<compile_context>
chip_gen: v7x
topology: tpu7x:2x2x1
jax: 0.10.0
libtpu: 0.0.40
codegen_flags: <defaults>
</compile_context>

<pallas_src>
import functools

import jax
import jax.numpy as jnp
from jax import lax
from jax.experimental import pallas as pl
from jax.experimental.pallas import tpu as pltpu

# ---- module "config" (deterministic, in-script) -----------------------------
IN_CHANS = 3            # SimMIM.in_chans
ENCODER_STRIDE = 4      # SimMIM.encoder_stride (PixelShuffle factor)
PATCH_SIZE = 4          # SimMIM.patch_size (mask repeat_interleave factor)
NUM_FEATURES = 32       # encoder.num_features
NORM_TARGET_ENABLE = True
NORM_TARGET_PATCH = 3   # config.NORM_TARGET.PATCH_SIZE (must be odd)


def _eq_mat(shape, pred):
    """Build a {0,1} float32 matrix E[r, c] = pred(row_iota, col_iota)."""
    ri = lax.broadcasted_iota(jnp.int32, shape, 0)
    ci = lax.broadcasted_iota(jnp.int32, shape, 1)
    return pred(ri, ci).astype(jnp.float32)


# ------------------------------- fused kernel --------------------------------
def _simmim_fused_kernel(x_ref, mask_ref, enc_w_ref, enc_b_ref, tok_ref,
                         dec_w_ref, dec_b_ref, num_ref, den_ref,
                         *, C, H, W, es, ps, knorm, norm_enable):
    f32 = jnp.float32
    Hp, Wp = H // es, W // es
    M = C * es * es                  # per-patch features == decoder out-chans per token
    es_shift = es.bit_length() - 1   # es is a power of two (asserted in the wrapper)

    x2 = x_ref[0]                    # (C*H, W)  channel-stacked image
    msk = mask_ref[0]                # (Hp, Wp)  {0,1} patch mask

    dot = functools.partial(jnp.dot, preferred_element_type=f32)

    # Selection matrices for the (channel c, row-offset i) plane:
    #   A[r, hp] = 1  iff  r == c*H + hp*es + i                              (C*H, Hp)
    #   B[k, w]  = 1  iff  k == (w//es)*M + c*es*es + i*es + (w % es)        (Wp*M, W)
    # x_spatial = sum_{c,i} A @ tokens @ B   and   tokens = sum_{c,i} A^T @ x_spatial @ B^T
    def sel_mats(c, i, transposed):
        off = c * es * es + i * es
        if transposed:
            A = _eq_mat((Hp, C * H), lambda hp, r: r == c * H + hp * es + i)
            B = _eq_mat((W, Wp * M),
                        lambda w, k: k == jnp.right_shift(w, es_shift) * M + off
                        + jnp.bitwise_and(w, es - 1))
        else:
            A = _eq_mat((C * H, Hp), lambda r, hp: r == c * H + hp * es + i)
            B = _eq_mat((Wp * M, W),
                        lambda k, w: k == jnp.right_shift(w, es_shift) * M + off
                        + jnp.bitwise_and(w, es - 1))
        return A, B

    # ---- 1) patch extraction (im2col) on the MXU:
    #         patches2[hp, wp*M + m] = x[c, hp*es+i, wp*es+j],  m = c*es*es + i*es + j
    patches2 = jnp.zeros((Hp, Wp * M), f32)
    for c in range(C):
        for i in range(es):
            At, Bt = sel_mats(c, i, transposed=True)
            patches2 = patches2 + dot(dot(At, x2), Bt)          # (Hp, W) -> (Hp, Wp*M)

    # ---- 2) encoder patch-embed + mask-token blend + 1x1-conv decoder,
    #         one token column (wp) at a time; everything stays on-chip.
    # TODO(synk): SimMIM's encoder is an injected module (e.g. Swin); this synthetic
    # patch-embed (conv k=s=encoder_stride) + mask-token stand-in keeps its output shape.
    enc_w = enc_w_ref[...]           # (M, F)
    enc_b = enc_b_ref[...]           # (1, F)
    tok = tok_ref[...]               # (1, F)  learned mask token
    dec_w = dec_w_ref[...]           # (F, M)  Conv2d(F -> es*es*3, k=1)
    dec_b = dec_b_ref[...]           # (1, M)

    dec2 = jnp.zeros((Hp, Wp * M), f32)
    for wp in range(Wp):
        p_wp = patches2[:, wp * M:(wp + 1) * M]                 # (Hp, M)
        z_wp = dot(p_wp, enc_w) + enc_b                         # (Hp, F)
        m_wp = msk[:, wp:wp + 1]                                # (Hp, 1)
        z_wp = z_wp * (1.0 - m_wp) + tok * m_wp                 # mask-token blend
        d_wp = dot(z_wp, dec_w) + dec_b                         # (Hp, M)
        place = _eq_mat((M, Wp * M), lambda k, col: col == wp * M + k)
        dec2 = dec2 + dot(d_wp, place)                          # scatter into column block

    # ---- 3) PixelShuffle(encoder_stride) on the MXU:
    #         x_rec[c, hp*es+i, wp*es+j] = dec2[hp, wp*M + c*es*es + i*es + j]
    xrec2 = jnp.zeros((C * H, W), f32)
    for c in range(C):
        for i in range(es):
            A, B = sel_mats(c, i, transposed=False)
            xrec2 = xrec2 + dot(A, dot(dec2, B))                # (Hp, W) -> (C*H, W)

    # ---- 4) mask.repeat_interleave(ps, 1).repeat_interleave(ps, 2), in-kernel
    R = _eq_mat((H, Hp), lambda h, hp: (h >= hp * ps) & (h < (hp + 1) * ps))
    Cw = _eq_mat((Wp, W), lambda wp, w: (w >= wp * ps) & (w < (wp + 1) * ps))
    mask_full = dot(dot(R, msk), Cw)                            # (H, W)

    # ---- 5) norm_targets: separable k x k box sums as banded matmuls,
    #         valid-neighbor counts computed analytically (no padded HBM inputs).
    p = knorm // 2
    Bh = _eq_mat((H, H), lambda a, b: (a - b <= p) & (b - a <= p))
    Bw = _eq_mat((W, W), lambda a, b: (a - b <= p) & (b - a <= p))
    cnt = (jnp.sum(Bh, axis=1, keepdims=True) *
           jnp.sum(Bw, axis=0, keepdims=True))                  # (H, W) valid-neighbor count
    inv_cnt = 1.0 / cnt                                         # count_include_pad=False divisor
    bessel = cnt / (cnt - 1.0)                                  # targets_count / (targets_count - 1)

    num = 0.0
    for c in range(C):
        xc = x2[c * H:(c + 1) * H, :]                           # (H, W)
        if norm_enable:
            s = dot(dot(Bh, xc), Bw)                            # window sums of x
            q = dot(dot(Bh, xc * xc), Bw)                       # window sums of x^2
            mean = s * inv_cnt
            var = (q * inv_cnt - mean * mean) * bessel
            var = jnp.maximum(var, 0.0)                         # torch.clamp(min=0)
            xt = (xc - mean) * lax.rsqrt(var + 1e-6)            # rsqrt -> EUP slot
        else:
            xt = xc
        diff = jnp.abs(xt - xrec2[c * H:(c + 1) * H, :])
        num = num + jnp.sum(diff * mask_full)
    den = jnp.sum(mask_full)

    num_ref[...] = num.reshape(1, 1, 1)
    den_ref[...] = den.reshape(1, 1, 1)


# ------------------------------- forward -------------------------------------
def simmim_forward(x, mask, params):
    B, C, H, W = x.shape
    es = ENCODER_STRIDE
    ps = PATCH_SIZE
    M, F = params["enc_w"].shape
    assert C == IN_CHANS == 3
    assert M == C * es * es
    assert (es & (es - 1)) == 0 and H % es == 0 and W % es == 0
    assert NORM_TARGET_PATCH % 2 == 1
    # TODO(synk): the synthetic encoder applies the mask per token, which requires the mask
    # grid to coincide with the token grid (PATCH_SIZE == ENCODER_STRIDE for this config).
    assert ps == es
    Hp, Wp = H // es, W // es

    x2d = x.reshape(B, C * H, W)             # free row-major view, no data movement
    mask_f = mask.astype(jnp.float32)

    kernel = functools.partial(
        _simmim_fused_kernel, C=C, H=H, W=W, es=es, ps=ps,
        knorm=NORM_TARGET_PATCH, norm_enable=NORM_TARGET_ENABLE)

    num, den = pl.pallas_call(
        kernel,
        out_shape=(jax.ShapeDtypeStruct((B, 1, 1), jnp.float32),
                   jax.ShapeDtypeStruct((B, 1, 1), jnp.float32)),
        grid_spec=pltpu.PrefetchScalarGridSpec(
            num_scalar_prefetch=0,
            grid=(B,),
            in_specs=[
                pl.BlockSpec((1, C * H, W), lambda b: (b, 0, 0)),   # image
                pl.BlockSpec((1, Hp, Wp), lambda b: (b, 0, 0)),     # patch mask
                pl.BlockSpec((M, F), lambda b: (0, 0)),             # enc_w
                pl.BlockSpec((1, F), lambda b: (0, 0)),             # enc_b
                pl.BlockSpec((1, F), lambda b: (0, 0)),             # mask_token
                pl.BlockSpec((F, M), lambda b: (0, 0)),             # dec_w
                pl.BlockSpec((1, M), lambda b: (0, 0)),             # dec_b
            ],
            out_specs=[
                pl.BlockSpec((1, 1, 1), lambda b: (b, 0, 0)),
                pl.BlockSpec((1, 1, 1), lambda b: (b, 0, 0)),
            ],
        ),
        compiler_params=pltpu.CompilerParams(
            dimension_semantics=("parallel",),
            vmem_limit_bytes=32 * 1024 * 1024,
        ),
    )(x2d, mask_f, params["enc_w"], params["enc_b"], params["mask_token"],
      params["dec_w"], params["dec_b"])

    # Tiny scalar combine (keeps the batch grid axis 'parallel' for megacore on v7x).
    loss = num.sum() / (den.sum() + 1e-5) / IN_CHANS
    return loss


def init_params(key):
    k1, k2, k3, k4 = jax.random.split(key, 4)
    es = ENCODER_STRIDE
    return {
        # synthetic patch-embed encoder weights; row m = c*es*es + i*es + j <-> conv W[f,c,i,j]
        "enc_w": 0.02 * jax.random.normal(k1, (IN_CHANS * es * es, NUM_FEATURES), jnp.float32),
        "enc_b": jnp.zeros((1, NUM_FEATURES), jnp.float32),
        "mask_token": 0.02 * jax.random.normal(k2, (1, NUM_FEATURES), jnp.float32),
        # decoder Conv2d(num_features -> es**2 * 3, kernel_size=1); col oc = c*es*es + i*es + j
        "dec_w": 0.02 * jax.random.normal(k3, (NUM_FEATURES, es * es * 3), jnp.float32),
        "dec_b": 0.01 * jax.random.normal(k4, (1, es * es * 3), jnp.float32),
    }


# ---------------------- pure-JAX reference (for sanity) ----------------------
def _simmim_reference(x, mask, params):
    B, C, H, W = x.shape
    es, ps = ENCODER_STRIDE, PATCH_SIZE
    Hp, Wp = H // es, W // es
    patches = (x.reshape(B, C, Hp, es, Wp, es)
                 .transpose(0, 2, 4, 1, 3, 5)
                 .reshape(B, Hp * Wp, C * es * es))
    z = patches @ params["enc_w"] + params["enc_b"]
    m_tok = mask.reshape(B, Hp * Wp, 1).astype(jnp.float32)
    z = z * (1.0 - m_tok) + params["mask_token"] * m_tok
    dec = z @ params["dec_w"] + params["dec_b"]
    x_rec = (dec.reshape(B, Hp, Wp, 3, es, es)
                .transpose(0, 3, 1, 4, 2, 5)
                .reshape(B, 3, H, W))
    mask_full = jnp.repeat(jnp.repeat(mask.astype(jnp.float32), ps, 1), ps, 2)[:, None]
    if NORM_TARGET_ENABLE:
        k = NORM_TARGET_PATCH
        p = k // 2
        xpad = jnp.pad(x, ((0, 0), (0, 0), (p, p), (p, p)))
        cpad = jnp.pad(jnp.ones_like(x), ((0, 0), (0, 0), (p, p), (p, p)))
        s = sum(xpad[:, :, dy:dy + H, dx:dx + W] for dy in range(k) for dx in range(k))
        q = sum(xpad[:, :, dy:dy + H, dx:dx + W] ** 2 for dy in range(k) for dx in range(k))
        cnt = sum(cpad[:, :, dy:dy + H, dx:dx + W] for dy in range(k) for dx in range(k))
        mean = s / cnt
        var = (q / cnt - mean ** 2) * (cnt / (cnt - 1.0))
        var = jnp.maximum(var, 0.0)
        x_t = (x - mean) / jnp.sqrt(var + 1e-6)
    else:
        x_t = x
    diff = jnp.abs(x_t - x_rec)
    return (diff * mask_full).sum() / (mask_full.sum() + 1e-5) / IN_CHANS


if __name__ == "__main__":
    key = jax.random.PRNGKey(0)
    kx, km, kp = jax.random.split(key, 3)

    B, H, W = 2, 16, 16
    x = jax.random.normal(kx, (B, IN_CHANS, H, W), jnp.float32)
    mask = jax.random.bernoulli(
        km, 0.5, (B, H // PATCH_SIZE, W // PATCH_SIZE)).astype(jnp.float32)
    params = init_params(kp)

    loss = jax.jit(simmim_forward)(x, mask, params)
    jax.block_until_ready(loss)

    ref = _simmim_reference(x, mask, params)
    assert loss.shape == () and bool(jnp.isfinite(loss))
    assert bool(jnp.allclose(loss, ref, rtol=5e-2, atol=5e-2)), (float(loss), float(ref))
    print("KERNEL_OK")
</pallas_src>

<mosaic_0001>
module attributes {stable_mosaic.version = 11 : i64} {
  func.func @_simmim_fused_kernel(%arg0: i32, %arg1: memref<1x48x16xf32, #tpu.memory_space<vmem>>, %arg2: memref<1x4x4xf32, #tpu.memory_space<vmem>>, %arg3: memref<48x32xf32, #tpu.memory_space<vmem>>, %arg4: memref<1x32xf32, #tpu.memory_space<vmem>>, %arg5: memref<1x32xf32, #tpu.memory_space<vmem>>, %arg6: memref<32x48xf32, #tpu.memory_space<vmem>>, %arg7: memref<1x48xf32, #tpu.memory_space<vmem>>, %arg8: memref<1x1x1xf32, #tpu.memory_space<vmem>>, %arg9: memref<1x1x1xf32, #tpu.memory_space<vmem>>) attributes {dimension_semantics = [#tpu.dimension_semantics<parallel>], iteration_bounds = array<i64: 2>, scalar_prefetch = 0 : i64, scratch_operands = 0 : i64, tpu.core_type = #tpu.core_type<tc>, window_params = [{transform_indices = @transform_0, window_bounds = array<i64: 1, 48, 16>}, {transform_indices = @transform_1, window_bounds = array<i64: 1, 4, 4>}, {pipeline_mode = #tpu.pipeline_mode<synchronous>, transform_indices = @transform_2, window_bounds = array<i64: 48, 32>}, {pipeline_mode = #tpu.pipeline_mode<synchronous>, transform_indices = @transform_3, window_bounds = array<i64: 1, 32>}, {pipeline_mode = #tpu.pipeline_mode<synchronous>, transform_indices = @transform_4, window_bounds = array<i64: 1, 32>}, {pipeline_mode = #tpu.pipeline_mode<synchronous>, transform_indices = @transform_5, window_bounds = array<i64: 32, 48>}, {pipeline_mode = #tpu.pipeline_mode<synchronous>, transform_indices = @transform_6, window_bounds = array<i64: 1, 48>}, {transform_indices = @transform_7, window_bounds = array<i64: 1, 1, 1>}, {transform_indices = @transform_8, window_bounds = array<i64: 1, 1, 1>}]} {
    %c0 = arith.constant 0 : index
    %c0_0 = arith.constant 0 : index
    %c0_1 = arith.constant 0 : index
    %0 = vector.load %arg1[%c0, %c0_0, %c0_1] : memref<1x48x16xf32, #tpu.memory_space<vmem>>, vector<1x48x16xf32>
    %1 = vector.shape_cast %0 : vector<1x48x16xf32> to vector<48x16xf32>
    %c0_2 = arith.constant 0 : index
    %c0_3 = arith.constant 0 : index
    %c0_4 = arith.constant 0 : index
    %2 = vector.load %arg2[%c0_2, %c0_3, %c0_4] : memref<1x4x4xf32, #tpu.memory_space<vmem>>, vector<1x4x4xf32>
    %3 = vector.shape_cast %2 : vector<1x4x4xf32> to vector<4x4xf32>
    %cst = arith.constant 0.000000e+00 : f32
    %4 = vector.broadcast %cst : f32 to vector<4x192xf32>
    %5 = tpu.iota {dimensions = array<i32: 0>} : vector<4x48xi32>
    %6 = tpu.iota {dimensions = array<i32: 1>} : vector<4x48xi32>
    %c4_i32 = arith.constant 4 : i32
    %7 = vector.broadcast %c4_i32 : i32 to vector<4x48xi32>
    %8 = arith.muli %5, %7 : vector<4x48xi32>
    %c0_i32 = arith.constant 0 : i32
    %9 = vector.broadcast %c0_i32 : i32 to vector<4x48xi32>
    %10 = arith.addi %9, %8 : vector<4x48xi32>
    %c0_i32_5 = arith.constant 0 : i32
    %11 = vector.broadcast %c0_i32_5 : i32 to vector<4x48xi32>
    %12 = arith.addi %10, %11 : vector<4x48xi32>
    %13 = arith.cmpi eq, %6, %12 : vector<4x48xi32>
    %14 = arith.extui %13 : vector<4x48xi1> to vector<4x48xi32>
    %15 = arith.sitofp %14 : vector<4x48xi32> to vector<4x48xf32>
    %16 = tpu.iota {dimensions = array<i32: 0>} : vector<16x192xi32>
    %17 = tpu.iota {dimensions = array<i32: 1>} : vector<16x192xi32>
    %c2_i32 = arith.constant 2 : i32
    %18 = vector.broadcast %c2_i32 : i32 to vector<16x192xi32>
    %19 = arith.shrsi %16, %18 : vector<16x192xi32>
    %c48_i32 = arith.constant 48 : i32
    %20 = vector.broadcast %c48_i32 : i32 to vector<16x192xi32>
    %21 = arith.muli %19, %20 : vector<16x192xi32>
    %c0_i32_6 = arith.constant 0 : i32
    %22 = vector.broadcast %c0_i32_6 : i32 to vector<16x192xi32>
    %23 = arith.addi %21, %22 : vector<16x192xi32>
    %c3_i32 = arith.constant 3 : i32
    %24 = vector.broadcast %c3_i32 : i32 to vector<16x192xi32>
    %25 = arith.andi %16, %24 : vector<16x192xi32>
    %26 = arith.addi %23, %25 : vector<16x192xi32>
    %27 = arith.cmpi eq, %17, %26 : vector<16x192xi32>
    %28 = arith.extui %27 : vector<16x192xi1> to vector<16x192xi32>
    %29 = arith.sitofp %28 : vector<16x192xi32> to vector<16x192xf32>
    %cst_7 = arith.constant dense<0.000000e+00> : vector<4x16xf32>
    %30 = tpu.matmul %15, %1, %cst_7 {dimension_numbers = #tpu.dot_dimension_numbers<[1], [0], [0], [1], [0, 0, 1, 1], [], []>} : vector<4x48xf32>, vector<48x16xf32>, vector<4x16xf32> -> vector<4x16xf32>
    %cst_8 = arith.constant dense<0.000000e+00> : vector<4x192xf32>
    %31 = tpu.matmul %30, %29, %cst_8 {dimension_numbers = #tpu.dot_dimension_numbers<[1], [0], [0], [1], [0, 0, 1, 1], [], []>} : vector<4x16xf32>, vector<16x192xf32>, vector<4x192xf32> -> vector<4x192xf32>
    %32 = arith.addf %4, %31 : vector<4x192xf32>
    %33 = tpu.iota {dimensions = array<i32: 0>} : vector<4x48xi32>
    %34 = tpu.iota {dimensions = array<i32: 1>} : vector<4x48xi32>
    %c4_i32_9 = arith.constant 4 : i32
    %35 = vector.broadcast %c4_i32_9 : i32 to vector<4x48xi32>
    %36 = arith.muli %33, %35 : vector<4x48xi32>
    %c0_i32_10 = arith.constant 0 : i32
    %37 = vector.broadcast %c0_i32_10 : i32 to vector<4x48xi32>
    %38 = arith.addi %37, %36 : vector<4x48xi32>
    %c1_i32 = arith.constant 1 : i32
    %39 = vector.broadcast %c1_i32 : i32 to vector<4x48xi32>
    %40 = arith.addi %38, %39 : vector<4x48xi32>
    %41 = arith.cmpi eq, %34, %40 : vector<4x48xi32>
    %42 = arith.extui %41 : vector<4x48xi1> to vector<4x48xi32>
    %43 = arith.sitofp %42 : vector<4x48xi32> to vector<4x48xf32>
    %44 = tpu.iota {dimensions = array<i32: 0>} : vector<16x192xi32>
    %45 = tpu.iota {dimensions = array<i32: 1>} : vector<16x192xi32>
    %c2_i32_11 = arith.constant 2 : i32
    %46 = vector.broadcast %c2_i32_11 : i32 to vector<16x192xi32>
    %47 = arith.shrsi %44, %46 : vector<16x192xi32>
    %c48_i32_12 = arith.constant 48 : i32
    %48 = vector.broadcast %c48_i32_12 : i32 to vector<16x192xi32>
    %49 = arith.muli %47, %48 : vector<16x192xi32>
    %c4_i32_13 = arith.constant 4 : i32
    %50 = vector.broadcast %c4_i32_13 : i32 to vector<16x192xi32>
    %51 = arith.addi %49, %50 : vector<16x192xi32>
    %c3_i32_14 = arith.constant 3 : i32
    %52 = vector.broadcast %c3_i32_14 : i32 to vector<16x192xi32>
    %53 = arith.andi %44, %52 : vector<16x192xi32>
    %54 = arith.addi %51, %53 : vector<16x192xi32>
    %55 = arith.cmpi eq, %45, %54 : vector<16x192xi32>
    %56 = arith.extui %55 : vector<16x192xi1> to vector<16x192xi32>
    %57 = arith.sitofp %56 : vector<16x192xi32> to vector<16x192xf32>
    %cst_15 = arith.constant dense<0.000000e+00> : vector<4x16xf32>
    %58 = tpu.matmul %43, %1, %cst_15 {dimension_numbers = #tpu.dot_dimension_numbers<[1], [0], [0], [1], [0, 0, 1, 1], [], []>} : vector<4x48xf32>, vector<48x16xf32>, vector<4x16xf32> -> vector<4x16xf32>
    %cst_16 = arith.constant dense<0.000000e+00> : vector<4x192xf32>
    %59 = tpu.matmul %58, %57, %cst_16 {dimension_numbers = #tpu.dot_dimension_numbers<[1], [0], [0], [1], [0, 0, 1, 1], [], []>} : vector<4x16xf32>, vector<16x192xf32>, vector<4x192xf32> -> vector<4x192xf32>
    %60 = arith.addf %32, %59 : vector<4x192xf32>
    %61 = tpu.iota {dimensions = array<i32: 0>} : vector<4x48xi32>
    %62 = tpu.iota {dimensions = array<i32: 1>} : vector<4x48xi32>
    %c4_i32_17 = arith.constant 4 : i32
    %63 = vector.broadcast %c4_i32_17 : i32 to vector<4x48xi32>
    %64 = arith.muli %61, %63 : vector<4x48xi32>
    %c0_i32_18 = arith.constant 0 : i32
    %65 = vector.broadcast %c0_i32_18 : i32 to vector<4x48xi32>
    %66 = arith.addi %65, %64 : vector<4x48xi32>
    %c2_i32_19 = arith.constant 2 : i32
    %67 = vector.broadcast %c2_i32_19 : i32 to vector<4x48xi32>
    %68 = arith.addi %66, %67 : vector<4x48xi32>
    %69 = arith.cmpi eq, %62, %68 : vector<4x48xi32>
    %70 = arith.extui %69 : vector<4x48xi1> to vector<4x48xi32>
    %71 = arith.sitofp %70 : vector<4x48xi32> to vector<4x48xf32>
    %72 = tpu.iota {dimensions = array<i32: 0>} : vector<16x192xi32>
    %73 = tpu.iota {dimensions = array<i32: 1>} : vector<16x192xi32>
    %c2_i32_20 = arith.constant 2 : i32
    %74 = vector.broadcast %c2_i32_20 : i32 to vector<16x192xi32>
    %75 = arith.shrsi %72, %74 : vector<16x192xi32>
    %c48_i32_21 = arith.constant 48 : i32
    %76 = vector.broadcast %c48_i32_21 : i32 to vector<16x192xi32>
    %77 = arith.muli %75, %76 : vector<16x192xi32>
    %c8_i32 = arith.constant 8 : i32
    %78 = vector.broadcast %c8_i32 : i32 to vector<16x192xi32>
    %79 = arith.addi %77, %78 : vector<16x192xi32>
    %c3_i32_22 = arith.constant 3 : i32
    %80 = vector.broadcast %c3_i32_22 : i32 to vector<16x192xi32>
    %81 = arith.andi %72, %80 : vector<16x192xi32>
    %82 = arith.addi %79, %81 : vector<16x192xi32>
    %83 = arith.cmpi eq, %73, %82 : vector<16x192xi32>
    %84 = arith.extui %83 : vector<16x192xi1> to vector<16x192xi32>
    %85 = arith.sitofp %84 : vector<16x192xi32> to vector<16x192xf32>
    %cst_23 = arith.constant dense<0.000000e+00> : vector<4x16xf32>
    %86 = tpu.matmul %71, %1, %cst_23 {dimension_numbers = #tpu.dot_dimension_numbers<[1], [0], [0], [1], [0, 0, 1, 1], [], []>} : vector<4x48xf32>, vector<48x16xf32>, vector<4x16xf32> -> vector<4x16xf32>
    %cst_24 = arith.constant dense<0.000000e+00> : vector<4x192xf32>
    %87 = tpu.matmul %86, %85, %cst_24 {dimension_numbers = #tpu.dot_dimension_numbers<[1], [0], [0], [1], [0, 0, 1, 1], [], []>} : vector<4x16xf32>, vector<16x192xf32>, vector<4x192xf32> -> vector<4x192xf32>
    %88 = arith.addf %60, %87 : vector<4x192xf32>
    %89 = tpu.iota {dimensions = array<i32: 0>} : vector<4x48xi32>
    %90 = tpu.iota {dimensions = array<i32: 1>} : vector<4x48xi32>
    %c4_i32_25 = arith.constant 4 : i32
    %91 = vector.broadcast %c4_i32_25 : i32 to vector<4x48xi32>
    %92 = arith.muli %89, %91 : vector<4x48xi32>
    %c0_i32_26 = arith.constant 0 : i32
    %93 = vector.broadcast %c0_i32_26 : i32 to vector<4x48xi32>
    %94 = arith.addi %93, %92 : vector<4x48xi32>
    %c3_i32_27 = arith.constant 3 : i32
    %95 = vector.broadcast %c3_i32_27 : i32 to vector<4x48xi32>
    %96 = arith.addi %94, %95 : vector<4x48xi32>
    %97 = arith.cmpi eq, %90, %96 : vector<4x48xi32>
    %98 = arith.extui %97 : vector<4x48xi1> to vector<4x48xi32>
    %99 = arith.sitofp %98 : vector<4x48xi32> to vector<4x48xf32>
    %100 = tpu.iota {dimensions = array<i32: 0>} : vector<16x192xi32>
    %101 = tpu.iota {dimensions = array<i32: 1>} : vector<16x192xi32>
    %c2_i32_28 = arith.constant 2 : i32
    %102 = vector.broadcast %c2_i32_28 : i32 to vector<16x192xi32>
    %103 = arith.shrsi %100, %102 : vector<16x192xi32>
    %c48_i32_29 = arith.constant 48 : i32
    %104 = vector.broadcast %c48_i32_29 : i32 to vector<16x192xi32>
    %105 = arith.muli %103, %104 : vector<16x192xi32>
    %c12_i32 = arith.constant 12 : i32
    %106 = vector.broadcast %c12_i32 : i32 to vector<16x192xi32>
    %107 = arith.addi %105, %106 : vector<16x192xi32>
    %c3_i32_30 = arith.constant 3 : i32
    %108 = vector.broadcast %c3_i32_30 : i32 to vector<16x192xi32>
    %109 = arith.andi %100, %108 : vector<16x192xi32>
    %110 = arith.addi %107, %109 : vector<16x192xi32>
    %111 = arith.cmpi eq, %101, %110 : vector<16x192xi32>
    %112 = arith.extui %111 : vector<16x192xi1> to vector<16x192xi32>
    %113 = arith.sitofp %112 : vector<16x192xi32> to vector<16x192xf32>
    %cst_31 = arith.constant dense<0.000000e+00> : vector<4x16xf32>
    %114 = tpu.matmul %99, %1, %cst_31 {dimension_numbers = #tpu.dot_dimension_numbers<[1], [0], [0], [1], [0, 0, 1, 1], [], []>} : vector<4x48xf32>, vector<48x16xf32>, vector<4x16xf32> -> vector<4x16xf32>
    %cst_32 = arith.constant dense<0.000000e+00> : vector<4x192xf32>
    %115 = tpu.matmul %114, %113, %cst_32 {dimension_numbers = #tpu.dot_dimension_numbers<[1], [0], [0], [1], [0, 0, 1, 1], [], []>} : vector<4x16xf32>, vector<16x192xf32>, vector<4x192xf32> -> vector<4x192xf32>
    %116 = arith.addf %88, %115 : vector<4x192xf32>
    %117 = tpu.iota {dimensions = array<i32: 0>} : vector<4x48xi32>
    %118 = tpu.iota {dimensions = array<i32: 1>} : vector<4x48xi32>
    %c4_i32_33 = arith.constant 4 : i32
    %119 = vector.broadcast %c4_i32_33 : i32 to vector<4x48xi32>
    %120 = arith.muli %117, %119 : vector<4x48xi32>
    %c16_i32 = arith.constant 16 : i32
    %121 = vector.broadcast %c16_i32 : i32 to vector<4x48xi32>
    %122 = arith.addi %121, %120 : vector<4x48xi32>
    %c0_i32_34 = arith.constant 0 : i32
    %123 = vector.broadcast %c0_i32_34 : i32 to vector<4x48xi32>
    %124 = arith.addi %122, %123 : vector<4x48xi32>
    %125 = arith.cmpi eq, %118, %124 : vector<4x48xi32>
    %126 = arith.extui %125 : vector<4x48xi1> to vector<4x48xi32>
    %127 = arith.sitofp %126 : vector<4x48xi32> to vector<4x48xf32>
    %128 = tpu.iota {dimensions = array<i32: 0>} : vector<16x192xi32>
    %129 = tpu.iota {dimensions = array<i32: 1>} : vector<16x192xi32>
    %c2_i32_35 = arith.constant 2 : i32
    %130 = vector.broadcast %c2_i32_35 : i32 to vector<16x192xi32>
    %131 = arith.shrsi %128, %130 : vector<16x192xi32>
    %c48_i32_36 = arith.constant 48 : i32
    %132 = vector.broadcast %c48_i32_36 : i32 to vector<16x192xi32>
    %133 = arith.muli %131, %132 : vector<16x192xi32>
    %c16_i32_37 = arith.constant 16 : i32
    %134 = vector.broadcast %c16_i32_37 : i32 to vector<16x192xi32>
    %135 = arith.addi %133, %134 : vector<16x192xi32>
    %c3_i32_38 = arith.constant 3 : i32
    %136 = vector.broadcast %c3_i32_38 : i32 to vector<16x192xi32>
    %137 = arith.andi %128, %136 : vector<16x192xi32>
    %138 = arith.addi %135, %137 : vector<16x192xi32>
    %139 = arith.cmpi eq, %129, %138 : vector<16x192xi32>
    %140 = arith.extui %139 : vector<16x192xi1> to vector<16x192xi32>
    %141 = arith.sitofp %140 : vector<16x192xi32> to vector<16x192xf32>
    %cst_39 = arith.constant dense<0.000000e+00> : vector<4x16xf32>
    %142 = tpu.matmul %127, %1, %cst_39 {dimension_numbers = #tpu.dot_dimension_numbers<[1], [0], [0], [1], [0, 0, 1, 1], [], []>} : vector<4x48xf32>, vector<48x16xf32>, vector<4x16xf32> -> vector<4x16xf32>
    %cst_40 = arith.constant dense<0.000000e+00> : vector<4x192xf32>
    %143 = tpu.matmul %142, %141, %cst_40 {dimension_numbers = #tpu.dot_dimension_numbers<[1], [0], [0], [1], [0, 0, 1, 1], [], []>} : vector<4x16xf32>, vector<16x192xf32>, vector<4x192xf32> -> vector<4x192xf32>
    %144 = arith.addf %116, %143 : vector<4x192xf32>
    %145 = tpu.iota {dimensions = array<i32: 0>} : vector<4x48xi32>
    %146 = tpu.iota {dimensions = array<i32: 1>} : vector<4x48xi32>
    %c4_i32_41 = arith.constant 4 : i32
    %147 = vector.broadcast %c4_i32_41 : i32 to vector<4x48xi32>
    %148 = arith.muli %145, %147 : vector<4x48xi32>
    %c16_i32_42 = arith.constant 16 : i32
    %149 = vector.broadcast %c16_i32_42 : i32 to vector<4x48xi32>
    %150 = arith.addi %149, %148 : vector<4x48xi32>
    %c1_i32_43 = arith.constant 1 : i32
    %151 = vector.broadcast %c1_i32_43 : i32 to vector<4x48xi32>
    %152 = arith.addi %150, %151 : vector<4x48xi32>
    %153 = arith.cmpi eq, %146, %152 : vector<4x48xi32>
    %154 = arith.extui %153 : vector<4x48xi1> to vector<4x48xi32>
    %155 = arith.sitofp %154 : vector<4x48xi32> to vector<4x48xf32>
    %156 = tpu.iota {dimensions = array<i32: 0>} : vector<16x192xi32>
    %157 = tpu.iota {dimensions = array<i32: 1>} : vector<16x192xi32>
    %c2_i32_44 = arith.constant 2 : i32
    %158 = vector.broadcast %c2_i32_44 : i32 to vector<16x192xi32>
    %159 = arith.shrsi %156, %158 : vector<16x192xi32>
    %c48_i32_45 = arith.constant 48 : i32
    %160 = vector.broadcast %c48_i32_45 : i32 to vector<16x192xi32>
    %161 = arith.muli %159, %160 : vector<16x192xi32>
    %c20_i32 = arith.constant 20 : i32
    %162 = vector.broadcast %c20_i32 : i32 to vector<16x192xi32>
    %163 = arith.addi %161, %162 : vector<16x192xi32>
    %c3_i32_46 = arith.constant 3 : i32
    %164 = vector.broadcast %c3_i32_46 : i32 to vector<16x192xi32>
    %165 = arith.andi %156, %164 : vector<16x192xi32>
    %166 = arith.addi %163, %165 : vector<16x192xi32>
    %167 = arith.cmpi eq, %157, %166 : vector<16x192xi32>
    %168 = arith.extui %167 : vector<16x192xi1> to vector<16x192xi32>
    %169 = arith.sitofp %168 : vector<16x192xi32> to vector<16x192xf32>
    %cst_47 = arith.constant dense<0.000000e+00> : vector<4x16xf32>
    %170 = tpu.matmul %155, %1, %cst_47 {dimension_numbers = #tpu.dot_dimension_numbers<[1], [0], [0], [1], [0, 0, 1, 1], [], []>} : vector<4x48xf32>, vector<48x16xf32>, vector<4x16xf32> -> vector<4x16xf32>
    %cst_48 = arith.constant dense<0.000000e+00> : vector<4x192xf32>
    %171 = tpu.matmul %170, %169, %cst_48 {dimension_numbers = #tpu.dot_dimension_numbers<[1], [0], [0], [1], [0, 0, 1, 1], [], []>} : vector<4x16xf32>, vector<16x192xf32>, vector<4x192xf32> -> vector<4x192xf32>
    %172 = arith.addf %144, %171 : vector<4x192xf32>
    %173 = tpu.iota {dimensions = array<i32: 0>} : vector<4x48xi32>
    %174 = tpu.iota {dimensions = array<i32: 1>} : vector<4x48xi32>
    %c4_i32_49 = arith.constant 4 : i32
    %175 = vector.broadcast %c4_i32_49 : i32 to vector<4x48xi32>
    %176 = arith.muli %173, %175 : vector<4x48xi32>
    %c16_i32_50 = arith.constant 16 : i32
    %177 = vector.broadcast %c16_i32_50 : i32 to vector<4x48xi32>
    %178 = arith.addi %177, %176 : vector<4x48xi32>
    %c2_i32_51 = arith.constant 2 : i32
    %179 = vector.broadcast %c2_i32_51 : i32 to vector<4x48xi32>
    %180 = arith.addi %178, %179 : vector<4x48xi32>
    %181 = arith.cmpi eq, %174, %180 : vector<4x48xi32>
    %182 = arith.extui %181 : vector<4x48xi1> to vector<4x48xi32>
    %183 = arith.sitofp %182 : vector<4x48xi32> to vector<4x48xf32>
    %184 = tpu.iota {dimensions = array<i32: 0>} : vector<16x192xi32>
    %185 = tpu.iota {dimensions = array<i32: 1>} : vector<16x192xi32>
    %c2_i32_52 = arith.constant 2 : i32
    %186 = vector.broadcast %c2_i32_52 : i32 to vector<16x192xi32>
    %187 = arith.shrsi %184, %186 : vector<16x192xi32>
    %c48_i32_53 = arith.constant 48 : i32
    %188 = vector.broadcast %c48_i32_53 : i32 to vector<16x192xi32>
    %189 = arith.muli %187, %188 : vector<16x192xi32>
    %c24_i32 = arith.constant 24 : i32
    %190 = vector.broadcast %c24_i32 : i32 to vector<16x192xi32>
    %191 = arith.addi %189, %190 : vector<16x192xi32>
    %c3_i32_54 = arith.constant 3 : i32
    %192 = vector.broadcast %c3_i32_54 : i32 to vector<16x192xi32>
    %193 = arith.andi %184, %192 : vector<16x192xi32>
    %194 = arith.addi %191, %193 : vector<16x192xi32>
    %195 = arith.cmpi eq, %185, %194 : vector<16x192xi32>
    %196 = arith.extui %195 : vector<16x192xi1> to vector<16x192xi32>
    %197 = arith.sitofp %196 : vector<16x192xi32> to vector<16x192xf32>
    %cst_55 = arith.constant dense<0.000000e+00> : vector<4x16xf32>
    %198 = tpu.matmul %183, %1, %cst_55 {dimension_numbers = #tpu.dot_dimension_numbers<[1], [0], [0], [1], [0, 0, 1, 1], [], []>} : vector<4x48xf32>, vector<48x16xf32>, vector<4x16xf32> -> vector<4x16xf32>
    %cst_56 = arith.constant dense<0.000000e+00> : vector<4x192xf32>
    %199 = tpu.matmul %198, %197, %cst_56 {dimension_numbers = #tpu.dot_dimension_numbers<[1], [0], [0], [1], [0, 0, 1, 1], [], []>} : vector<4x16xf32>, vector<16x192xf32>, vector<4x192xf32> -> vector<4x192xf32>
    %200 = arith.addf %172, %199 : vector<4x192xf32>
    %201 = tpu.iota {dimensions = array<i32: 0>} : vector<4x48xi32>
    %202 = tpu.iota {dimensions = array<i32: 1>} : vector<4x48xi32>
    %c4_i32_57 = arith.constant 4 : i32
    %203 = vector.broadcast %c4_i32_57 : i32 to vector<4x48xi32>
    %204 = arith.muli %201, %203 : vector<4x48xi32>
    %c16_i32_58 = arith.constant 16 : i32
    %205 = vector.broadcast %c16_i32_58 : i32 to vector<4x48xi32>
    %206 = arith.addi %205, %204 : vector<4x48xi32>
    %c3_i32_59 = arith.constant 3 : i32
    %207 = vector.broadcast %c3_i32_59 : i32 to vector<4x48xi32>
    %208 = arith.addi %206, %207 : vector<4x48xi32>
    %209 = arith.cmpi eq, %202, %208 : vector<4x48xi32>
    %210 = arith.extui %209 : vector<4x48xi1> to vector<4x48xi32>
    %211 = arith.sitofp %210 : vector<4x48xi32> to vector<4x48xf32>
    %212 = tpu.iota {dimensions = array<i32: 0>} : vector<16x192xi32>
    %213 = tpu.iota {dimensions = array<i32: 1>} : vector<16x192xi32>
    %c2_i32_60 = arith.constant 2 : i32
    %214 = vector.broadcast %c2_i32_60 : i32 to vector<16x192xi32>
    %215 = arith.shrsi %212, %214 : vector<16x192xi32>
    %c48_i32_61 = arith.constant 48 : i32
    %216 = vector.broadcast %c48_i32_61 : i32 to vector<16x192xi32>
    %217 = arith.muli %215, %216 : vector<16x192xi32>
    %c28_i32 = arith.constant 28 : i32
    %218 = vector.broadcast %c28_i32 : i32 to vector<16x192xi32>
    %219 = arith.addi %217, %218 : vector<16x192xi32>
    %c3_i32_62 = arith.constant 3 : i32
    %220 = vector.broadcast %c3_i32_62 : i32 to vector<16x192xi32>
    %221 = arith.andi %212, %220 : vector<16x192xi32>
    %222 = arith.addi %219, %221 : vector<16x192xi32>
    %223 = arith.cmpi eq, %213, %222 : vector<16x192xi32>
    %224 = arith.extui %223 : vector<16x192xi1> to vector<16x192xi32>
    %225 = arith.sitofp %224 : vector<16x192xi32> to vector<16x192xf32>
    %cst_63 = arith.constant dense<0.000000e+00> : vector<4x16xf32>
    %226 = tpu.matmul %211, %1, %cst_63 {dimension_numbers = #tpu.dot_dimension_numbers<[1], [0], [0], [1], [0, 0, 1, 1], [], []>} : vector<4x48xf32>, vector<48x16xf32>, vector<4x16xf32> -> vector<4x16xf32>
    %cst_64 = arith.constant dense<0.000000e+00> : vector<4x192xf32>
    %227 = tpu.matmul %226, %225, %cst_64 {dimension_numbers = #tpu.dot_dimension_numbers<[1], [0], [0], [1], [0, 0, 1, 1], [], []>} : vector<4x16xf32>, vector<16x192xf32>, vector<4x192xf32> -> vector<4x192xf32>
    %228 = arith.addf %200, %227 : vector<4x192xf32>
    %229 = tpu.iota {dimensions = array<i32: 0>} : vector<4x48xi32>
    %230 = tpu.iota {dimensions = array<i32: 1>} : vector<4x48xi32>
    %c4_i32_65 = arith.constant 4 : i32
    %231 = vector.broadcast %c4_i32_65 : i32 to vector<4x48xi32>
    %232 = arith.muli %229, %231 : vector<4x48xi32>
    %c32_i32 = arith.constant 32 : i32
    %233 = vector.broadcast %c32_i32 : i32 to vector<4x48xi32>
    %234 = arith.addi %233, %232 : vector<4x48xi32>
    %c0_i32_66 = arith.constant 0 : i32
    %235 = vector.broadcast %c0_i32_66 : i32 to vector<4x48xi32>
    %236 = arith.addi %234, %235 : vector<4x48xi32>
    %237 = arith.cmpi eq, %230, %236 : vector<4x48xi32>
    %238 = arith.extui %237 : vector<4x48xi1> to vector<4x48xi32>
    %239 = arith.sitofp %238 : vector<4x48xi32> to vector<4x48xf32>
    %240 = tpu.iota {dimensions = array<i32: 0>} : vector<16x192xi32>
    %241 = tpu.iota {dimensions = array<i32: 1>} : vector<16x192xi32>
    %c2_i32_67 = arith.constant 2 : i32
    %242 = vector.broadcast %c2_i32_67 : i32 to vector<16x192xi32>
    %243 = arith.shrsi %240, %242 : vector<16x192xi32>
    %c48_i32_68 = arith.constant 48 : i32
    %244 = vector.broadcast %c48_i32_68 : i32 to vector<16x192xi32>
    %245 = arith.muli %243, %244 : vector<16x192xi32>
    %c32_i32_69 = arith.constant 32 : i32
    %246 = vector.broadcast %c32_i32_69 : i32 to vector<16x192xi32>
    %247 = arith.addi %245, %246 : vector<16x192xi32>
    %c3_i32_70 = arith.constant 3 : i32
    %248 = vector.broadcast %c3_i32_70 : i32 to vector<16x192xi32>
    %249 = arith.andi %240, %248 : vector<16x192xi32>
    %250 = arith.addi %247, %249 : vector<16x192xi32>
    %251 = arith.cmpi eq, %241, %250 : vector<16x192xi32>
    %252 = arith.extui %251 : vector<16x192xi1> to vector<16x192xi32>
    %253 = arith.sitofp %252 : vector<16x192xi32> to vector<16x192xf32>
    %cst_71 = arith.constant dense<0.000000e+00> : vector<4x16xf32>
    %254 = tpu.matmul %239, %1, %cst_71 {dimension_numbers = #tpu.dot_dimension_numbers<[1], [0], [0], [1], [0, 0, 1, 1], [], []>} : vector<4x48xf32>, vector<48x16xf32>, vector<4x16xf32> -> vector<4x16xf32>
    %cst_72 = arith.constant dense<0.000000e+00> : vector<4x192xf32>
    %255 = tpu.matmul %254, %253, %cst_72 {dimension_numbers = #tpu.dot_dimension_numbers<[1], [0], [0], [1], [0, 0, 1, 1], [], []>} : vector<4x16xf32>, vector<16x192xf32>, vector<4x192xf32> -> vector<4x192xf32>
    %256 = arith.addf %228, %255 : vector<4x192xf32>
    %257 = tpu.iota {dimensions = array<i32: 0>} : vector<4x48xi32>
    %258 = tpu.iota {dimensions = array<i32: 1>} : vector<4x48xi32>
    %c4_i32_73 = arith.constant 4 : i32
    %259 = vector.broadcast %c4_i32_73 : i32 to vector<4x48xi32>
    %260 = arith.muli %257, %259 : vector<4x48xi32>
    %c32_i32_74 = arith.constant 32 : i32
    %261 = vector.broadcast %c32_i32_74 : i32 to vector<4x48xi32>
    %262 = arith.addi %261, %260 : vector<4x48xi32>
    %c1_i32_75 = arith.constant 1 : i32
    %263 = vector.broadcast %c1_i32_75 : i32 to vector<4x48xi32>
    %264 = arith.addi %262, %263 : vector<4x48xi32>
    %265 = arith.cmpi eq, %258, %264 : vector<4x48xi32>
    %266 = arith.extui %265 : vector<4x48xi1> to vector<4x48xi32>
    %267 = arith.sitofp %266 : vector<4x48xi32> to vector<4x48xf32>
    %268 = tpu.iota {dimensions = array<i32: 0>} : vector<16x192xi32>
    %269 = tpu.iota {dimensions = array<i32: 1>} : vector<16x192xi32>
    %c2_i32_76 = arith.constant 2 : i32
    %270 = vector.broadcast %c2_i32_76 : i32 to vector<16x192xi32>
    %271 = arith.shrsi %268, %270 : vector<16x192xi32>
    %c48_i32_77 = arith.constant 48 : i32
    %272 = vector.broadcast %c48_i32_77 : i32 to vector<16x192xi32>
    %273 = arith.muli %271, %272 : vector<16x192xi32>
    %c36_i32 = arith.constant 36 : i32
    %274 = vector.broadcast %c36_i32 : i32 to vector<16x192xi32>
    %275 = arith.addi %273, %274 : vector<16x192xi32>
    %c3_i32_78 = arith.constant 3 : i32
    %276 = vector.broadcast %c3_i32_78 : i32 to vector<16x192xi32>
    %277 = arith.andi %268, %276 : vector<16x192xi32>
    %278 = arith.addi %275, %277 : vector<16x192xi32>
    %279 = arith.cmpi eq, %269, %278 : vector<16x192xi32>
    %280 = arith.extui %279 : vector<16x192xi1> to vector<16x192xi32>
    %281 = arith.sitofp %280 : vector<16x192xi32> to vector<16x192xf32>
    %cst_79 = arith.constant dense<0.000000e+00> : vector<4x16xf32>
    %282 = tpu.matmul %267, %1, %cst_79 {dimension_numbers = #tpu.dot_dimension_numbers<[1], [0], [0], [1], [0, 0, 1, 1], [], []>} : vector<4x48xf32>, vector<48x16xf32>, vector<4x16xf32> -> vector<4x16xf32>
    %cst_80 = arith.constant dense<0.000000e+00> : vector<4x192xf32>
    %283 = tpu.matmul %282, %281, %cst_80 {dimension_numbers = #tpu.dot_dimension_numbers<[1], [0], [0], [1], [0, 0, 1, 1], [], []>} : vector<4x16xf32>, vector<16x192xf32>, vector<4x192xf32> -> vector<4x192xf32>
    %284 = arith.addf %256, %283 : vector<4x192xf32>
    %285 = tpu.iota {dimensions = array<i32: 0>} : vector<4x48xi32>
    %286 = tpu.iota {dimensions = array<i32: 1>} : vector<4x48xi32>
    %c4_i32_81 = arith.constant 4 : i32
    %287 = vector.broadcast %c4_i32_81 : i32 to vector<4x48xi32>
    %288 = arith.muli %285, %287 : vector<4x48xi32>
    %c32_i32_82 = arith.constant 32 : i32
    %289 = vector.broadcast %c32_i32_82 : i32 to vector<4x48xi32>
    %290 = arith.addi %289, %288 : vector<4x48xi32>
    %c2_i32_83 = arith.constant 2 : i32
    %291 = vector.broadcast %c2_i32_83 : i32 to vector<4x48xi32>
    %292 = arith.addi %290, %291 : vector<4x48xi32>
    %293 = arith.cmpi eq, %286, %292 : vector<4x48xi32>
    %294 = arith.extui %293 : vector<4x48xi1> to vector<4x48xi32>
    %295 = arith.sitofp %294 : vector<4x48xi32> to vector<4x48xf32>
    %296 = tpu.iota {dimensions = array<i32: 0>} : vector<16x192xi32>
    %297 = tpu.iota {dimensions = array<i32: 1>} : vector<16x192xi32>
    %c2_i32_84 = arith.constant 2 : i32
    %298 = vector.broadcast %c2_i32_84 : i32 to vector<16x192xi32>
    %299 = arith.shrsi %296, %298 : vector<16x192xi32>
    %c48_i32_85 = arith.constant 48 : i32
    %300 = vector.broadcast %c48_i32_85 : i32 to vector<16x192xi32>
    %301 = arith.muli %299, %300 : vector<16x192xi32>
    %c40_i32 = arith.constant 40 : i32
    %302 = vector.broadcast %c40_i32 : i32 to vector<16x192xi32>
    %303 = arith.addi %301, %302 : vector<16x192xi32>
    %c3_i32_86 = arith.constant 3 : i32
    %304 = vector.broadcast %c3_i32_86 : i32 to vector<16x192xi32>
    %305 = arith.andi %296, %304 : vector<16x192xi32>
    %306 = arith.addi %303, %305 : vector<16x192xi32>
    %307 = arith.cmpi eq, %297, %306 : vector<16x192xi32>
    %308 = arith.extui %307 : vector<16x192xi1> to vector<16x192xi32>
    %309 = arith.sitofp %308 : vector<16x192xi32> to vector<16x192xf32>
    %cst_87 = arith.constant dense<0.000000e+00> : vector<4x16xf32>
    %310 = tpu.matmul %295, %1, %cst_87 {dimension_numbers = #tpu.dot_dimension_numbers<[1], [0], [0], [1], [0, 0, 1, 1], [], []>} : vector<4x48xf32>, vector<48x16xf32>, vector<4x16xf32> -> vector<4x16xf32>
    %cst_88 = arith.constant dense<0.000000e+00> : vector<4x192xf32>
    %311 = tpu.matmul %310, %309, %cst_88 {dimension_numbers = #tpu.dot_dimension_numbers<[1], [0], [0], [1], [0, 0, 1, 1], [], []>} : vector<4x16xf32>, vector<16x192xf32>, vector<4x192xf32> -> vector<4x192xf32>
    %312 = arith.addf %284, %311 : vector<4x192xf32>
    %313 = tpu.iota {dimensions = array<i32: 0>} : vector<4x48xi32>
    %314 = tpu.iota {dimensions = array<i32: 1>} : vector<4x48xi32>
    %c4_i32_89 = arith.constant 4 : i32
    %315 = vector.broadcast %c4_i32_89 : i32 to vector<4x48xi32>
    %316 = arith.muli %313, %315 : vector<4x48xi32>
    %c32_i32_90 = arith.constant 32 : i32
    %317 = vector.broadcast %c32_i32_90 : i32 to vector<4x48xi32>
    %318 = arith.addi %317, %316 : vector<4x48xi32>
    %c3_i32_91 = arith.constant 3 : i32
    %319 = vector.broadcast %c3_i32_91 : i32 to vector<4x48xi32>
    %320 = arith.addi %318, %319 : vector<4x48xi32>
    %321 = arith.cmpi eq, %314, %320 : vector<4x48xi32>
    %322 = arith.extui %321 : vector<4x48xi1> to vector<4x48xi32>
    %323 = arith.sitofp %322 : vector<4x48xi32> to vector<4x48xf32>
    %324 = tpu.iota {dimensions = array<i32: 0>} : vector<16x192xi32>
    %325 = tpu.iota {dimensions = array<i32: 1>} : vector<16x192xi32>
    %c2_i32_92 = arith.constant 2 : i32
    %326 = vector.broadcast %c2_i32_92 : i32 to vector<16x192xi32>
    %327 = arith.shrsi %324, %326 : vector<16x192xi32>
    %c48_i32_93 = arith.constant 48 : i32
    %328 = vector.broadcast %c48_i32_93 : i32 to vector<16x192xi32>
    %329 = arith.muli %327, %328 : vector<16x192xi32>
    %c44_i32 = arith.constant 44 : i32
    %330 = vector.broadcast %c44_i32 : i32 to vector<16x192xi32>
    %331 = arith.addi %329, %330 : vector<16x192xi32>
    %c3_i32_94 = arith.constant 3 : i32
    %332 = vector.broadcast %c3_i32_94 : i32 to vector<16x192xi32>
    %333 = arith.andi %324, %332 : vector<16x192xi32>
    %334 = arith.addi %331, %333 : vector<16x192xi32>
    %335 = arith.cmpi eq, %325, %334 : vector<16x192xi32>
    %336 = arith.extui %335 : vector<16x192xi1> to vector<16x192xi32>
    %337 = arith.sitofp %336 : vector<16x192xi32> to vector<16x192xf32>
    %cst_95 = arith.constant dense<0.000000e+00> : vector<4x16xf32>
    %338 = tpu.matmul %323, %1, %cst_95 {dimension_numbers = #tpu.dot_dimension_numbers<[1], [0], [0], [1], [0, 0, 1, 1], [], []>} : vector<4x48xf32>, vector<48x16xf32>, vector<4x16xf32> -> vector<4x16xf32>
    %cst_96 = arith.constant dense<0.000000e+00> : vector<4x192xf32>
    %339 = tpu.matmul %338, %337, %cst_96 {dimension_numbers = #tpu.dot_dimension_numbers<[1], [0], [0], [1], [0, 0, 1, 1], [], []>} : vector<4x16xf32>, vector<16x192xf32>, vector<4x192xf32> -> vector<4x192xf32>
    %340 = arith.addf %312, %339 : vector<4x192xf32>
    %c0_97 = arith.constant 0 : index
    %c0_98 = arith.constant 0 : index
    %341 = vector.load %arg3[%c0_97, %c0_98] : memref<48x32xf32, #tpu.memory_space<vmem>>, vector<48x32xf32>
    %c0_99 = arith.constant 0 : index
    %c0_100 = arith.constant 0 : index
    %342 = vector.load %arg4[%c0_99, %c0_100] : memref<1x32xf32, #tpu.memory_space<vmem>>, vector<1x32xf32>
    %c0_101 = arith.constant 0 : index
    %c0_102 = arith.constant 0 : index
    %343 = vector.load %arg5[%c0_101, %c0_102] : memref<1x32xf32, #tpu.memory_space<vmem>>, vector<1x32xf32>
    %c0_103 = arith.constant 0 : index
    %c0_104 = arith.constant 0 : index
    %344 = vector.load %arg6[%c0_103, %c0_104] : memref<32x48xf32, #tpu.memory_space<vmem>>, vector<32x48xf32>
    %c0_105 = arith.constant 0 : index
    %c0_106 = arith.constant 0 : index
    %345 = vector.load %arg7[%c0_105, %c0_106] : memref<1x48xf32, #tpu.memory_space<vmem>>, vector<1x48xf32>
    %cst_107 = arith.constant 0.000000e+00 : f32
    %346 = vector.broadcast %cst_107 : f32 to vector<4x192xf32>
    %347 = vector.extract_strided_slice %340 {offsets = [0, 0], sizes = [4, 48], strides = [1, 1]} : vector<4x192xf32> to vector<4x48xf32>
    %cst_108 = arith.constant dense<0.000000e+00> : vector<4x32xf32>
    %348 = tpu.matmul %347, %341, %cst_108 {dimension_numbers = #tpu.dot_dimension_numbers<[1], [0], [0], [1], [0, 0, 1, 1], [], []>} : vector<4x48xf32>, vector<48x32xf32>, vector<4x32xf32> -> vector<4x32xf32>
    %349 = vector.broadcast %342 : vector<1x32xf32> to vector<4x32xf32>
    %350 = arith.addf %348, %349 : vector<4x32xf32>
    %351 = vector.extract_strided_slice %3 {offsets = [0, 0], sizes = [4, 1], strides = [1, 1]} : vector<4x4xf32> to vector<4x1xf32>
    %cst_109 = arith.constant 1.000000e+00 : f32
    %352 = vector.broadcast %cst_109 : f32 to vector<4x1xf32>
    %353 = arith.subf %352, %351 : vector<4x1xf32>
    %354 = vector.broadcast %353 : vector<4x1xf32> to vector<4x32xf32>
    %355 = arith.mulf %350, %354 : vector<4x32xf32>
    %356 = vector.broadcast %343 : vector<1x32xf32> to vector<4x32xf32>
    %357 = vector.broadcast %351 : vector<4x1xf32> to vector<4x32xf32>
    %358 = arith.mulf %356, %357 : vector<4x32xf32>
    %359 = arith.addf %355, %358 : vector<4x32xf32>
    %cst_110 = arith.constant dense<0.000000e+00> : vector<4x48xf32>
    %360 = tpu.matmul %359, %344, %cst_110 {dimension_numbers = #tpu.dot_dimension_numbers<[1], [0], [0], [1], [0, 0, 1, 1], [], []>} : vector<4x32xf32>, vector<32x48xf32>, vector<4x48xf32> -> vector<4x48xf32>
    %361 = vector.broadcast %345 : vector<1x48xf32> to vector<4x48xf32>
    %362 = arith.addf %360, %361 : vector<4x48xf32>
    %363 = tpu.iota {dimensions = array<i32: 0>} : vector<48x192xi32>
    %364 = tpu.iota {dimensions = array<i32: 1>} : vector<48x192xi32>
    %c0_i32_111 = arith.constant 0 : i32
    %365 = vector.broadcast %c0_i32_111 : i32 to vector<48x192xi32>
    %366 = arith.addi %365, %363 : vector<48x192xi32>
    %367 = arith.cmpi eq, %364, %366 : vector<48x192xi32>
    %368 = arith.extui %367 : vector<48x192xi1> to vector<48x192xi32>
    %369 = arith.sitofp %368 : vector<48x192xi32> to vector<48x192xf32>
    %cst_112 = arith.constant dense<0.000000e+00> : vector<4x192xf32>
    %370 = tpu.matmul %362, %369, %cst_112 {dimension_numbers = #tpu.dot_dimension_numbers<[1], [0], [0], [1], [0, 0, 1, 1], [], []>} : vector<4x48xf32>, vector<48x192xf32>, vector<4x192xf32> -> vector<4x192xf32>
    %371 = arith.addf %346, %370 : vector<4x192xf32>
    %372 = vector.extract_strided_slice %340 {offsets = [0, 48], sizes = [4, 48], strides = [1, 1]} : vector<4x192xf32> to vector<4x48xf32>
    %cst_113 = arith.constant dense<0.000000e+00> : vector<4x32xf32>
    %373 = tpu.matmul %372, %341, %cst_113 {dimension_numbers = #tpu.dot_dimension_numbers<[1], [0], [0], [1], [0, 0, 1, 1], [], []>} : vector<4x48xf32>, vector<48x32xf32>, vector<4x32xf32> -> vector<4x32xf32>
    %374 = vector.broadcast %342 : vector<1x32xf32> to vector<4x32xf32>
    %375 = arith.addf %373, %374 : vector<4x32xf32>
    %376 = vector.extract_strided_slice %3 {offsets = [0, 1], sizes = [4, 1], strides = [1, 1]} : vector<4x4xf32> to vector<4x1xf32>
    %cst_114 = arith.constant 1.000000e+00 : f32
    %377 = vector.broadcast %cst_114 : f32 to vector<4x1xf32>
    %378 = arith.subf %377, %376 : vector<4x1xf32>
    %379 = vector.broadcast %378 : vector<4x1xf32> to vector<4x32xf32>
    %380 = arith.mulf %375, %379 : vector<4x32xf32>
    %381 = vector.broadcast %343 : vector<1x32xf32> to vector<4x32xf32>
    %382 = vector.broadcast %376 : vector<4x1xf32> to vector<4x32xf32>
    %383 = arith.mulf %381, %382 : vector<4x32xf32>
    %384 = arith.addf %380, %383 : vector<4x32xf32>
    %cst_115 = arith.constant dense<0.000000e+00> : vector<4x48xf32>
    %385 = tpu.matmul %384, %344, %cst_115 {dimension_numbers = #tpu.dot_dimension_numbers<[1], [0], [0], [1], [0, 0, 1, 1], [], []>} : vector<4x32xf32>, vector<32x48xf32>, vector<4x48xf32> -> vector<4x48xf32>
    %386 = vector.broadcast %345 : vector<1x48xf32> to vector<4x48xf32>
    %387 = arith.addf %385, %386 : vector<4x48xf32>
    %388 = tpu.iota {dimensions = array<i32: 0>} : vector<48x192xi32>
    %389 = tpu.iota {dimensions = array<i32: 1>} : vector<48x192xi32>
    %c48_i32_116 = arith.constant 48 : i32
    %390 = vector.broadcast %c48_i32_116 : i32 to vector<48x192xi32>
    %391 = arith.addi %390, %388 : vector<48x192xi32>
    %392 = arith.cmpi eq, %389, %391 : vector<48x192xi32>
    %393 = arith.extui %392 : vector<48x192xi1> to vector<48x192xi32>
    %394 = arith.sitofp %393 : vector<48x192xi32> to vector<48x192xf32>
    %cst_117 = arith.constant dense<0.000000e+00> : vector<4x192xf32>
    %395 = tpu.matmul %387, %394, %cst_117 {dimension_numbers = #tpu.dot_dimension_numbers<[1], [0], [0], [1], [0, 0, 1, 1], [], []>} : vector<4x48xf32>, vector<48x192xf32>, vector<4x192xf32> -> vector<4x192xf32>
    %396 = arith.addf %371, %395 : vector<4x192xf32>
    %397 = vector.extract_strided_slice %340 {offsets = [0, 96], sizes = [4, 48], strides = [1, 1]} : vector<4x192xf32> to vector<4x48xf32>
    %cst_118 = arith.constant dense<0.000000e+00> : vector<4x32xf32>
    %398 = tpu.matmul %397, %341, %cst_118 {dimension_numbers = #tpu.dot_dimension_numbers<[1], [0], [0], [1], [0, 0, 1, 1], [], []>} : vector<4x48xf32>, vector<48x32xf32>, vector<4x32xf32> -> vector<4x32xf32>
    %399 = vector.broadcast %342 : vector<1x32xf32> to vector<4x32xf32>
    %400 = arith.addf %398, %399 : vector<4x32xf32>
    %401 = vector.extract_strided_slice %3 {offsets = [0, 2], sizes = [4, 1], strides = [1, 1]} : vector<4x4xf32> to vector<4x1xf32>
    %cst_119 = arith.constant 1.000000e+00 : f32
    %402 = vector.broadcast %cst_119 : f32 to vector<4x1xf32>
    %403 = arith.subf %402, %401 : vector<4x1xf32>
    %404 = vector.broadcast %403 : vector<4x1xf32> to vector<4x32xf32>
    %405 = arith.mulf %400, %404 : vector<4x32xf32>
    %406 = vector.broadcast %343 : vector<1x32xf32> to vector<4x32xf32>
    %407 = vector.broadcast %401 : vector<4x1xf32> to vector<4x32xf32>
    %408 = arith.mulf %406, %407 : vector<4x32xf32>
    %409 = arith.addf %405, %408 : vector<4x32xf32>
    %cst_120 = arith.constant dense<0.000000e+00> : vector<4x48xf32>
    %410 = tpu.matmul %409, %344, %cst_120 {dimension_numbers = #tpu.dot_dimension_numbers<[1], [0], [0], [1], [0, 0, 1, 1], [], []>} : vector<4x32xf32>, vector<32x48xf32>, vector<4x48xf32> -> vector<4x48xf32>
    %411 = vector.broadcast %345 : vector<1x48xf32> to vector<4x48xf32>
    %412 = arith.addf %410, %411 : vector<4x48xf32>
    %413 = tpu.iota {dimensions = array<i32: 0>} : vector<48x192xi32>
    %414 = tpu.iota {dimensions = array<i32: 1>} : vector<48x192xi32>
    %c96_i32 = arith.constant 96 : i32
    %415 = vector.broadcast %c96_i32 : i32 to vector<48x192xi32>
    %416 = arith.addi %415, %413 : vector<48x192xi32>
    %417 = arith.cmpi eq, %414, %416 : vector<48x192xi32>
    %418 = arith.extui %417 : vector<48x192xi1> to vector<48x192xi32>
    %419 = arith.sitofp %418 : vector<48x192xi32> to vector<48x192xf32>
    %cst_121 = arith.constant dense<0.000000e+00> : vector<4x192xf32>
    %420 = tpu.matmul %412, %419, %cst_121 {dimension_numbers = #tpu.dot_dimension_numbers<[1], [0], [0], [1], [0, 0, 1, 1], [], []>} : vector<4x48xf32>, vector<48x192xf32>, vector<4x192xf32> -> vector<4x192xf32>
    %421 = arith.addf %396, %420 : vector<4x192xf32>
    %422 = vector.extract_strided_slice %340 {offsets = [0, 144], sizes = [4, 48], strides = [1, 1]} : vector<4x192xf32> to vector<4x48xf32>
    %cst_122 = arith.constant dense<0.000000e+00> : vector<4x32xf32>
    %423 = tpu.matmul %422, %341, %cst_122 {dimension_numbers = #tpu.dot_dimension_numbers<[1], [0], [0], [1], [0, 0, 1, 1], [], []>} : vector<4x48xf32>, vector<48x32xf32>, vector<4x32xf32> -> vector<4x32xf32>
    %424 = vector.broadcast %342 : vector<1x32xf32> to vector<4x32xf32>
    %425 = arith.addf %423, %424 : vector<4x32xf32>
    %426 = vector.extract_strided_slice %3 {offsets = [0, 3], sizes = [4, 1], strides = [1, 1]} : vector<4x4xf32> to vector<4x1xf32>
    %cst_123 = arith.constant 1.000000e+00 : f32
    %427 = vector.broadcast %cst_123 : f32 to vector<4x1xf32>
    %428 = arith.subf %427, %426 : vector<4x1xf32>
    %429 = vector.broadcast %428 : vector<4x1xf32> to vector<4x32xf32>
    %430 = arith.mulf %425, %429 : vector<4x32xf32>
    %431 = vector.broadcast %343 : vector<1x32xf32> to vector<4x32xf32>
    %432 = vector.broadcast %426 : vector<4x1xf32> to vector<4x32xf32>
    %433 = arith.mulf %431, %432 : vector<4x32xf32>
    %434 = arith.addf %430, %433 : vector<4x32xf32>
    %cst_124 = arith.constant dense<0.000000e+00> : vector<4x48xf32>
    %435 = tpu.matmul %434, %344, %cst_124 {dimension_numbers = #tpu.dot_dimension_numbers<[1], [0], [0], [1], [0, 0, 1, 1], [], []>} : vector<4x32xf32>, vector<32x48xf32>, vector<4x48xf32> -> vector<4x48xf32>
    %436 = vector.broadcast %345 : vector<1x48xf32> to vector<4x48xf32>
    %437 = arith.addf %435, %436 : vector<4x48xf32>
    %438 = tpu.iota {dimensions = array<i32: 0>} : vector<48x192xi32>
    %439 = tpu.iota {dimensions = array<i32: 1>} : vector<48x192xi32>
    %c144_i32 = arith.constant 144 : i32
    %440 = vector.broadcast %c144_i32 : i32 to vector<48x192xi32>
    %441 = arith.addi %440, %438 : vector<48x192xi32>
    %442 = arith.cmpi eq, %439, %441 : vector<48x192xi32>
    %443 = arith.extui %442 : vector<48x192xi1> to vector<48x192xi32>
    %444 = arith.sitofp %443 : vector<48x192xi32> to vector<48x192xf32>
    %cst_125 = arith.constant dense<0.000000e+00> : vector<4x192xf32>
    %445 = tpu.matmul %437, %444, %cst_125 {dimension_numbers = #tpu.dot_dimension_numbers<[1], [0], [0], [1], [0, 0, 1, 1], [], []>} : vector<4x48xf32>, vector<48x192xf32>, vector<4x192xf32> -> vector<4x192xf32>
    %446 = arith.addf %421, %445 : vector<4x192xf32>
    %cst_126 = arith.constant 0.000000e+00 : f32
    %447 = vector.broadcast %cst_126 : f32 to vector<48x16xf32>
    %448 = tpu.iota {dimensions = array<i32: 0>} : vector<48x4xi32>
    %449 = tpu.iota {dimensions = array<i32: 1>} : vector<48x4xi32>
    %c4_i32_127 = arith.constant 4 : i32
    %450 = vector.broadcast %c4_i32_127 : i32 to vector<48x4xi32>
    %451 = arith.muli %449, %450 : vector<48x4xi32>
    %c0_i32_128 = arith.constant 0 : i32
    %452 = vector.broadcast %c0_i32_128 : i32 to vector<48x4xi32>
    %453 = arith.addi %452, %451 : vector<48x4xi32>
    %c0_i32_129 = arith.constant 0 : i32
    %454 = vector.broadcast %c0_i32_129 : i32 to vector<48x4xi32>
    %455 = arith.addi %453, %454 : vector<48x4xi32>
    %456 = arith.cmpi eq, %448, %455 : vector<48x4xi32>
    %457 = arith.extui %456 : vector<48x4xi1> to vector<48x4xi32>
    %458 = arith.sitofp %457 : vector<48x4xi32> to vector<48x4xf32>
    %459 = tpu.iota {dimensions = array<i32: 0>} : vector<192x16xi32>
    %460 = tpu.iota {dimensions = array<i32: 1>} : vector<192x16xi32>
    %c2_i32_130 = arith.constant 2 : i32
    %461 = vector.broadcast %c2_i32_130 : i32 to vector<192x16xi32>
    %462 = arith.shrsi %460, %461 : vector<192x16xi32>
    %c48_i32_131 = arith.constant 48 : i32
    %463 = vector.broadcast %c48_i32_131 : i32 to vector<192x16xi32>
    %464 = arith.muli %462, %463 : vector<192x16xi32>
    %c0_i32_132 = arith.constant 0 : i32
    %465 = vector.broadcast %c0_i32_132 : i32 to vector<192x16xi32>
    %466 = arith.addi %464, %465 : vector<192x16xi32>
    %c3_i32_133 = arith.constant 3 : i32
    %467 = vector.broadcast %c3_i32_133 : i32 to vector<192x16xi32>
    %468 = arith.andi %460, %467 : vector<192x16xi32>
    %469 = arith.addi %466, %468 : vector<192x16xi32>
    %470 = arith.cmpi eq, %459, %469 : vector<192x16xi32>
    %471 = arith.extui %470 : vector<192x16xi1> to vector<192x16xi32>
    %472 = arith.sitofp %471 : vector<192x16xi32> to vector<192x16xf32>
    %cst_134 = arith.constant dense<0.000000e+00> : vector<4x16xf32>
    %473 = tpu.matmul %446, %472, %cst_134 {dimension_numbers = #tpu.dot_dimension_numbers<[1], [0], [0], [1], [0, 0, 1, 1], [], []>} : vector<4x192xf32>, vector<192x16xf32>, vector<4x16xf32> -> vector<4x16xf32>
    %cst_135 = arith.constant dense<0.000000e+00> : vector<48x16xf32>
    %474 = tpu.matmul %458, %473, %cst_135 {dimension_numbers = #tpu.dot_dimension_numbers<[1], [0], [0], [1], [0, 0, 1, 1], [], []>} : vector<48x4xf32>, vector<4x16xf32>, vector<48x16xf32> -> vector<48x16xf32>
    %475 = arith.addf %447, %474 : vector<48x16xf32>
    %476 = tpu.iota {dimensions = array<i32: 0>} : vector<48x4xi32>
    %477 = tpu.iota {dimensions = array<i32: 1>} : vector<48x4xi32>
    %c4_i32_136 = arith.constant 4 : i32
    %478 = vector.broadcast %c4_i32_136 : i32 to vector<48x4xi32>
    %479 = arith.muli %477, %478 : vector<48x4xi32>
    %c0_i32_137 = arith.constant 0 : i32
    %480 = vector.broadcast %c0_i32_137 : i32 to vector<48x4xi32>
    %481 = arith.addi %480, %479 : vector<48x4xi32>
    %c1_i32_138 = arith.constant 1 : i32
    %482 = vector.broadcast %c1_i32_138 : i32 to vector<48x4xi32>
    %483 = arith.addi %481, %482 : vector<48x4xi32>
    %484 = arith.cmpi eq, %476, %483 : vector<48x4xi32>
    %485 = arith.extui %484 : vector<48x4xi1> to vector<48x4xi32>
    %486 = arith.sitofp %485 : vector<48x4xi32> to vector<48x4xf32>
    %487 = tpu.iota {dimensions = array<i32: 0>} : vector<192x16xi32>
    %488 = tpu.iota {dimensions = array<i32: 1>} : vector<192x16xi32>
    %c2_i32_139 = arith.constant 2 : i32
    %489 = vector.broadcast %c2_i32_139 : i32 to vector<192x16xi32>
    %490 = arith.shrsi %488, %489 : vector<192x16xi32>
    %c48_i32_140 = arith.constant 48 : i32
    %491 = vector.broadcast %c48_i32_140 : i32 to vector<192x16xi32>
    %492 = arith.muli %490, %491 : vector<192x16xi32>
    %c4_i32_141 = arith.constant 4 : i32
    %493 = vector.broadcast %c4_i32_141 : i32 to vector<192x16xi32>
    %494 = arith.addi %492, %493 : vector<192x16xi32>
    %c3_i32_142 = arith.constant 3 : i32
    %495 = vector.broadcast %c3_i32_142 : i32 to vector<192x16xi32>
    %496 = arith.andi %488, %495 : vector<192x16xi32>
    %497 = arith.addi %494, %496 : vector<192x16xi32>
    %498 = arith.cmpi eq, %487, %497 : vector<192x16xi32>
    %499 = arith.extui %498 : vector<192x16xi1> to vector<192x16xi32>
    %500 = arith.sitofp %499 : vector<192x16xi32> to vector<192x16xf32>
    %cst_143 = arith.constant dense<0.000000e+00> : vector<4x16xf32>
    %501 = tpu.matmul %446, %500, %cst_143 {dimension_numbers = #tpu.dot_dimension_numbers<[1], [0], [0], [1], [0, 0, 1, 1], [], []>} : vector<4x192xf32>, vector<192x16xf32>, vector<4x16xf32> -> vector<4x16xf32>
    %cst_144 = arith.constant dense<0.000000e+00> : vector<48x16xf32>
    %502 = tpu.matmul %486, %501, %cst_144 {dimension_numbers = #tpu.dot_dimension_numbers<[1], [0], [0], [1], [0, 0, 1, 1], [], []>} : vector<48x4xf32>, vector<4x16xf32>, vector<48x16xf32> -> vector<48x16xf32>
    %503 = arith.addf %475, %502 : vector<48x16xf32>
    %504 = tpu.iota {dimensions = array<i32: 0>} : vector<48x4xi32>
    %505 = tpu.iota {dimensions = array<i32: 1>} : vector<48x4xi32>
    %c4_i32_145 = arith.constant 4 : i32
    %506 = vector.broadcast %c4_i32_145 : i32 to vector<48x4xi32>
    %507 = arith.muli %505, %506 : vector<48x4xi32>
    %c0_i32_146 = arith.constant 0 : i32
    %508 = vector.broadcast %c0_i32_146 : i32 to vector<48x4xi32>
    %509 = arith.addi %508, %507 : vector<48x4xi32>
    %c2_i32_147 = arith.constant 2 : i32
    %510 = vector.broadcast %c2_i32_147 : i32 to vector<48x4xi32>
    %511 = arith.addi %509, %510 : vector<48x4xi32>
    %512 = arith.cmpi eq, %504, %511 : vector<48x4xi32>
    %513 = arith.extui %512 : vector<48x4xi1> to vector<48x4xi32>
    %514 = arith.sitofp %513 : vector<48x4xi32> to vector<48x4xf32>
    %515 = tpu.iota {dimensions = array<i32: 0>} : vector<192x16xi32>
    %516 = tpu.iota {dimensions = array<i32: 1>} : vector<192x16xi32>
    %c2_i32_148 = arith.constant 2 : i32
    %517 = vector.broadcast %c2_i32_148 : i32 to vector<192x16xi32>
    %518 = arith.shrsi %516, %517 : vector<192x16xi32>
    %c48_i32_149 = arith.constant 48 : i32
    %519 = vector.broadcast %c48_i32_149 : i32 to vector<192x16xi32>
    %520 = arith.muli %518, %519 : vector<192x16xi32>
    %c8_i32_150 = arith.constant 8 : i32
    %521 = vector.broadcast %c8_i32_150 : i32 to vector<192x16xi32>
    %522 = arith.addi %520, %521 : vector<192x16xi32>
    %c3_i32_151 = arith.constant 3 : i32
    %523 = vector.broadcast %c3_i32_151 : i32 to vector<192x16xi32>
    %524 = arith.andi %516, %523 : vector<192x16xi32>
    %525 = arith.addi %522, %524 : vector<192x16xi32>
    %526 = arith.cmpi eq, %515, %525 : vector<192x16xi32>
    %527 = arith.extui %526 : vector<192x16xi1> to vector<192x16xi32>
    %528 = arith.sitofp %527 : vector<192x16xi32> to vector<192x16xf32>
    %cst_152 = arith.constant dense<0.000000e+00> : vector<4x16xf32>
    %529 = tpu.matmul %446, %528, %cst_152 {dimension_numbers = #tpu.dot_dimension_numbers<[1], [0], [0], [1], [0, 0, 1, 1], [], []>} : vector<4x192xf32>, vector<192x16xf32>, vector<4x16xf32> -> vector<4x16xf32>
    %cst_153 = arith.constant dense<0.000000e+00> : vector<48x16xf32>
    %530 = tpu.matmul %514, %529, %cst_153 {dimension_numbers = #tpu.dot_dimension_numbers<[1], [0], [0], [1], [0, 0, 1, 1], [], []>} : vector<48x4xf32>, vector<4x16xf32>, vector<48x16xf32> -> vector<48x16xf32>
    %531 = arith.addf %503, %530 : vector<48x16xf32>
    %532 = tpu.iota {dimensions = array<i32: 0>} : vector<48x4xi32>
    %533 = tpu.iota {dimensions = array<i32: 1>} : vector<48x4xi32>
    %c4_i32_154 = arith.constant 4 : i32
    %534 = vector.broadcast %c4_i32_154 : i32 to vector<48x4xi32>
    %535 = arith.muli %533, %534 : vector<48x4xi32>
    %c0_i32_155 = arith.constant 0 : i32
    %536 = vector.broadcast %c0_i32_155 : i32 to vector<48x4xi32>
    %537 = arith.addi %536, %535 : vector<48x4xi32>
    %c3_i32_156 = arith.constant 3 : i32
    %538 = vector.broadcast %c3_i32_156 : i32 to vector<48x4xi32>
    %539 = arith.addi %537, %538 : vector<48x4xi32>
    %540 = arith.cmpi eq, %532, %539 : vector<48x4xi32>
    %541 = arith.extui %540 : vector<48x4xi1> to vector<48x4xi32>
    %542 = arith.sitofp %541 : vector<48x4xi32> to vector<48x4xf32>
    %543 = tpu.iota {dimensions = array<i32: 0>} : vector<192x16xi32>
    %544 = tpu.iota {dimensions = array<i32: 1>} : vector<192x16xi32>
    %c2_i32_157 = arith.constant 2 : i32
    %545 = vector.broadcast %c2_i32_157 : i32 to vector<192x16xi32>
    %546 = arith.shrsi %544, %545 : vector<192x16xi32>
    %c48_i32_158 = arith.constant 48 : i32
    %547 = vector.broadcast %c48_i32_158 : i32 to vector<192x16xi32>
    %548 = arith.muli %546, %547 : vector<192x16xi32>
    %c12_i32_159 = arith.constant 12 : i32
    %549 = vector.broadcast %c12_i32_159 : i32 to vector<192x16xi32>
    %550 = arith.addi %548, %549 : vector<192x16xi32>
    %c3_i32_160 = arith.constant 3 : i32
    %551 = vector.broadcast %c3_i32_160 : i32 to vector<192x16xi32>
    %552 = arith.andi %544, %551 : vector<192x16xi32>
    %553 = arith.addi %550, %552 : vector<192x16xi32>
    %554 = arith.cmpi eq, %543, %553 : vector<192x16xi32>
    %555 = arith.extui %554 : vector<192x16xi1> to vector<192x16xi32>
    %556 = arith.sitofp %555 : vector<192x16xi32> to vector<192x16xf32>
    %cst_161 = arith.constant dense<0.000000e+00> : vector<4x16xf32>
    %557 = tpu.matmul %446, %556, %cst_161 {dimension_numbers = #tpu.dot_dimension_numbers<[1], [0], [0], [1], [0, 0, 1, 1], [], []>} : vector<4x192xf32>, vector<192x16xf32>, vector<4x16xf32> -> vector<4x16xf32>
    %cst_162 = arith.constant dense<0.000000e+00> : vector<48x16xf32>
    %558 = tpu.matmul %542, %557, %cst_162 {dimension_numbers = #tpu.dot_dimension_numbers<[1], [0], [0], [1], [0, 0, 1, 1], [], []>} : vector<48x4xf32>, vector<4x16xf32>, vector<48x16xf32> -> vector<48x16xf32>
    %559 = arith.addf %531, %558 : vector<48x16xf32>
    %560 = tpu.iota {dimensions = array<i32: 0>} : vector<48x4xi32>
    %561 = tpu.iota {dimensions = array<i32: 1>} : vector<48x4xi32>
    %c4_i32_163 = arith.constant 4 : i32
    %562 = vector.broadcast %c4_i32_163 : i32 to vector<48x4xi32>
    %563 = arith.muli %561, %562 : vector<48x4xi32>
    %c16_i32_164 = arith.constant 16 : i32
    %564 = vector.broadcast %c16_i32_164 : i32 to vector<48x4xi32>
    %565 = arith.addi %564, %563 : vector<48x4xi32>
    %c0_i32_165 = arith.constant 0 : i32
    %566 = vector.broadcast %c0_i32_165 : i32 to vector<48x4xi32>
    %567 = arith.addi %565, %566 : vector<48x4xi32>
    %568 = arith.cmpi eq, %560, %567 : vector<48x4xi32>
    %569 = arith.extui %568 : vector<48x4xi1> to vector<48x4xi32>
    %570 = arith.sitofp %569 : vector<48x4xi32> to vector<48x4xf32>
    %571 = tpu.iota {dimensions = array<i32: 0>} : vector<192x16xi32>
    %572 = tpu.iota {dimensions = array<i32: 1>} : vector<192x16xi32>
    %c2_i32_166 = arith.constant 2 : i32
    %573 = vector.broadcast %c2_i32_166 : i32 to vector<192x16xi32>
    %574 = arith.shrsi %572, %573 : vector<192x16xi32>
    %c48_i32_167 = arith.constant 48 : i32
    %575 = vector.broadcast %c48_i32_167 : i32 to vector<192x16xi32>
    %576 = arith.muli %574, %575 : vector<192x16xi32>
    %c16_i32_168 = arith.constant 16 : i32
    %577 = vector.broadcast %c16_i32_168 : i32 to vector<192x16xi32>
    %578 = arith.addi %576, %577 : vector<192x16xi32>
    %c3_i32_169 = arith.constant 3 : i32
    %579 = vector.broadcast %c3_i32_169 : i32 to vector<192x16xi32>
    %580 = arith.andi %572, %579 : vector<192x16xi32>
    %581 = arith.addi %578, %580 : vector<192x16xi32>
    %582 = arith.cmpi eq, %571, %581 : vector<192x16xi32>
    %583 = arith.extui %582 : vector<192x16xi1> to vector<192x16xi32>
    %584 = arith.sitofp %583 : vector<192x16xi32> to vector<192x16xf32>
    %cst_170 = arith.constant dense<0.000000e+00> : vector<4x16xf32>
    %585 = tpu.matmul %446, %584, %cst_170 {dimension_numbers = #tpu.dot_dimension_numbers<[1], [0], [0], [1], [0, 0, 1, 1], [], []>} : vector<4x192xf32>, vector<192x16xf32>, vector<4x16xf32> -> vector<4x16xf32>
    %cst_171 = arith.constant dense<0.000000e+00> : vector<48x16xf32>
    %586 = tpu.matmul %570, %585, %cst_171 {dimension_numbers = #tpu.dot_dimension_numbers<[1], [0], [0], [1], [0, 0, 1, 1], [], []>} : vector<48x4xf32>, vector<4x16xf32>, vector<48x16xf32> -> vector<48x16xf32>
    %587 = arith.addf %559, %586 : vector<48x16xf32>
    %588 = tpu.iota {dimensions = array<i32: 0>} : vector<48x4xi32>
    %589 = tpu.iota {dimensions = array<i32: 1>} : vector<48x4xi32>
    %c4_i32_172 = arith.constant 4 : i32
    %590 = vector.broadcast %c4_i32_172 : i32 to vector<48x4xi32>
    %591 = arith.muli %589, %590 : vector<48x4xi32>
    %c16_i32_173 = arith.constant 16 : i32
    %592 = vector.broadcast %c16_i32_173 : i32 to vector<48x4xi32>
    %593 = arith.addi %592, %591 : vector<48x4xi32>
    %c1_i32_174 = arith.constant 1 : i32
    %594 = vector.broadcast %c1_i32_174 : i32 to vector<48x4xi32>
    %595 = arith.addi %593, %594 : vector<48x4xi32>
    %596 = arith.cmpi eq, %588, %595 : vector<48x4xi32>
    %597 = arith.extui %596 : vector<48x4xi1> to vector<48x4xi32>
    %598 = arith.sitofp %597 : vector<48x4xi32> to vector<48x4xf32>
    %599 = tpu.iota {dimensions = array<i32: 0>} : vector<192x16xi32>
    %600 = tpu.iota {dimensions = array<i32: 1>} : vector<192x16xi32>
    %c2_i32_175 = arith.constant 2 : i32
    %601 = vector.broadcast %c2_i32_175 : i32 to vector<192x16xi32>
    %602 = arith.shrsi %600, %601 : vector<192x16xi32>
    %c48_i32_176 = arith.constant 48 : i32
    %603 = vector.broadcast %c48_i32_176 : i32 to vector<192x16xi32>
    %604 = arith.muli %602, %603 : vector<192x16xi32>
    %c20_i32_177 = arith.constant 20 : i32
    %605 = vector.broadcast %c20_i32_177 : i32 to vector<192x16xi32>
    %606 = arith.addi %604, %605 : vector<192x16xi32>
    %c3_i32_178 = arith.constant 3 : i32
    %607 = vector.broadcast %c3_i32_178 : i32 to vector<192x16xi32>
    %608 = arith.andi %600, %607 : vector<192x16xi32>
    %609 = arith.addi %606, %608 : vector<192x16xi32>
    %610 = arith.cmpi eq, %599, %609 : vector<192x16xi32>
    %611 = arith.extui %610 : vector<192x16xi1> to vector<192x16xi32>
    %612 = arith.sitofp %611 : vector<192x16xi32> to vector<192x16xf32>
    %cst_179 = arith.constant dense<0.000000e+00> : vector<4x16xf32>
    %613 = tpu.matmul %446, %612, %cst_179 {dimension_numbers = #tpu.dot_dimension_numbers<[1], [0], [0], [1], [0, 0, 1, 1], [], []>} : vector<4x192xf32>, vector<192x16xf32>, vector<4x16xf32> -> vector<4x16xf32>
    %cst_180 = arith.constant dense<0.000000e+00> : vector<48x16xf32>
    %614 = tpu.matmul %598, %613, %cst_180 {dimension_numbers = #tpu.dot_dimension_numbers<[1], [0], [0], [1], [0, 0, 1, 1], [], []>} : vector<48x4xf32>, vector<4x16xf32>, vector<48x16xf32> -> vector<48x16xf32>
    %615 = arith.addf %587, %614 : vector<48x16xf32>
    %616 = tpu.iota {dimensions = array<i32: 0>} : vector<48x4xi32>
    %617 = tpu.iota {dimensions = array<i32: 1>} : vector<48x4xi32>
    %c4_i32_181 = arith.constant 4 : i32
    %618 = vector.broadcast %c4_i32_181 : i32 to vector<48x4xi32>
    %619 = arith.muli %617, %618 : vector<48x4xi32>
    %c16_i32_182 = arith.constant 16 : i32
    %620 = vector.broadcast %c16_i32_182 : i32 to vector<48x4xi32>
    %621 = arith.addi %620, %619 : vector<48x4xi32>
    %c2_i32_183 = arith.constant 2 : i32
    %622 = vector.broadcast %c2_i32_183 : i32 to vector<48x4xi32>
    %623 = arith.addi %621, %622 : vector<48x4xi32>
    %624 = arith.cmpi eq, %616, %623 : vector<48x4xi32>
    %625 = arith.extui %624 : vector<48x4xi1> to vector<48x4xi32>
    %626 = arith.sitofp %625 : vector<48x4xi32> to vector<48x4xf32>
    %627 = tpu.iota {dimensions = array<i32: 0>} : vector<192x16xi32>
    %628 = tpu.iota {dimensions = array<i32: 1>} : vector<192x16xi32>
    %c2_i32_184 = arith.constant 2 : i32
    %629 = vector.broadcast %c2_i32_184 : i32 to vector<192x16xi32>
    %630 = arith.shrsi %628, %629 : vector<192x16xi32>
    %c48_i32_185 = arith.constant 48 : i32
    %631 = vector.broadcast %c48_i32_185 : i32 to vector<192x16xi32>
    %632 = arith.muli %630, %631 : vector<192x16xi32>
    %c24_i32_186 = arith.constant 24 : i32
    %633 = vector.broadcast %c24_i32_186 : i32 to vector<192x16xi32>
    %634 = arith.addi %632, %633 : vector<192x16xi32>
    %c3_i32_187 = arith.constant 3 : i32
    %635 = vector.broadcast %c3_i32_187 : i32 to vector<192x16xi32>
    %636 = arith.andi %628, %635 : vector<192x16xi32>
    %637 = arith.addi %634, %636 : vector<192x16xi32>
    %638 = arith.cmpi eq, %627, %637 : vector<192x16xi32>
    %639 = arith.extui %638 : vector<192x16xi1> to vector<192x16xi32>
    %640 = arith.sitofp %639 : vector<192x16xi32> to vector<192x16xf32>
    %cst_188 = arith.constant dense<0.000000e+00> : vector<4x16xf32>
    %641 = tpu.matmul %446, %640, %cst_188 {dimension_numbers = #tpu.dot_dimension_numbers<[1], [0], [0], [1], [0, 0, 1, 1], [], []>} : vector<4x192xf32>, vector<192x16xf32>, vector<4x16xf32> -> vector<4x16xf32>
    %cst_189 = arith.constant dense<0.000000e+00> : vector<48x16xf32>
    %642 = tpu.matmul %626, %641, %cst_189 {dimension_numbers = #tpu.dot_dimension_numbers<[1], [0], [0], [1], [0, 0, 1, 1], [], []>} : vector<48x4xf32>, vector<4x16xf32>, vector<48x16xf32> -> vector<48x16xf32>
    %643 = arith.addf %615, %642 : vector<48x16xf32>
    %644 = tpu.iota {dimensions = array<i32: 0>} : vector<48x4xi32>
    %645 = tpu.iota {dimensions = array<i32: 1>} : vector<48x4xi32>
    %c4_i32_190 = arith.constant 4 : i32
    %646 = vector.broadcast %c4_i32_190 : i32 to vector<48x4xi32>
    %647 = arith.muli %645, %646 : vector<48x4xi32>
    %c16_i32_191 = arith.constant 16 : i32
    %648 = vector.broadcast %c16_i32_191 : i32 to vector<48x4xi32>
    %649 = arith.addi %648, %647 : vector<48x4xi32>
    %c3_i32_192 = arith.constant 3 : i32
    %650 = vector.broadcast %c3_i32_192 : i32 to vector<48x4xi32>
    %651 = arith.addi %649, %650 : vector<48x4xi32>
    %652 = arith.cmpi eq, %644, %651 : vector<48x4xi32>
    %653 = arith.extui %652 : vector<48x4xi1> to vector<48x4xi32>
    %654 = arith.sitofp %653 : vector<48x4xi32> to vector<48x4xf32>
    %655 = tpu.iota {dimensions = array<i32: 0>} : vector<192x16xi32>
    %656 = tpu.iota {dimensions = array<i32: 1>} : vector<192x16xi32>
    %c2_i32_193 = arith.constant 2 : i32
    %657 = vector.broadcast %c2_i32_193 : i32 to vector<192x16xi32>
    %658 = arith.shrsi %656, %657 : vector<192x16xi32>
    %c48_i32_194 = arith.constant 48 : i32
    %659 = vector.broadcast %c48_i32_194 : i32 to vector<192x16xi32>
    %660 = arith.muli %658, %659 : vector<192x16xi32>
    %c28_i32_195 = arith.constant 28 : i32
    %661 = vector.broadcast %c28_i32_195 : i32 to vector<192x16xi32>
    %662 = arith.addi %660, %661 : vector<192x16xi32>
    %c3_i32_196 = arith.constant 3 : i32
    %663 = vector.broadcast %c3_i32_196 : i32 to vector<192x16xi32>
    %664 = arith.andi %656, %663 : vector<192x16xi32>
    %665 = arith.addi %662, %664 : vector<192x16xi32>
    %666 = arith.cmpi eq, %655, %665 : vector<192x16xi32>
    %667 = arith.extui %666 : vector<192x16xi1> to vector<192x16xi32>
    %668 = arith.sitofp %667 : vector<192x16xi32> to vector<192x16xf32>
    %cst_197 = arith.constant dense<0.000000e+00> : vector<4x16xf32>
    %669 = tpu.matmul %446, %668, %cst_197 {dimension_numbers = #tpu.dot_dimension_numbers<[1], [0], [0], [1], [0, 0, 1, 1], [], []>} : vector<4x192xf32>, vector<192x16xf32>, vector<4x16xf32> -> vector<4x16xf32>
    %cst_198 = arith.constant dense<0.000000e+00> : vector<48x16xf32>
    %670 = tpu.matmul %654, %669, %cst_198 {dimension_numbers = #tpu.dot_dimension_numbers<[1], [0], [0], [1], [0, 0, 1, 1], [], []>} : vector<48x4xf32>, vector<4x16xf32>, vector<48x16xf32> -> vector<48x16xf32>
    %671 = arith.addf %643, %670 : vector<48x16xf32>
    %672 = tpu.iota {dimensions = array<i32: 0>} : vector<48x4xi32>
    %673 = tpu.iota {dimensions = array<i32: 1>} : vector<48x4xi32>
    %c4_i32_199 = arith.constant 4 : i32
    %674 = vector.broadcast %c4_i32_199 : i32 to vector<48x4xi32>
    %675 = arith.muli %673, %674 : vector<48x4xi32>
    %c32_i32_200 = arith.constant 32 : i32
    %676 = vector.broadcast %c32_i32_200 : i32 to vector<48x4xi32>
    %677 = arith.addi %676, %675 : vector<48x4xi32>
    %c0_i32_201 = arith.constant 0 : i32
    %678 = vector.broadcast %c0_i32_201 : i32 to vector<48x4xi32>
    %679 = arith.addi %677, %678 : vector<48x4xi32>
    %680 = arith.cmpi eq, %672, %679 : vector<48x4xi32>
    %681 = arith.extui %680 : vector<48x4xi1> to vector<48x4xi32>
    %682 = arith.sitofp %681 : vector<48x4xi32> to vector<48x4xf32>
    %683 = tpu.iota {dimensions = array<i32: 0>} : vector<192x16xi32>
    %684 = tpu.iota {dimensions = array<i32: 1>} : vector<192x16xi32>
    %c2_i32_202 = arith.constant 2 : i32
    %685 = vector.broadcast %c2_i32_202 : i32 to vector<192x16xi32>
    %686 = arith.shrsi %684, %685 : vector<192x16xi32>
    %c48_i32_203 = arith.constant 48 : i32
    %687 = vector.broadcast %c48_i32_203 : i32 to vector<192x16xi32>
    %688 = arith.muli %686, %687 : vector<192x16xi32>
    %c32_i32_204 = arith.constant 32 : i32
    %689 = vector.broadcast %c32_i32_204 : i32 to vector<192x16xi32>
    %690 = arith.addi %688, %689 : vector<192x16xi32>
    %c3_i32_205 = arith.constant 3 : i32
    %691 = vector.broadcast %c3_i32_205 : i32 to vector<192x16xi32>
    %692 = arith.andi %684, %691 : vector<192x16xi32>
    %693 = arith.addi %690, %692 : vector<192x16xi32>
    %694 = arith.cmpi eq, %683, %693 : vector<192x16xi32>
    %695 = arith.extui %694 : vector<192x16xi1> to vector<192x16xi32>
    %696 = arith.sitofp %695 : vector<192x16xi32> to vector<192x16xf32>
    %cst_206 = arith.constant dense<0.000000e+00> : vector<4x16xf32>
    %697 = tpu.matmul %446, %696, %cst_206 {dimension_numbers = #tpu.dot_dimension_numbers<[1], [0], [0], [1], [0, 0, 1, 1], [], []>} : vector<4x192xf32>, vector<192x16xf32>, vector<4x16xf32> -> vector<4x16xf32>
    %cst_207 = arith.constant dense<0.000000e+00> : vector<48x16xf32>
    %698 = tpu.matmul %682, %697, %cst_207 {dimension_numbers = #tpu.dot_dimension_numbers<[1], [0], [0], [1], [0, 0, 1, 1], [], []>} : vector<48x4xf32>, vector<4x16xf32>, vector<48x16xf32> -> vector<48x16xf32>
    %699 = arith.addf %671, %698 : vector<48x16xf32>
    %700 = tpu.iota {dimensions = array<i32: 0>} : vector<48x4xi32>
    %701 = tpu.iota {dimensions = array<i32: 1>} : vector<48x4xi32>
    %c4_i32_208 = arith.constant 4 : i32
    %702 = vector.broadcast %c4_i32_208 : i32 to vector<48x4xi32>
    %703 = arith.muli %701, %702 : vector<48x4xi32>
    %c32_i32_209 = arith.constant 32 : i32
    %704 = vector.broadcast %c32_i32_209 : i32 to vector<48x4xi32>
    %705 = arith.addi %704, %703 : vector<48x4xi32>
    %c1_i32_210 = arith.constant 1 : i32
    %706 = vector.broadcast %c1_i32_210 : i32 to vector<48x4xi32>
    %707 = arith.addi %705, %706 : vector<48x4xi32>
    %708 = arith.cmpi eq, %700, %707 : vector<48x4xi32>
    %709 = arith.extui %708 : vector<48x4xi1> to vector<48x4xi32>
    %710 = arith.sitofp %709 : vector<48x4xi32> to vector<48x4xf32>
    %711 = tpu.iota {dimensions = array<i32: 0>} : vector<192x16xi32>
    %712 = tpu.iota {dimensions = array<i32: 1>} : vector<192x16xi32>
    %c2_i32_211 = arith.constant 2 : i32
    %713 = vector.broadcast %c2_i32_211 : i32 to vector<192x16xi32>
    %714 = arith.shrsi %712, %713 : vector<192x16xi32>
    %c48_i32_212 = arith.constant 48 : i32
    %715 = vector.broadcast %c48_i32_212 : i32 to vector<192x16xi32>
    %716 = arith.muli %714, %715 : vector<192x16xi32>
    %c36_i32_213 = arith.constant 36 : i32
    %717 = vector.broadcast %c36_i32_213 : i32 to vector<192x16xi32>
    %718 = arith.addi %716, %717 : vector<192x16xi32>
    %c3_i32_214 = arith.constant 3 : i32
    %719 = vector.broadcast %c3_i32_214 : i32 to vector<192x16xi32>
    %720 = arith.andi %712, %719 : vector<192x16xi32>
    %721 = arith.addi %718, %720 : vector<192x16xi32>
    %722 = arith.cmpi eq, %711, %721 : vector<192x16xi32>
    %723 = arith.extui %722 : vector<192x16xi1> to vector<192x16xi32>
    %724 = arith.sitofp %723 : vector<192x16xi32> to vector<192x16xf32>
    %cst_215 = arith.constant dense<0.000000e+00> : vector<4x16xf32>
    %725 = tpu.matmul %446, %724, %cst_215 {dimension_numbers = #tpu.dot_dimension_numbers<[1], [0], [0], [1], [0, 0, 1, 1], [], []>} : vector<4x192xf32>, vector<192x16xf32>, vector<4x16xf32> -> vector<4x16xf32>
    %cst_216 = arith.constant dense<0.000000e+00> : vector<48x16xf32>
    %726 = tpu.matmul %710, %725, %cst_216 {dimension_numbers = #tpu.dot_dimension_numbers<[1], [0], [0], [1], [0, 0, 1, 1], [], []>} : vector<48x4xf32>, vector<4x16xf32>, vector<48x16xf32> -> vector<48x16xf32>
    %727 = arith.addf %699, %726 : vector<48x16xf32>
    %728 = tpu.iota {dimensions = array<i32: 0>} : vector<48x4xi32>
    %729 = tpu.iota {dimensions = array<i32: 1>} : vector<48x4xi32>
    %c4_i32_217 = arith.constant 4 : i32
    %730 = vector.broadcast %c4_i32_217 : i32 to vector<48x4xi32>
    %731 = arith.muli %729, %730 : vector<48x4xi32>
    %c32_i32_218 = arith.constant 32 : i32
    %732 = vector.broadcast %c32_i32_218 : i32 to vector<48x4xi32>
    %733 = arith.addi %732, %731 : vector<48x4xi32>
    %c2_i32_219 = arith.constant 2 : i32
    %734 = vector.broadcast %c2_i32_219 : i32 to vector<48x4xi32>
    %735 = arith.addi %733, %734 : vector<48x4xi32>
    %736 = arith.cmpi eq, %728, %735 : vector<48x4xi32>
    %737 = arith.extui %736 : vector<48x4xi1> to vector<48x4xi32>
    %738 = arith.sitofp %737 : vector<48x4xi32> to vector<48x4xf32>
    %739 = tpu.iota {dimensions = array<i32: 0>} : vector<192x16xi32>
    %740 = tpu.iota {dimensions = array<i32: 1>} : vector<192x16xi32>
    %c2_i32_220 = arith.constant 2 : i32
    %741 = vector.broadcast %c2_i32_220 : i32 to vector<192x16xi32>
    %742 = arith.shrsi %740, %741 : vector<192x16xi32>
    %c48_i32_221 = arith.constant 48 : i32
    %743 = vector.broadcast %c48_i32_221 : i32 to vector<192x16xi32>
    %744 = arith.muli %742, %743 : vector<192x16xi32>
    %c40_i32_222 = arith.constant 40 : i32
    %745 = vector.broadcast %c40_i32_222 : i32 to vector<192x16xi32>
    %746 = arith.addi %744, %745 : vector<192x16xi32>
    %c3_i32_223 = arith.constant 3 : i32
    %747 = vector.broadcast %c3_i32_223 : i32 to vector<192x16xi32>
    %748 = arith.andi %740, %747 : vector<192x16xi32>
    %749 = arith.addi %746, %748 : vector<192x16xi32>
    %750 = arith.cmpi eq, %739, %749 : vector<192x16xi32>
    %751 = arith.extui %750 : vector<192x16xi1> to vector<192x16xi32>
    %752 = arith.sitofp %751 : vector<192x16xi32> to vector<192x16xf32>
    %cst_224 = arith.constant dense<0.000000e+00> : vector<4x16xf32>
    %753 = tpu.matmul %446, %752, %cst_224 {dimension_numbers = #tpu.dot_dimension_numbers<[1], [0], [0], [1], [0, 0, 1, 1], [], []>} : vector<4x192xf32>, vector<192x16xf32>, vector<4x16xf32> -> vector<4x16xf32>
    %cst_225 = arith.constant dense<0.000000e+00> : vector<48x16xf32>
    %754 = tpu.matmul %738, %753, %cst_225 {dimension_numbers = #tpu.dot_dimension_numbers<[1], [0], [0], [1], [0, 0, 1, 1], [], []>} : vector<48x4xf32>, vector<4x16xf32>, vector<48x16xf32> -> vector<48x16xf32>
    %755 = arith.addf %727, %754 : vector<48x16xf32>
    %756 = tpu.iota {dimensions = array<i32: 0>} : vector<48x4xi32>
    %757 = tpu.iota {dimensions = array<i32: 1>} : vector<48x4xi32>
    %c4_i32_226 = arith.constant 4 : i32
    %758 = vector.broadcast %c4_i32_226 : i32 to vector<48x4xi32>
    %759 = arith.muli %757, %758 : vector<48x4xi32>
    %c32_i32_227 = arith.constant 32 : i32
    %760 = vector.broadcast %c32_i32_227 : i32 to vector<48x4xi32>
    %761 = arith.addi %760, %759 : vector<48x4xi32>
    %c3_i32_228 = arith.constant 3 : i32
    %762 = vector.broadcast %c3_i32_228 : i32 to vector<48x4xi32>
    %763 = arith.addi %761, %762 : vector<48x4xi32>
    %764 = arith.cmpi eq, %756, %763 : vector<48x4xi32>
    %765 = arith.extui %764 : vector<48x4xi1> to vector<48x4xi32>
    %766 = arith.sitofp %765 : vector<48x4xi32> to vector<48x4xf32>
    %767 = tpu.iota {dimensions = array<i32: 0>} : vector<192x16xi32>
    %768 = tpu.iota {dimensions = array<i32: 1>} : vector<192x16xi32>
    %c2_i32_229 = arith.constant 2 : i32
    %769 = vector.broadcast %c2_i32_229 : i32 to vector<192x16xi32>
    %770 = arith.shrsi %768, %769 : vector<192x16xi32>
    %c48_i32_230 = arith.constant 48 : i32
    %771 = vector.broadcast %c48_i32_230 : i32 to vector<192x16xi32>
    %772 = arith.muli %770, %771 : vector<192x16xi32>
    %c44_i32_231 = arith.constant 44 : i32
    %773 = vector.broadcast %c44_i32_231 : i32 to vector<192x16xi32>
    %774 = arith.addi %772, %773 : vector<192x16xi32>
    %c3_i32_232 = arith.constant 3 : i32
    %775 = vector.broadcast %c3_i32_232 : i32 to vector<192x16xi32>
    %776 = arith.andi %768, %775 : vector<192x16xi32>
    %777 = arith.addi %774, %776 : vector<192x16xi32>
    %778 = arith.cmpi eq, %767, %777 : vector<192x16xi32>
    %779 = arith.extui %778 : vector<192x16xi1> to vector<192x16xi32>
    %780 = arith.sitofp %779 : vector<192x16xi32> to vector<192x16xf32>
    %cst_233 = arith.constant dense<0.000000e+00> : vector<4x16xf32>
    %781 = tpu.matmul %446, %780, %cst_233 {dimension_numbers = #tpu.dot_dimension_numbers<[1], [0], [0], [1], [0, 0, 1, 1], [], []>} : vector<4x192xf32>, vector<192x16xf32>, vector<4x16xf32> -> vector<4x16xf32>
    %cst_234 = arith.constant dense<0.000000e+00> : vector<48x16xf32>
    %782 = tpu.matmul %766, %781, %cst_234 {dimension_numbers = #tpu.dot_dimension_numbers<[1], [0], [0], [1], [0, 0, 1, 1], [], []>} : vector<48x4xf32>, vector<4x16xf32>, vector<48x16xf32> -> vector<48x16xf32>
    %783 = arith.addf %755, %782 : vector<48x16xf32>
    %784 = tpu.iota {dimensions = array<i32: 0>} : vector<16x4xi32>
    %785 = tpu.iota {dimensions = array<i32: 1>} : vector<16x4xi32>
    %c4_i32_235 = arith.constant 4 : i32
    %786 = vector.broadcast %c4_i32_235 : i32 to vector<16x4xi32>
    %787 = arith.muli %785, %786 : vector<16x4xi32>
    %788 = arith.cmpi sge, %784, %787 : vector<16x4xi32>
    %c1_i32_236 = arith.constant 1 : i32
    %789 = vector.broadcast %c1_i32_236 : i32 to vector<16x4xi32>
    %790 = arith.addi %785, %789 : vector<16x4xi32>
    %c4_i32_237 = arith.constant 4 : i32
    %791 = vector.broadcast %c4_i32_237 : i32 to vector<16x4xi32>
    %792 = arith.muli %790, %791 : vector<16x4xi32>
    %793 = arith.cmpi slt, %784, %792 : vector<16x4xi32>
    %794 = arith.andi %788, %793 : vector<16x4xi1>
    %795 = arith.extui %794 : vector<16x4xi1> to vector<16x4xi32>
    %796 = arith.sitofp %795 : vector<16x4xi32> to vector<16x4xf32>
    %797 = tpu.iota {dimensions = array<i32: 0>} : vector<4x16xi32>
    %798 = tpu.iota {dimensions = array<i32: 1>} : vector<4x16xi32>
    %c4_i32_238 = arith.constant 4 : i32
    %799 = vector.broadcast %c4_i32_238 : i32 to vector<4x16xi32>
    %800 = arith.muli %797, %799 : vector<4x16xi32>
    %801 = arith.cmpi sge, %798, %800 : vector<4x16xi32>
    %c1_i32_239 = arith.constant 1 : i32
    %802 = vector.broadcast %c1_i32_239 : i32 to vector<4x16xi32>
    %803 = arith.addi %797, %802 : vector<4x16xi32>
    %c4_i32_240 = arith.constant 4 : i32
    %804 = vector.broadcast %c4_i32_240 : i32 to vector<4x16xi32>
    %805 = arith.muli %803, %804 : vector<4x16xi32>
    %806 = arith.cmpi slt, %798, %805 : vector<4x16xi32>
    %807 = arith.andi %801, %806 : vector<4x16xi1>
    %808 = arith.extui %807 : vector<4x16xi1> to vector<4x16xi32>
    %809 = arith.sitofp %808 : vector<4x16xi32> to vector<4x16xf32>
    %cst_241 = arith.constant dense<0.000000e+00> : vector<16x4xf32>
    %810 = tpu.matmul %796, %3, %cst_241 {dimension_numbers = #tpu.dot_dimension_numbers<[1], [0], [0], [1], [0, 0, 1, 1], [], []>} : vector<16x4xf32>, vector<4x4xf32>, vector<16x4xf32> -> vector<16x4xf32>
    %cst_242 = arith.constant dense<0.000000e+00> : vector<16x16xf32>
    %811 = tpu.matmul %810, %809, %cst_242 {dimension_numbers = #tpu.dot_dimension_numbers<[1], [0], [0], [1], [0, 0, 1, 1], [], []>} : vector<16x4xf32>, vector<4x16xf32>, vector<16x16xf32> -> vector<16x16xf32>
    %812 = tpu.iota {dimensions = array<i32: 0>} : vector<16x16xi32>
    %813 = tpu.iota {dimensions = array<i32: 1>} : vector<16x16xi32>
    %814 = arith.subi %812, %813 : vector<16x16xi32>
    %c1_i32_243 = arith.constant 1 : i32
    %815 = vector.broadcast %c1_i32_243 : i32 to vector<16x16xi32>
    %816 = arith.cmpi sle, %814, %815 : vector<16x16xi32>
    %817 = arith.subi %813, %812 : vector<16x16xi32>
    %c1_i32_244 = arith.constant 1 : i32
    %818 = vector.broadcast %c1_i32_244 : i32 to vector<16x16xi32>
    %819 = arith.cmpi sle, %817, %818 : vector<16x16xi32>
    %820 = arith.andi %816, %819 : vector<16x16xi1>
    %821 = arith.extui %820 : vector<16x16xi1> to vector<16x16xi32>
    %822 = arith.sitofp %821 : vector<16x16xi32> to vector<16x16xf32>
    %823 = tpu.iota {dimensions = array<i32: 0>} : vector<16x16xi32>
    %824 = tpu.iota {dimensions = array<i32: 1>} : vector<16x16xi32>
    %825 = arith.subi %823, %824 : vector<16x16xi32>
    %c1_i32_245 = arith.constant 1 : i32
    %826 = vector.broadcast %c1_i32_245 : i32 to vector<16x16xi32>
    %827 = arith.cmpi sle, %825, %826 : vector<16x16xi32>
    %828 = arith.subi %824, %823 : vector<16x16xi32>
    %c1_i32_246 = arith.constant 1 : i32
    %829 = vector.broadcast %c1_i32_246 : i32 to vector<16x16xi32>
    %830 = arith.cmpi sle, %828, %829 : vector<16x16xi32>
    %831 = arith.andi %827, %830 : vector<16x16xi1>
    %832 = arith.extui %831 : vector<16x16xi1> to vector<16x16xi32>
    %833 = arith.sitofp %832 : vector<16x16xi32> to vector<16x16xf32>
    %cst_247 = arith.constant dense<0.000000e+00> : vector<16xf32>
    %834 = vector.multi_reduction <add>, %822, %cst_247 [1] : vector<16x16xf32> to vector<16xf32>
    %835 = vector.shape_cast %834 : vector<16xf32> to vector<16x1xf32>
    %cst_248 = arith.constant dense<0.000000e+00> : vector<16xf32>
    %836 = vector.multi_reduction <add>, %833, %cst_248 [0] : vector<16x16xf32> to vector<16xf32>
    %837 = vector.shape_cast %836 : vector<16xf32> to vector<1x16xf32>
    %838 = vector.broadcast %835 : vector<16x1xf32> to vector<16x16xf32>
    %839 = vector.broadcast %837 : vector<1x16xf32> to vector<16x16xf32>
    %840 = arith.mulf %838, %839 : vector<16x16xf32>
    %cst_249 = arith.constant 1.000000e+00 : f32
    %841 = vector.broadcast %cst_249 : f32 to vector<16x16xf32>
    %842 = arith.divf %841, %840 : vector<16x16xf32>
    %cst_250 = arith.constant 1.000000e+00 : f32
    %843 = vector.broadcast %cst_250 : f32 to vector<16x16xf32>
    %844 = arith.subf %840, %843 : vector<16x16xf32>
    %845 = arith.divf %840, %844 : vector<16x16xf32>
    %846 = vector.extract_strided_slice %1 {offsets = [0, 0], sizes = [16, 16], strides = [1, 1]} : vector<48x16xf32> to vector<16x16xf32>
    %cst_251 = arith.constant dense<0.000000e+00> : vector<16x16xf32>
    %847 = tpu.matmul %822, %846, %cst_251 {dimension_numbers = #tpu.dot_dimension_numbers<[1], [0], [0], [1], [0, 0, 1, 1], [], []>} : vector<16x16xf32>, vector<16x16xf32>, vector<16x16xf32> -> vector<16x16xf32>
    %cst_252 = arith.constant dense<0.000000e+00> : vector<16x16xf32>
    %848 = tpu.matmul %847, %833, %cst_252 {dimension_numbers = #tpu.dot_dimension_numbers<[1], [0], [0], [1], [0, 0, 1, 1], [], []>} : vector<16x16xf32>, vector<16x16xf32>, vector<16x16xf32> -> vector<16x16xf32>
    %849 = arith.mulf %846, %846 : vector<16x16xf32>
    %cst_253 = arith.constant dense<0.000000e+00> : vector<16x16xf32>
    %850 = tpu.matmul %822, %849, %cst_253 {dimension_numbers = #tpu.dot_dimension_numbers<[1], [0], [0], [1], [0, 0, 1, 1], [], []>} : vector<16x16xf32>, vector<16x16xf32>, vector<16x16xf32> -> vector<16x16xf32>
    %cst_254 = arith.constant dense<0.000000e+00> : vector<16x16xf32>
    %851 = tpu.matmul %850, %833, %cst_254 {dimension_numbers = #tpu.dot_dimension_numbers<[1], [0], [0], [1], [0, 0, 1, 1], [], []>} : vector<16x16xf32>, vector<16x16xf32>, vector<16x16xf32> -> vector<16x16xf32>
    %852 = arith.mulf %848, %842 : vector<16x16xf32>
    %853 = arith.mulf %851, %842 : vector<16x16xf32>
    %854 = arith.mulf %852, %852 : vector<16x16xf32>
    %855 = arith.subf %853, %854 : vector<16x16xf32>
    %856 = arith.mulf %855, %845 : vector<16x16xf32>
    %cst_255 = arith.constant 0.000000e+00 : f32
    %857 = vector.broadcast %cst_255 : f32 to vector<16x16xf32>
    %858 = arith.maximumf %856, %857 : vector<16x16xf32>
    %859 = arith.subf %846, %852 : vector<16x16xf32>
    %cst_256 = arith.constant 9.99999997E-7 : f32
    %860 = vector.broadcast %cst_256 : f32 to vector<16x16xf32>
    %861 = arith.addf %858, %860 : vector<16x16xf32>
    %862 = math.rsqrt %861 : vector<16x16xf32>
    %863 = arith.mulf %859, %862 : vector<16x16xf32>
    %864 = vector.extract_strided_slice %783 {offsets = [0, 0], sizes = [16, 16], strides = [1, 1]} : vector<48x16xf32> to vector<16x16xf32>
    %865 = arith.subf %863, %864 : vector<16x16xf32>
    %866 = math.absf %865 : vector<16x16xf32>
    %867 = arith.mulf %866, %811 : vector<16x16xf32>
    %868 = vector.shape_cast %867 : vector<16x16xf32> to vector<1x16x16xf32>
    %cst_257 = arith.constant dense<0.000000e+00> : vector<1xf32>
    %869 = vector.multi_reduction <add>, %868, %cst_257 [1, 2] : vector<1x16x16xf32> to vector<1xf32>
    %870 = vector.shape_cast %869 : vector<1xf32> to vector<1x1x1xf32>
    %871 = vector.extract %870[0, 0, 0] : f32 from vector<1x1x1xf32>
    %cst_258 = arith.constant 0.000000e+00 : f32
    %872 = arith.addf %cst_258, %871 : f32
    %873 = vector.extract_strided_slice %1 {offsets = [16, 0], sizes = [16, 16], strides = [1, 1]} : vector<48x16xf32> to vector<16x16xf32>
    %cst_259 = arith.constant dense<0.000000e+00> : vector<16x16xf32>
    %874 = tpu.matmul %822, %873, %cst_259 {dimension_numbers = #tpu.dot_dimension_numbers<[1], [0], [0], [1], [0, 0, 1, 1], [], []>} : vector<16x16xf32>, vector<16x16xf32>, vector<16x16xf32> -> vector<16x16xf32>
    %cst_260 = arith.constant dense<0.000000e+00> : vector<16x16xf32>
    %875 = tpu.matmul %874, %833, %cst_260 {dimension_numbers = #tpu.dot_dimension_numbers<[1], [0], [0], [1], [0, 0, 1, 1], [], []>} : vector<16x16xf32>, vector<16x16xf32>, vector<16x16xf32> -> vector<16x16xf32>
    %876 = arith.mulf %873, %873 : vector<16x16xf32>
    %cst_261 = arith.constant dense<0.000000e+00> : vector<16x16xf32>
    %877 = tpu.matmul %822, %876, %cst_261 {dimension_numbers = #tpu.dot_dimension_numbers<[1], [0], [0], [1], [0, 0, 1, 1], [], []>} : vector<16x16xf32>, vector<16x16xf32>, vector<16x16xf32> -> vector<16x16xf32>
    %cst_262 = arith.constant dense<0.000000e+00> : vector<16x16xf32>
    %878 = tpu.matmul %877, %833, %cst_262 {dimension_numbers = #tpu.dot_dimension_numbers<[1], [0], [0], [1], [0, 0, 1, 1], [], []>} : vector<16x16xf32>, vector<16x16xf32>, vector<16x16xf32> -> vector<16x16xf32>
    %879 = arith.mulf %875, %842 : vector<16x16xf32>
    %880 = arith.mulf %878, %842 : vector<16x16xf32>
    %881 = arith.mulf %879, %879 : vector<16x16xf32>
    %882 = arith.subf %880, %881 : vector<16x16xf32>
    %883 = arith.mulf %882, %845 : vector<16x16xf32>
    %cst_263 = arith.constant 0.000000e+00 : f32
    %884 = vector.broadcast %cst_263 : f32 to vector<16x16xf32>
    %885 = arith.maximumf %883, %884 : vector<16x16xf32>
    %886 = arith.subf %873, %879 : vector<16x16xf32>
    %cst_264 = arith.constant 9.99999997E-7 : f32
    %887 = vector.broadcast %cst_264 : f32 to vector<16x16xf32>
    %888 = arith.addf %885, %887 : vector<16x16xf32>
    %889 = math.rsqrt %888 : vector<16x16xf32>
    %890 = arith.mulf %886, %889 : vector<16x16xf32>
    %891 = vector.extract_strided_slice %783 {offsets = [16, 0], sizes = [16, 16], strides = [1, 1]} : vector<48x16xf32> to vector<16x16xf32>
    %892 = arith.subf %890, %891 : vector<16x16xf32>
    %893 = math.absf %892 : vector<16x16xf32>
    %894 = arith.mulf %893, %811 : vector<16x16xf32>
    %895 = vector.shape_cast %894 : vector<16x16xf32> to vector<1x16x16xf32>
    %cst_265 = arith.constant dense<0.000000e+00> : vector<1xf32>
    %896 = vector.multi_reduction <add>, %895, %cst_265 [1, 2] : vector<1x16x16xf32> to vector<1xf32>
    %897 = vector.shape_cast %896 : vector<1xf32> to vector<1x1x1xf32>
    %898 = vector.extract %897[0, 0, 0] : f32 from vector<1x1x1xf32>
    %899 = arith.addf %872, %898 : f32
    %900 = vector.extract_strided_slice %1 {offsets = [32, 0], sizes = [16, 16], strides = [1, 1]} : vector<48x16xf32> to vector<16x16xf32>
    %cst_266 = arith.constant dense<0.000000e+00> : vector<16x16xf32>
    %901 = tpu.matmul %822, %900, %cst_266 {dimension_numbers = #tpu.dot_dimension_numbers<[1], [0], [0], [1], [0, 0, 1, 1], [], []>} : vector<16x16xf32>, vector<16x16xf32>, vector<16x16xf32> -> vector<16x16xf32>
    %cst_267 = arith.constant dense<0.000000e+00> : vector<16x16xf32>
    %902 = tpu.matmul %901, %833, %cst_267 {dimension_numbers = #tpu.dot_dimension_numbers<[1], [0], [0], [1], [0, 0, 1, 1], [], []>} : vector<16x16xf32>, vector<16x16xf32>, vector<16x16xf32> -> vector<16x16xf32>
    %903 = arith.mulf %900, %900 : vector<16x16xf32>
    %cst_268 = arith.constant dense<0.000000e+00> : vector<16x16xf32>
    %904 = tpu.matmul %822, %903, %cst_268 {dimension_numbers = #tpu.dot_dimension_numbers<[1], [0], [0], [1], [0, 0, 1, 1], [], []>} : vector<16x16xf32>, vector<16x16xf32>, vector<16x16xf32> -> vector<16x16xf32>
    %cst_269 = arith.constant dense<0.000000e+00> : vector<16x16xf32>
    %905 = tpu.matmul %904, %833, %cst_269 {dimension_numbers = #tpu.dot_dimension_numbers<[1], [0], [0], [1], [0, 0, 1, 1], [], []>} : vector<16x16xf32>, vector<16x16xf32>, vector<16x16xf32> -> vector<16x16xf32>
    %906 = arith.mulf %902, %842 : vector<16x16xf32>
    %907 = arith.mulf %905, %842 : vector<16x16xf32>
    %908 = arith.mulf %906, %906 : vector<16x16xf32>
    %909 = arith.subf %907, %908 : vector<16x16xf32>
    %910 = arith.mulf %909, %845 : vector<16x16xf32>
    %cst_270 = arith.constant 0.000000e+00 : f32
    %911 = vector.broadcast %cst_270 : f32 to vector<16x16xf32>
    %912 = arith.maximumf %910, %911 : vector<16x16xf32>
    %913 = arith.subf %900, %906 : vector<16x16xf32>
    %cst_271 = arith.constant 9.99999997E-7 : f32
    %914 = vector.broadcast %cst_271 : f32 to vector<16x16xf32>
    %915 = arith.addf %912, %914 : vector<16x16xf32>
    %916 = math.rsqrt %915 : vector<16x16xf32>
    %917 = arith.mulf %913, %916 : vector<16x16xf32>
    %918 = vector.extract_strided_slice %783 {offsets = [32, 0], sizes = [16, 16], strides = [1, 1]} : vector<48x16xf32> to vector<16x16xf32>
    %919 = arith.subf %917, %918 : vector<16x16xf32>
    %920 = math.absf %919 : vector<16x16xf32>
    %921 = arith.mulf %920, %811 : vector<16x16xf32>
    %922 = vector.shape_cast %921 : vector<16x16xf32> to vector<1x16x16xf32>
    %cst_272 = arith.constant dense<0.000000e+00> : vector<1xf32>
    %923 = vector.multi_reduction <add>, %922, %cst_272 [1, 2] : vector<1x16x16xf32> to vector<1xf32>
    %924 = vector.shape_cast %923 : vector<1xf32> to vector<1x1x1xf32>
    %925 = vector.extract %924[0, 0, 0] : f32 from vector<1x1x1xf32>
    %926 = arith.addf %899, %925 : f32
    %927 = vector.shape_cast %811 : vector<16x16xf32> to vector<1x16x16xf32>
    %cst_273 = arith.constant dense<0.000000e+00> : vector<1xf32>
    %928 = vector.multi_reduction <add>, %927, %cst_273 [1, 2] : vector<1x16x16xf32> to vector<1xf32>
    %929 = vector.shape_cast %928 : vector<1xf32> to vector<1x1x1xf32>
    %930 = vector.extract %929[0, 0, 0] : f32 from vector<1x1x1xf32>
    %931 = vector.broadcast %926 : f32 to vector<1x1x1xf32>
    %c0_274 = arith.constant 0 : index
    %c0_275 = arith.constant 0 : index
    %c0_276 = arith.constant 0 : index
    %932 = vector.load %arg8[%c0_274, %c0_275, %c0_276] : memref<1x1x1xf32, #tpu.memory_space<vmem>>, vector<1x1x1xf32>
    tpu.vector_store %arg8[%c0_274, %c0_275, %c0_276], %931 {strides = array<i32>} : memref<1x1x1xf32, #tpu.memory_space<vmem>>, vector<1x1x1xf32>,
    %933 = vector.broadcast %930 : f32 to vector<1x1x1xf32>
    %c0_277 = arith.constant 0 : index
    %c0_278 = arith.constant 0 : index
    %c0_279 = arith.constant 0 : index
    %934 = vector.load %arg9[%c0_277, %c0_278, %c0_279] : memref<1x1x1xf32, #tpu.memory_space<vmem>>, vector<1x1x1xf32>
    tpu.vector_store %arg9[%c0_277, %c0_278, %c0_279], %933 {strides = array<i32>} : memref<1x1x1xf32, #tpu.memory_space<vmem>>, vector<1x1x1xf32>,
    return
  }
  func.func @transform_0(%arg0: i32) -> (i32, i32, i32) {
    %c0_i32 = arith.constant 0 : i32
    %c0_i32_0 = arith.constant 0 : i32
    %c0_i32_1 = arith.constant 0 : i32
    return %arg0, %c0_i32, %c0_i32_0 : i32, i32, i32
  }
  func.func @transform_1(%arg0: i32) -> (i32, i32, i32) {
    %c0_i32 = arith.constant 0 : i32
    %c0_i32_0 = arith.constant 0 : i32
    %c0_i32_1 = arith.constant 0 : i32
    return %arg0, %c0_i32, %c0_i32_0 : i32, i32, i32
  }
  func.func @transform_2(%arg0: i32) -> (i32, i32) {
    %c0_i32 = arith.constant 0 : i32
    %c0_i32_0 = arith.constant 0 : i32
    %c0_i32_1 = arith.constant 0 : i32
    return %c0_i32, %c0_i32_0 : i32, i32
  }
  func.func @transform_3(%arg0: i32) -> (i32, i32) {
    %c0_i32 = arith.constant 0 : i32
    %c0_i32_0 = arith.constant 0 : i32
    %c0_i32_1 = arith.constant 0 : i32
    return %c0_i32, %c0_i32_0 : i32, i32
  }
  func.func @transform_4(%arg0: i32) -> (i32, i32) {
    %c0_i32 = arith.constant 0 : i32
    %c0_i32_0 = arith.constant 0 : i32
    %c0_i32_1 = arith.constant 0 : i32
    return %c0_i32, %c0_i32_0 : i32, i32
  }
  func.func @transform_5(%arg0: i32) -> (i32, i32) {
    %c0_i32 = arith.constant 0 : i32
    %c0_i32_0 = arith.constant 0 : i32
    %c0_i32_1 = arith.constant 0 : i32
    return %c0_i32, %c0_i32_0 : i32, i32
  }
  func.func @transform_6(%arg0: i32) -> (i32, i32) {
    %c0_i32 = arith.constant 0 : i32
    %c0_i32_0 = arith.constant 0 : i32
    %c0_i32_1 = arith.constant 0 : i32
    return %c0_i32, %c0_i32_0 : i32, i32
  }
  func.func @transform_7(%arg0: i32) -> (i32, i32, i32) {
    %c0_i32 = arith.constant 0 : i32
    %c0_i32_0 = arith.constant 0 : i32
    %c0_i32_1 = arith.constant 0 : i32
    return %arg0, %c0_i32, %c0_i32_0 : i32, i32, i32
  }
  func.func @transform_8(%arg0: i32) -> (i32, i32, i32) {
    %c0_i32 = arith.constant 0 : i32
    %c0_i32_0 = arith.constant 0 : i32
    %c0_i32_1 = arith.constant 0 : i32
    return %arg0, %c0_i32, %c0_i32_0 : i32, i32, i32
  }
}

</mosaic_0001>

<bundles_post_ra>
// kernel: simmim_forward.1
= control target key start
LH: loop header
LB: loop body
LE: loop exit
PB: predicated region body
PF: predicated region fallthrough
CT: control target
= control target key end

     0   :  { %14 = vsyncpa [#allocation3], 0  ;;  %s13522_s0 = inlined_call_operand.hbm [shape: f32[2,48,16], index: 0, kind: input, shape index: {}]   ;;  %s13523_s1 = inlined_call_operand.vmem [shape: f32[2,4,4], index: 1, kind: input, shape index: {}]   ;;  %s13524_s2 = inlined_call_operand.vmem [shape: f32[48,32], index: 2, kind: input, shape index: {}]   ;;  %s13525_s3 = inlined_call_operand.vmem [shape: f32[1,32], index: 3, kind: input, shape index: {}]   ;;  %s13526_s4 = inlined_call_operand.vmem [shape: f32[1,32], index: 4, kind: input, shape index: {}]   ;;  %s13527_s5 = inlined_call_operand.vmem [shape: f32[32,48], index: 5, kind: input, shape index: {}]   ;;  %s13528_s6 = inlined_call_operand.vmem [shape: f32[1,48], index: 6, kind: input, shape index: {}]   ;;  %s13529_s7 = inlined_call_operand.vmem [shape: f32[2,1,1], index: 7, kind: output, shape index: {0}]   ;;  %s13530_s8 = inlined_call_operand.vmem [shape: f32[2,1,1], index: 8, kind: output, shape index: {1}]  }
   0x1   :  { %16 = vsyncpa [#allocation3 + $0x1], 0  ;;  %s11225_s27 = smov 0   ;;  %s11227_s28 = smov 0  }
   0x2   :  { %s11229_s29 = smov 0   ;;  %s11231_s30 = smov 0  }
   0x3 LB: > { %s11244_s9 = sadd.s32 4294967295, %s11164_s30   ;;  %s11247_s10 = sadd.s32 1, %s11164_s30   ;;  %s11164_s30 = sphi %s11231_s30, %s13551_s30   ;;  %s11160_s29 = sphi %s11229_s29, %s13550_s29   ;;  %s11156_s28 = sphi %s11227_s28, %s13549_s28   ;;  %s11152_s27 = sphi %s11225_s27, %s13548_s27  }
   0x4   : > { %s26_s11 = ssub.s32 %s11164_s30, %s11247_s10  ;;  %s29_s12 = sadd.s32 1, %s11160_s29 }
   0x5   : > { %p27_p0 = scmp.eq.s32.totalorder %s26_s11, 0  ;;  %p36_p1 = scmp.ne.s32.totalorder %s11160_s29, %s11156_s28 }
   0x6   : > { %p37_p2 = scmp.eq.s32.totalorder %s11164_s30, 0  ;;  %p42_p3 = scmp.ne.s32.totalorder %s11156_s28, %s11152_s27 }
   0x7   : > { %s11257_s13 = scalar_select %p27_p0, %s11160_s29, %s29_s12  }
   0x8   : > { %p38_p4 = por %p37_p2, %p36_p1  ;;  %p43_p5 = scmp.eq.s32.totalorder %s11244_s9, 0 }
   0x9   : > { %p11020_p6 = scmp.lt.s32.totalorder %s11164_s30, 2  ;;  %s264_s15 = sand.u32 1, %s11160_s29  }
   0xa   : > { %p11261_p7 = por %p43_p5, %p42_p3  ;;  %s11003_s16 = smul.u32 48, %s264_s15 }
   0xb   : > { %s11004_s17 = smul.u32 768, %s11164_s30  ;;  %p11267_p8 = pnand %p11020_p6, %p38_p4 }
   0xc   : > { %s268_s22 = scalar_lea.vmem [#allocation2], %s11003_s16  ;;  %s11279_s24 = scalar_lea.sflag [#allocation3], %s264_s15 }
   0xd   : > { %s11274_s21 = scalar_lea.hbm %s13522_s0, %s11004_s17  ;;  %s275_s23 = sshll.u32 %s268_s22, 4  ;;  %s11276_s23 = int_to_ptr.vmem [resolvable:$true] %s275_s23 }
   0xe   : > { %s11100_s25 = scalar_lea.hbm %s11274_s21, 768  ;;  %p11102_p11 = pneg %p11267_p8 }
   0xf   : > { %p11101_p10 = scmp.ne.s32.totalorder %s11274_s21, %s11100_s25  ;;  %s11105_s11 = scalar_lea.hbm %s13522_s0, 1536 }
  0x10   : > { %p11106_p0 = scmp.lt.u32.totalorder %s11274_s21, %s13522_s0  ;;  %p11107_p1 = scmp.lt.u32.totalorder %s11105_s11, %s11100_s25 }
  0x11   : > { %p11103_p12 = pnand %p11102_p11, %p11101_p10  ;;  %p11109_p3 = scmp.lt.u32.totalorder %s11100_s25, %s11274_s21 }
  0x12   : > { %p11108_p2 = por %p11107_p1, %p11106_p0 }
  0x13   : > { %p11104_p13 = pneg %p11103_p12 }
  0x14   : > { %p11110_p4 = por %p11109_p3, %p11108_p2 }
  0x16   : > { %p11111_p5 = pnand %p11110_p4, %p11104_p13 }
  0x18   : > { %11114 = shalt.err (!%p11111_p5)
}
  0x19   : > { %s11115_s15 = scalar_lea.vmem %s11276_s23, 768  ;;  %s11166_s17 = smov [#allocation2]  }
  0x1a   : > { %p11116_p6 = scmp.ne.s32.totalorder %s11276_s23, %s11115_s15  ;;  %s11120_s19 = sshll.u32 %s11166_s17, 4  ;;  %s11121_s19 = int_to_ptr.vmem [resolvable:$false] %s11120_s19 }
  0x1b   : > { %s11122_s20 = scalar_lea.vmem %s11121_s19, 1536  ;;  %p11123_p9 = scmp.lt.s32.totalorder %s11276_s23, %s11121_s19 }
  0x1c   : > { %p11118_p10 = pnand %p11116_p6, %p11102_p11  ;;  %p11124_p0 = scmp.lt.s32.totalorder %s11122_s20, %s11115_s15 }
  0x1e   : > { %p11119_p12 = pneg %p11118_p10  ;;  %p11125_p1 = por %p11124_p0, %p11123_p9 }
  0x20   : > { %p11126_p2 = pnand %p11125_p1, %p11119_p12 }
  0x22   : > { %11129 = shalt.err (!%p11126_p2)
}
  0x23   : > { %s11167_s22 = smov 128   ;;  %s11168_s25 = smov 8  }
  0x24   : > { %11019 = dma.hbm_to_vmem [thread:$0]  (!%p11267_p8), %s11274_s21, 768, %s11276_s23, %s11279_s24, %s11167_s22, %s11167_s22, %s11168_s25  }
  0x25   : > { %p290_p11 = scmp.lt.s32.totalorder %s11164_s30, 3  ;;  %p13533_p13 = scmp.ge.s32.totalorder %s11164_s30, 1 }
  0x27   : > { %p291_p3 = pnand %p13533_p13, %p290_p11 }
  0x28   : > { %s296_s26 = sand.u32 (!%p291_p3), 1, %s11156_s28  }
  0x29   : > { %294 = sbr.rel (%p291_p3) target bundleno = 4412 (0x113c), region = 48  ;;  %s297_s11 = scalar_lea.sflag (!%p291_p3), [#allocation3], %s296_s26 }
  0x2a   : > { %s11005_s27 = smul.u32 (!%p291_p3), 48, %s296_s26 }
  0x2c   : > { %s11311_s12 = scalar_lea.vmem (!%p291_p3), [#allocation2], %s11005_s27 }
  0x30   : > { %11147 = dma.done.wait (%p11261_p7), %s297_s11, 768  }
  0x31   : > { %11149 = vsyncadd (%p11261_p7), %s297_s11, 4294966528  ;;  %v355_v0 = vlaneseq  ;;  %v11169_v1 = vmov 0.0|0.0   ;;  %vm11170_vm0 = vmmov 0   ;;  %v11171_v2 = vmov 0.0   ;;  %v348_v7 = vld [vmem:[%s11311_s12] sm:$0xff]  ;;  %v349_v8 = vld [vmem:[%s11311_s12 + $0x8] sm:$0xff] }
  0x32   : > { %10190 = vmatprep.subr.bf16.mxu1 %v11169_v1  ;;  %10181 = vmatprep.subr.bf16.mxu0 %v11169_v1  ;;  %v350_v9 = vld [vmem:[%s11311_s12 + $0x10] sm:$0xff]  ;;  %v11340_v13 = vpack.c.bf16 %v349_v8, %v348_v7  ;;  %v351_v14 = vld [vmem:[%s11311_s12 + $0x18] sm:$0xff]  ;;  %v352_v22 = vld [vmem:[%s11311_s12 + $0x20] sm:$0xff]  ;;  %vm385_vm8 = vcmask 392192   ;;  %v11172_v30 = vmov 1.0|1.0  }
  0x33   : > { %9668 = vmatprep.mubr.msk.f32.mxu1 %vm11170_vm0, %v11171_v2  ;;  %v11321_v3 = vshrl.u32 %v355_v0, 7  ;;  %9653 = vmatprep.mubr.msk.f32.mxu0 %vm11170_vm0, %v11171_v2  ;;  %v11333_v10 = vand.u32 127, %v355_v0  ;;  %v11352_v18 = vpack.c.bf16 %v351_v14, %v350_v9  ;;  %v353_v23 = vld [vmem:[%s11311_s12 + $0x28] sm:$0xff]  ;;  %p338_p7 = scmp.lt.s32.totalorder %s11244_s9, 1  ;;  %s11176_s30 = smov 80  }
  0x34   : > { %10192 = vmatpush3.bf16.msra.mxu1 %v11340_v13  ;;  %10183 = vmatpush3.bf16.msra.mxu0 %v11340_v13  ;;  %v11368_v27 = vpack.c.bf16 %v353_v23, %v352_v22  ;;  %s11177_s14 = smov 32   ;;  %s11178_s16 = smov 112  }
  0x35   : > { %v11326_v4 = vadd.s32 8, %v11321_v3  ;;  %v365_v5 = vshra.s32 %v11321_v3, 2  ;;  %v11336_v11 = vmul.u32 4, %v11321_v3  ;;  %v11346_v16 = vand.u32 3, %v11321_v3  ;;  %10193 = vmatprep.subr.bf16.mxu1 %v11169_v1  ;;  %10184 = vmatprep.subr.bf16.mxu0 %v11169_v1  ;;  %s13553_s9 = smov (!%p338_p7, %s11244_s9), 1 }
  0x36   : > { %v11356_v19 = vadd.s32 128, %v11333_v10  ;;  %s8366_s25 = sshll.u32 %s13553_s9, 2  ;;  %s344_s24 = scalar_lea.vmem %s13529_s7, %s13553_s9 }
  0x37   : > { %v366_v6 = vshra.s32 %v11326_v4, 2  ;;  %v11338_v12 = vmul.u32 48, %v365_v5  ;;  %v11349_v17 = vand.u32 3, %v11326_v4  ;;  %v459_v24 = vadd.s32 1, %v11336_v11  ;;  %s11710_s11 = scalar_lea.vmem %s13523_s1, %s8366_s25  ;;  %s347_s19 = scalar_lea.vmem %s13530_s8, %s13553_s9 }
  0x38   : > { %10195 = vmatpush3.bf16.msra.mxu1 %v11352_v18  ;;  %10186 = vmatpush3.bf16.msra.mxu0 %v11352_v18  ;;  %vm360_vm4 = vcmp.eq.s32.totalorder %v11333_v10, %v11336_v11  ;;  %v701_v31 = vadd.s32 2, %v11336_v11  ;;  %v11424_v36 = vadd.s32 16, %v11336_v11  ;;  %v870_v54 = vadd.s32 3, %v11336_v11 }
  0x39   : > { %v11343_v15 = vmul.u32 48, %v366_v6  ;;  %v463_v20 = vadd.s32 4, %v11338_v12  ;;  %10196 = vmatprep.subr.bf16.mxu1 %v11169_v1  ;;  %vm460_vm3 = vcmp.eq.s32.totalorder %v11333_v10, %v459_v24  ;;  %10187 = vmatprep.subr.bf16.mxu0 %v11169_v1  ;;  %v8367_v29 = vsel %vm360_vm4, 1.0, %v11171_v2 }
  0x3a   : > { %v8373_v28 = vsel %vm460_vm3, 1.0, %v11171_v2  ;;  %vm702_vm10 = vcmp.eq.s32.totalorder %v11333_v10, %v701_v31  ;;  %v371_v33 = vadd.s32 %v11346_v16, %v11338_v12  ;;  %v1208_v38 = vadd.s32 1, %v11424_v36 }
  0x3b   : > { %v464_v21 = vadd.s32 4, %v11343_v15  ;;  %v465_v25 = vadd.s32 %v463_v20, %v11346_v16  ;;  %v8389_v32 = vsel %vm702_vm10, 1.0, %v11171_v2  ;;  %v372_v34 = vadd.s32 %v11349_v17, %v11343_v15 }
  0x3c   : > { %10198 = vmatpush3.bf16.msra.mxu1 %v11368_v27  ;;  %10189 = vmatpush3.bf16.msra.mxu0 %v11368_v27  ;;  %vm374_vm11 = vcmp.eq.s32.totalorder %v11356_v19, %v371_v33  ;;  %vm373_vm13 = vcmp.eq.s32.totalorder %v11333_v10, %v371_v33  ;;  %vm1209_vm3 = vcmp.eq.s32.totalorder %v11333_v10, %v1208_v38  ;;  %v705_v40 = vadd.s32 8, %v11338_v12  ;;  %v2402_v38 = vld [vmem:[%s13527_s5 + $0x18] sm:$0xff] }
  0x3d   : > { %v466_v26 = vadd.s32 %v464_v21, %v11349_v17  ;;  %vm468_vm1 = vcmp.eq.s32.totalorder %v11356_v19, %v465_v25  ;;  %vm467_vm6 = vcmp.eq.s32.totalorder %v11333_v10, %v465_v25  ;;  %10207 = vmatprep.subr.bf16.mxu1 %v11169_v1  ;;  %vm376_vm12 = vcmp.eq.s32.totalorder %v11356_v19, %v372_v34 }
  0x3e   : > { %vm375_vm14 = vcmp.eq.s32.totalorder %v11333_v10, %v372_v34  ;;  %vm10203_vm15 = vmpackc.low %vm376_vm12, %vm374_vm11  ;;  %v8422_v39 = vsel %vm1209_vm3, 1.0, %v11171_v2  ;;  %v706_v41 = vadd.s32 8, %v11343_v15  ;;  %v707_v42 = vadd.s32 %v705_v40, %v11346_v16 }
  0x3f   : > { %vm470_vm2 = vcmp.eq.s32.totalorder %v11356_v19, %v466_v26  ;;  %vm469_vm7 = vcmp.eq.s32.totalorder %v11333_v10, %v466_v26  ;;  %9669 = vmatmul.mubr.msk.f32.vlgmr.msra.gmra.mrb[0].mxu1 %vm385_vm8, %v8373_v28  ;;  %9654 = vmatmul.mubr.msk.f32.vlgmr.msra.gmra.mrb[0].mxu0 %vm385_vm8, %v8367_v29  ;;  %v874_v50 = vadd.s32 12, %v11338_v12  ;;  %v875_v51 = vadd.s32 12, %v11343_v15 }
  0x40   : > { %vm10199_vm5 = vmpackc.low %vm470_vm2, %vm468_vm1  ;;  %10209 = vmatpush3.bf16.msra.mxu1 %v11340_v13  ;;  %9683 = vmatprep.mubr.msk.f32.mxu1 %vm11170_vm0, %v11171_v2  ;;  %vm1040_vm2 = vcmp.eq.s32.totalorder %v11333_v10, %v11424_v36  ;;  %v708_v43 = vadd.s32 %v706_v41, %v11349_v17  ;;  %vm710_vm4 = vcmp.eq.s32.totalorder %v11356_v19, %v707_v42  ;;  %v1043_v56 = vadd.s32 16, %v11338_v12 }
  0x41   : > { %10200 = vmatprep.subr.msk.bf16.mxu0 %vm10199_vm5, %v11172_v30  ;;  %vm10201_vm9 = vmpackc.low %vm469_vm7, %vm467_vm6  ;;  %10210 = vmatprep.subr.bf16.mxu1 %v11169_v1  ;;  %v8411_v37 = vsel %vm1040_vm2, 1.0, %v11171_v2  ;;  %vm552_vm6 = vcmask 130048   ;;  %v876_v52 = vadd.s32 %v874_v50, %v11346_v16  ;;  %v877_v53 = vadd.s32 %v875_v51, %v11349_v17 }
  0x42   : > { %10202 = vmatpush1.bf16.msk.msra.mxu0 %vm10201_vm9, %v11172_v30  ;;  %620 = vmatprep.mubr.f32.mxu0 %v11171_v2  ;;  %vm11419_vm1 = vmpackc.low %vm375_vm14, %vm373_vm13  ;;  %vm712_vm5 = vcmp.eq.s32.totalorder %v11356_v19, %v708_v43  ;;  %vm709_vm9 = vcmp.eq.s32.totalorder %v11333_v10, %v707_v42  ;;  %vm711_vm10 = vcmp.eq.s32.totalorder %v11333_v10, %v708_v43  ;;  %v1044_v57 = vadd.s32 16, %v11343_v15 }
  0x43   : > { %10204 = vmatprep.subr.msk.bf16.mxu0 %vm10203_vm15, %v11172_v30  ;;  %vm10216_vm7 = vmpackc.low %vm712_vm5, %vm710_vm4  ;;  %vm879_vm12 = vcmp.eq.s32.totalorder %v11356_v19, %v876_v52  ;;  %vm881_vm13 = vcmp.eq.s32.totalorder %v11356_v19, %v877_v53  ;;  %vm871_vm14 = vcmp.eq.s32.totalorder %v11333_v10, %v870_v54  ;;  %vm880_vm2 = vcmp.eq.s32.totalorder %v11333_v10, %v877_v53 }
  0x44   : > { %10212 = vmatpush3.bf16.msra.mxu1 %v11352_v18  ;;  %vm10218_vm11 = vmpackc.low %vm711_vm10, %vm709_vm9  ;;  %v8400_v55 = vsel %vm871_vm14, 1.0, %v11171_v2  ;;  %v1045_v58 = vadd.s32 %v1043_v56, %v11346_v16  ;;  %v1046_v59 = vadd.s32 %v1044_v57, %v11349_v17  ;;  %v1546_v5 = vadd.s32 3, %v11424_v36 }
  0x45   : > { %10213 = vmatprep.subr.bf16.mxu1 %v11169_v1  ;;  %vm10229_vm15 = vmpackc.low %vm881_vm13, %vm879_vm12  ;;  %v11513_v7 = vadd.s32 32, %v11336_v11  ;;  %v1212_v9 = vadd.s32 20, %v11338_v12  ;;  %v1213_v14 = vadd.s32 20, %v11343_v15  ;;  %v1381_v24 = vadd.s32 24, %v11338_v12 }
  0x46   : > { %vm1048_vm4 = vcmp.eq.s32.totalorder %v11356_v19, %v1045_v58  ;;  %vm1050_vm5 = vcmp.eq.s32.totalorder %v11356_v19, %v1046_v59  ;;  %vm1049_vm9 = vcmp.eq.s32.totalorder %v11333_v10, %v1046_v59  ;;  %vm1547_vm12 = vcmp.eq.s32.totalorder %v11333_v10, %v1546_v5 }
  0x47   : > { %vm10242_vm10 = vmpackc.low %vm1050_vm5, %vm1048_vm4  ;;  %v8444_v6 = vsel %vm1547_vm12, 1.0, %v11171_v2  ;;  %vm1716_vm13 = vcmp.eq.s32.totalorder %v11333_v10, %v11513_v7  ;;  %v1214_v20 = vadd.s32 %v1212_v9, %v11346_v16  ;;  %v1215_v21 = vadd.s32 %v1213_v14, %v11349_v17 }
  0x48   : > { %10215 = vmatpush3.bf16.msra.mxu1 %v11368_v27  ;;  %v8455_v8 = vsel %vm1716_vm13, 1.0, %v11171_v2  ;;  %v1382_v25 = vadd.s32 24, %v11343_v15  ;;  %v1383_v26 = vadd.s32 %v1381_v24, %v11346_v16  ;;  %v1377_v29 = vadd.s32 2, %v11424_v36 }
  0x49   : > { %10233 = vmatprep.subr.bf16.mxu1 %v11169_v1  ;;  %vm1217_vm14 = vcmp.eq.s32.totalorder %v11356_v19, %v1214_v20  ;;  %v1551_v33 = vadd.s32 28, %v11343_v15  ;;  %v2053_v41 = vadd.s32 2, %v11513_v7  ;;  %v2222_v43 = vadd.s32 3, %v11513_v7 }
  0x4a   : > { %v1384_v28 = vadd.s32 %v1382_v25, %v11349_v17  ;;  %vm1386_vm5 = vcmp.eq.s32.totalorder %v11356_v19, %v1383_v26  ;;  %v1888_v51 = vadd.s32 36, %v11338_v12  ;;  %v2057_v57 = vadd.s32 40, %v11338_v12 }
  0x4b   : > { %9684 = vmatmul.mubr.msk.f32.vlgmr.msra.gmra.mrb[2].mxu1 %vm385_vm8, %v8389_v32  ;;  %v1550_v32 = vadd.s32 28, %v11338_v12  ;;  %v1553_v35 = vadd.s32 %v1551_v33, %v11349_v17  ;;  %v2226_v5 = vadd.s32 44, %v11338_v12  ;;  %v11173_v25 = vmov 1  }
  0x4c   : > { %10235 = vmatpush3.bf16.msra.mxu1 %v11340_v13  ;;  %9713 = vmatprep.mubr.msk.f32.mxu1 %vm11170_vm0, %v11171_v2  ;;  %vm1387_vm12 = vcmp.eq.s32.totalorder %v11333_v10, %v1384_v28  ;;  %v1890_v53 = vadd.s32 %v1888_v51, %v11346_v16  ;;  %v2059_v59 = vadd.s32 %v2057_v57, %v11346_v16 }
  0x4d   : > { %10236 = vmatprep.subr.bf16.mxu1 %v11169_v1  ;;  %v1552_v34 = vadd.s32 %v1550_v32, %v11346_v16  ;;  %11067 = vset.pattern.permute.xlu1 %v11173_v25 }
  0x50   : > { %10238 = vmatpush3.bf16.msra.mxu1 %v11352_v18 }
  0x51   : > { %10239 = vmatprep.subr.bf16.mxu1 %v11169_v1 }
  0x54   : > { %10241 = vmatpush3.bf16.msra.mxu1 %v11368_v27 }
  0x55   : > { %10246 = vmatprep.subr.bf16.mxu1 %v11169_v1 }
  0x57   : > { %9714 = vmatmul.mubr.msk.f32.vlgmr.msra.gmra.mrb[4].mxu1 %vm385_vm8, %v8411_v37 }
  0x58   : > { %10248 = vmatpush3.bf16.msra.mxu1 %v11340_v13  ;;  %9728 = vmatprep.mubr.msk.f32.mxu1 %vm11170_vm0, %v11171_v2 }
  0x59   : > { %10249 = vmatprep.subr.bf16.mxu1 %v11169_v1 }
  0x5c   : > { %10251 = vmatpush3.bf16.msra.mxu1 %v11352_v18 }
  0x5d   : > { %10252 = vmatprep.subr.bf16.mxu1 %v11169_v1 }
  0x60   : > { %10254 = vmatpush3.bf16.msra.mxu1 %v11368_v27 }
  0x61   : > { %10272 = vmatprep.subr.bf16.mxu1 %v11169_v1 }
  0x63   : > { %9729 = vmatmul.mubr.msk.f32.vlgmr.msra.gmra.mrb[6].mxu1 %vm385_vm8, %v8422_v39 }
  0x64   : > { %10274 = vmatpush3.bf16.msra.mxu1 %v11340_v13  ;;  %9758 = vmatprep.mubr.msk.f32.mxu1 %vm11170_vm0, %v11171_v2 }
  0x65   : > { %10275 = vmatprep.subr.bf16.mxu1 %v11169_v1 }
  0x68   : > { %10277 = vmatpush3.bf16.msra.mxu1 %v11352_v18 }
  0x69   : > { %10278 = vmatprep.subr.bf16.mxu1 %v11169_v1 }
  0x6c   : > { %10280 = vmatpush3.bf16.msra.mxu1 %v11368_v27 }
  0x6d   : > { %10285 = vmatprep.subr.bf16.mxu1 %v11169_v1 }
  0x6f   : > { %9759 = vmatmul.mubr.msk.f32.vlgmr.msra.gmra.mrb[8].mxu1 %vm385_vm8, %v8444_v6  ;;  %v2227_v6 = vadd.s32 44, %v11343_v15 }
  0x70   : > { %10287 = vmatpush3.bf16.msra.mxu1 %v11340_v13  ;;  %9773 = vmatprep.mubr.msk.f32.mxu1 %vm11170_vm0, %v11171_v2 }
  0x71   : > { %10288 = vmatprep.subr.bf16.mxu1 %v11169_v1 }
  0x74   : > { %10290 = vmatpush3.bf16.msra.mxu1 %v11352_v18 }
  0x75   : > { %10291 = vmatprep.subr.bf16.mxu1 %v11169_v1 }
  0x78   : > { %10293 = vmatpush3.bf16.msra.mxu1 %v11368_v27 }
  0x79   : > { %10311 = vmatprep.subr.bf16.mxu1 %v11169_v1 }
  0x7b   : > { %9774 = vmatmul.mubr.msk.f32.vlgmr.msra.gmra.mrb[10].mxu1 %vm385_vm8, %v8455_v8  ;;  %v2229_v8 = vadd.s32 %v2227_v6, %v11349_v17  ;;  %v11804_v6 = vadd.s32 32, %v11321_v3 }
  0x7c   : > { %10313 = vmatpush3.bf16.msra.mxu1 %v11340_v13  ;;  %9803 = vmatprep.mubr.msk.f32.mxu1 %vm11170_vm0, %v11171_v2 }
  0x7d   : > { %10314 = vmatprep.subr.bf16.mxu1 %v11169_v1 }
  0x80   : > { %10316 = vmatpush3.bf16.msra.mxu1 %v11352_v18 }
  0x81   : > { %10317 = vmatprep.subr.bf16.mxu1 %v11169_v1 }
  0x84   : > { %10319 = vmatpush3.bf16.msra.mxu1 %v11368_v27 }
  0x85   : > { %10324 = vmatprep.subr.bf16.mxu1 %v11169_v1 }
 0x112   : > { %v548_v44 = vpop.f32.mrb[0].mxu1  ;;  %v455_v45 = vpop.f32.mrb[0].mxu0 }
 0x113   : > { %v9670_v46 = vpop.f32.mrb[1].mxu1  ;;  %8383 = vmatmul.mubr.msk.f32.vlgmr.msra.gmra.mrb[2].mxu0 %vm552_vm6, %v548_v44  ;;  %v9655_v47 = vpop.f32.mrb[1].mxu0 }
 0x114   : > { %10206 = vmatpush1.bf16.msk.msra.mxu0 %vm11419_vm1, %v11172_v30  ;;  %694 = vmatprep.mubr.f32.mxu0 %v11171_v2  ;;  %vm878_vm1 = vcmp.eq.s32.totalorder %v11333_v10, %v876_v52  ;;  %v1720_v46 = vadd.s32 32, %v11343_v15  ;;  %v1889_v52 = vadd.s32 36, %v11343_v15 }
 0x115   : > { %10217 = vmatprep.subr.msk.bf16.mxu0 %vm10216_vm7, %v11172_v30  ;;  %vm10231_vm3 = vmpackc.low %vm880_vm2, %vm878_vm1  ;;  %vm1047_vm7 = vcmp.eq.s32.totalorder %v11333_v10, %v1045_v58  ;;  %vm1216_vm2 = vcmp.eq.s32.totalorder %v11333_v10, %v1214_v20  ;;  %v2058_v58 = vadd.s32 40, %v11343_v15  ;;  %v2392_v15 = vld [vmem:[%s13524_s2 + $0x8] sm:$0xff]  ;;  %v2394_v20 = vld [vmem:[%s13524_s2 + $0x18] sm:$0xff] }
 0x116   : > { %v1891_v54 = vadd.s32 %v1889_v52, %v11349_v17 }
 0x11b   : > { %8388 = vmatmul.mubr.msk.f32.vlgmr.msra.gmra.mrb[2].mxu0 %vm552_vm6, %v455_v45  ;;  %v1719_v45 = vadd.s32 32, %v11338_v12  ;;  %v2391_v12 = vld [vmem:[%s13524_s2] sm:$0xff] }
 0x11c   : > { %10219 = vmatpush1.bf16.msk.msra.mxu0 %vm10218_vm11, %v11172_v30  ;;  %861 = vmatprep.mubr.f32.mxu0 %v11171_v2  ;;  %vm11500_vm11 = vmpackc.low %vm1049_vm9, %vm1047_vm7  ;;  %vm1388_vm7 = vcmp.eq.s32.totalorder %v11356_v19, %v1384_v28  ;;  %vm1378_vm9 = vcmp.eq.s32.totalorder %v11333_v10, %v1377_v29  ;;  %v11174_v29 = vmov 0  }
 0x11d   : > { %10220 = vmatprep.subr.bf16.mxu0 %v11169_v1  ;;  %v8433_v31 = vsel %vm1378_vm9, 1.0, %v11171_v2  ;;  %v1721_v47 = vadd.s32 %v1719_v45, %v11346_v16  ;;  %11066 = vset.pattern.permute.xlu0 %v11174_v29 }
 0x11e   : > { %v790_v48 = vpop.f32.mrb[2].mxu1 }
 0x11f   : > { %v9685_v49 = vpop.f32.mrb[3].mxu1  ;;  %vm1724_vm9 = vcmp.eq.s32.totalorder %v11356_v19, %v1721_v47 }
 0x123   : > { %8399 = vmatmul.mubr.msk.f32.vlgmr.msra.gmra.mrb[2].mxu0 %vm552_vm6, %v790_v48  ;;  %v1722_v48 = vadd.s32 %v1720_v46, %v11349_v17 }
 0x124   : > { %10222 = vmatpush3.bf16.msra.mxu0 %v11340_v13  ;;  %9698 = vmatprep.mubr.msk.f32.mxu0 %vm11170_vm0, %v11171_v2 }
 0x125   : > { %10223 = vmatprep.subr.bf16.mxu0 %v11169_v1 }
 0x128   : > { %10225 = vmatpush3.bf16.msra.mxu0 %v11352_v18 }
 0x129   : > { %10226 = vmatprep.subr.bf16.mxu0 %v11169_v1 }
 0x12a   : > { %v1128_v60 = vpop.f32.mrb[4].mxu1 }
 0x12b   : > { %v9715_v61 = vpop.f32.mrb[5].mxu1 }
 0x12c   : > { %10228 = vmatpush3.bf16.msra.mxu0 %v11368_v27 }
 0x12d   : > { %10230 = vmatprep.subr.msk.bf16.mxu0 %vm10229_vm15, %v11172_v30  ;;  %vm1219_vm15 = vcmp.eq.s32.totalorder %v11356_v19, %v1215_v21 }
 0x12e   : > { %vm10255_vm1 = vmpackc.low %vm1219_vm15, %vm1217_vm14  ;;  %vm1555_vm14 = vcmp.eq.s32.totalorder %v11356_v19, %v1552_v34  ;;  %vm1557_vm15 = vcmp.eq.s32.totalorder %v11356_v19, %v1553_v35 }
 0x12f   : > { %9699 = vmatmul.mubr.msk.f32.vlgmr.msra.gmra.mrb[4].mxu0 %vm385_vm8, %v8400_v55  ;;  %v1884_v55 = vadd.s32 1, %v11513_v7  ;;  %v2228_v7 = vadd.s32 %v2226_v5, %v11346_v16  ;;  %v11675_v16 = vpack.c.bf16 %v2392_v15, %v2391_v12  ;;  %v2785_v15 = vadd.s32 48, %v11804_v6 }
 0x130   : > { %10232 = vmatpush1.bf16.msk.msra.mxu0 %vm10231_vm3, %v11172_v30  ;;  %1030 = vmatprep.mubr.f32.mxu0 %v11171_v2  ;;  %vm1218_vm3 = vcmp.eq.s32.totalorder %v11333_v10, %v1215_v21 }
 0x131   : > { %10243 = vmatprep.subr.msk.bf16.mxu0 %vm10242_vm10, %v11172_v30  ;;  %vm10257_vm4 = vmpackc.low %vm1218_vm3, %vm1216_vm2  ;;  %vm1556_vm2 = vcmp.eq.s32.totalorder %v11333_v10, %v1553_v35  ;;  %v2400_v35 = vld [vmem:[%s13527_s5 + $0x8] sm:$0xff] }
 0x132   : > { %vm10268_vm10 = vmpackc.low %vm1388_vm7, %vm1386_vm5  ;;  %vm2054_vm5 = vcmp.eq.s32.totalorder %v11333_v10, %v2053_v41  ;;  %vm2223_vm7 = vcmp.eq.s32.totalorder %v11333_v10, %v2222_v43  ;;  %v11754_v41 = vld [vmem:[%s13525_s3] ss:$0 sm:$0xff] }
 0x133   : > { %vm10281_vm3 = vmpackc.low %vm1557_vm15, %vm1555_vm14  ;;  %v8477_v42 = vsel %vm2054_vm5, 1.0, %v11171_v2  ;;  %v8488_v44 = vsel %vm2223_vm7, 1.0, %v11171_v2  ;;  %vm1893_vm15 = vcmp.eq.s32.totalorder %v11356_v19, %v1890_v53  ;;  %vm1894_vm5 = vcmp.eq.s32.totalorder %v11333_v10, %v1891_v54 }
 0x134   : > { %9804 = vmatmul.mubr.msk.f32.vlgmr.msra.gmra.mrb[12].mxu1 %vm385_vm8, %v8477_v42  ;;  %v11759_v42 = vld [vmem:[%s13526_s4] ss:$0 sm:$0xff] }
 0x135   : > { %10326 = vmatpush3.bf16.msra.mxu1 %v11340_v13  ;;  %9818 = vmatprep.mubr.msk.f32.mxu1 %vm11170_vm0, %v11171_v2 }
 0x136   : > { %v1297_v63 = vpop.f32.mrb[6].mxu1  ;;  %10327 = vmatprep.subr.bf16.mxu1 %v11169_v1 }
 0x137   : > { %v9730_v0 = vpop.f32.mrb[7].mxu1 }
 0x139   : > { %10329 = vmatpush3.bf16.msra.mxu1 %v11352_v18 }
 0x13a   : > { %10330 = vmatprep.subr.bf16.mxu1 %v11169_v1 }
 0x13d   : > { %10332 = vmatpush3.bf16.msra.mxu1 %v11368_v27 }
 0x13e   : > { %10346 = vmatprep.subr.bf16.mxu1 %v11169_v1 }
 0x140   : > { %9819 = vmatmul.mubr.msk.f32.vlgmr.msra.gmra.mrb[14].mxu1 %vm385_vm8, %v8488_v44 }
 0x141   : > { %9844 = vmatprep.mubr.msk.f32.mxu1 %vm11170_vm0, %v11171_v2 }
 0x142   : > { %v1635_v36 = vpop.f32.mrb[8].mxu1 }
 0x143   : > { %v9760_v37 = vpop.f32.mrb[9].mxu1 }
 0x144   : > { %v2401_v37 = vld [vmem:[%s13527_s5 + $0x10] sm:$0xff] }
 0x14e   : > { %v1804_v39 = vpop.f32.mrb[10].mxu1 }
 0x14f   : > { %v9775_v40 = vpop.f32.mrb[11].mxu1 }
 0x202   : > { %v959_v22 = vpop.f32.mrb[4].mxu0 }
 0x203   : > { %v9700_v23 = vpop.f32.mrb[5].mxu0  ;;  %8410 = vmatmul.mubr.msk.f32.vlgmr.msra.gmra.mrb[2].mxu0 %vm552_vm6, %v959_v22  ;;  %v2395_v22 = vld [vmem:[%s13524_s2 + $0x20] sm:$0xff] }
 0x204   : > { %10245 = vmatpush1.bf16.msk.msra.mxu0 %vm11500_vm11, %v11172_v30  ;;  %1199 = vmatprep.mubr.f32.mxu0 %v11171_v2  ;;  %vm1385_vm11 = vcmp.eq.s32.totalorder %v11333_v10, %v1383_v26  ;;  %v2396_v23 = vld [vmem:[%s13524_s2 + $0x28] sm:$0xff]  ;;  %v11713_v26 = vld [vmem:[%s11710_s11] sm:$0xf] }
 0x205   : > { %10256 = vmatprep.subr.msk.bf16.mxu0 %vm10255_vm1, %v11172_v30  ;;  %vm10270_vm13 = vmpackc.low %vm1387_vm12, %vm1385_vm11  ;;  %vm1554_vm1 = vcmp.eq.s32.totalorder %v11333_v10, %v1552_v34  ;;  %vm1723_vm12 = vcmp.eq.s32.totalorder %v11333_v10, %v1721_v47  ;;  %v11697_v24 = vpack.c.bf16 %v2396_v23, %v2395_v22  ;;  %v11716_v28 = vsub.f32 1.0, %v11713_v26  ;;  %v2399_v34 = vld [vmem:[%s13527_s5] sm:$0xff] }
 0x207   : > { %v2142_v61 = vpop.f32.mrb[12].mxu1  ;;  %2486 = vperm.xlu0 %11066, %v11716_v28  }
 0x208   : > { %v9805_v62 = vpop.f32.mrb[13].mxu1 }
 0x20b   : > { %8421 = vmatmul.mubr.msk.f32.vlgmr.msra.gmra.mrb[2].mxu0 %vm552_vm6, %v1128_v60  ;;  %v2060_v60 = vadd.s32 %v2058_v58, %v11349_v17  ;;  %v2393_v17 = vld [vmem:[%s13524_s2 + $0x10] sm:$0xff]  ;;  %2498 = vperm.xlu0 %11066, %v11713_v26   ;;  %v11792_v58 = vadd.s32 48, %v11321_v3 }
 0x20c   : > { %10258 = vmatpush1.bf16.msk.msra.mxu0 %vm10257_vm4, %v11172_v30  ;;  %1368 = vmatprep.mubr.f32.mxu0 %v11171_v2  ;;  %vm11581_vm4 = vmpackc.low %vm1556_vm2, %vm1554_vm1  ;;  %vm1895_vm1 = vcmp.eq.s32.totalorder %v11356_v19, %v1891_v54  ;;  %vm1885_vm2 = vcmp.eq.s32.totalorder %v11333_v10, %v1884_v55  ;;  %v11685_v21 = vpack.c.bf16 %v2394_v20, %v2393_v17 }
 0x20d   : > { %10259 = vmatprep.subr.bf16.mxu0 %v11169_v1  ;;  %v8466_v56 = vsel %vm1885_vm2, 1.0, %v11171_v2 }
 0x20f   : > { %11068 = vset.pattern.permute.xlu0 %v11173_v25 }
 0x210   : > { %2703 = vperm.xlu0 %11068, %v11713_v26  }
 0x213   : > { %8432 = vmatmul.mubr.msk.f32.vlgmr.msra.gmra.mrb[2].mxu0 %vm552_vm6, %v1297_v63  ;;  %v2311_v63 = vpop.f32.mrb[14].mxu1 }
 0x214   : > { %10261 = vmatpush3.bf16.msra.mxu0 %v11340_v13  ;;  %9743 = vmatprep.mubr.msk.f32.mxu0 %vm11170_vm0, %v11171_v2  ;;  %v9820_v0 = vpop.f32.mrb[15].mxu1 }
 0x215   : > { %10262 = vmatprep.subr.bf16.mxu0 %v11169_v1 }
 0x218   : > { %10264 = vmatpush3.bf16.msra.mxu0 %v11352_v18 }
 0x219   : > { %10265 = vmatprep.subr.bf16.mxu0 %v11169_v1 }
 0x21c   : > { %10267 = vmatpush3.bf16.msra.mxu0 %v11368_v27 }
 0x21d   : > { %10269 = vmatprep.subr.msk.bf16.mxu0 %vm10268_vm10, %v11172_v30  ;;  %vm1726_vm10 = vcmp.eq.s32.totalorder %v11356_v19, %v1722_v48 }
 0x21e   : > { %vm10294_vm11 = vmpackc.low %vm1726_vm10, %vm1724_vm9  ;;  %vm2062_vm9 = vcmp.eq.s32.totalorder %v11356_v19, %v2059_v59  ;;  %vm2064_vm10 = vcmp.eq.s32.totalorder %v11356_v19, %v2060_v60 }
 0x21f   : > { %9744 = vmatmul.mubr.msk.f32.vlgmr.msra.gmra.mrb[6].mxu0 %vm385_vm8, %v8433_v31  ;;  %v11175_v31 = vmov 2  }
 0x220   : > { %10271 = vmatpush1.bf16.msk.msra.mxu0 %vm10270_vm13, %v11172_v30  ;;  %1537 = vmatprep.mubr.f32.mxu0 %v11171_v2  ;;  %vm1725_vm13 = vcmp.eq.s32.totalorder %v11333_v10, %v1722_v48 }
 0x221   : > { %10282 = vmatprep.subr.msk.bf16.mxu0 %vm10281_vm3, %v11172_v30  ;;  %vm10296_vm14 = vmpackc.low %vm1725_vm13, %vm1723_vm12  ;;  %vm2063_vm12 = vcmp.eq.s32.totalorder %v11333_v10, %v2060_v60  ;;  %11069 = vset.pattern.permute.xlu0 %v11175_v31  ;;  %v11796_v60 = vadd.s32 16, %v11321_v3 }
 0x222   : > { %vm10307_vm3 = vmpackc.low %vm1895_vm1, %vm1893_vm15  ;;  %vm2231_vm15 = vcmp.eq.s32.totalorder %v11356_v19, %v2228_v7  ;;  %vm2233_vm1 = vcmp.eq.s32.totalorder %v11356_v19, %v2229_v8  ;;  %3050 = vperm.xlu0 %11069, %v11716_v28  }
 0x223   : > { %vm10320_vm13 = vmpackc.low %vm2064_vm10, %vm2062_vm9  ;;  %vm2787_vm9 = vcmp.eq.s32.totalorder %v11333_v10, %v11792_v58 }
 0x224   : > { %vm10333_vm2 = vmpackc.low %vm2233_vm1, %vm2231_vm15  ;;  %vm2795_vm15 = vcmp.eq.s32.totalorder %v11333_v10, %v2785_v15 }
 0x286   : > { %v2487_v40 = vpop.permute.xlu0 %2486 }
 0x28a   : > { %v2499_v43 = vpop.permute.xlu0 %2498 }
 0x28b   : > { %v2501_v47 = vmul.f32 %v11759_v42, %v2499_v43 }
 0x28f   : > { %v2704_v57 = vpop.permute.xlu0 %2703 }
 0x290   : > { %v2706_v5 = vmul.f32 %v11759_v42, %v2704_v57 }
 0x2a1   : > { %v3051_v23 = vpop.permute.xlu0 %3050 }
 0x2f2   : > { %v1466_v49 = vpop.f32.mrb[6].mxu0 }
 0x2f3   : > { %v9745_v50 = vpop.f32.mrb[7].mxu0  ;;  %8443 = vmatmul.mubr.msk.f32.vlgmr.msra.gmra.mrb[2].mxu0 %vm552_vm6, %v1466_v49 }
 0x2f4   : > { %10284 = vmatpush1.bf16.msk.msra.mxu0 %vm11581_vm4, %v11172_v30  ;;  %1706 = vmatprep.mubr.f32.mxu0 %v11171_v2  ;;  %vm1892_vm4 = vcmp.eq.s32.totalorder %v11333_v10, %v1890_v53 }
 0x2f5   : > { %10295 = vmatprep.subr.msk.bf16.mxu0 %vm10294_vm11, %v11172_v30  ;;  %vm10309_vm7 = vmpackc.low %vm1894_vm5, %vm1892_vm4  ;;  %vm2061_vm11 = vcmp.eq.s32.totalorder %v11333_v10, %v2059_v59  ;;  %vm2232_vm4 = vcmp.eq.s32.totalorder %v11333_v10, %v2229_v8  ;;  %v2782_v59 = vadd.s32 48, %v11326_v4  ;;  %v2783_v8 = vadd.s32 48, %v11796_v60 }
 0x2f7   : > { %vm2789_vm10 = vcmp.eq.s32.totalorder %v11333_v10, %v2782_v59 }
 0x2fb   : > { %8454 = vmatmul.mubr.msk.f32.vlgmr.msra.gmra.mrb[2].mxu0 %vm552_vm6, %v1635_v36  ;;  %v11733_v36 = vpack.c.bf16 %v2400_v35, %v2399_v34  ;;  %v11834_v34 = vadd.s32 96, %v11321_v3  ;;  %v3134_v35 = vadd.s32 96, %v11326_v4 }
 0x2fc   : > { %10297 = vmatpush1.bf16.msk.msra.mxu0 %vm10296_vm14, %v11172_v30  ;;  %1875 = vmatprep.mubr.f32.mxu0 %v11171_v2  ;;  %vm10322_vm14 = vmpackc.low %vm2063_vm12, %vm2061_vm11  ;;  %vm2791_vm12 = vcmp.eq.s32.totalorder %v11333_v10, %v2783_v8 }
 0x2fd   : > { %10298 = vmatprep.subr.bf16.mxu0 %v11169_v1  ;;  %10348 = vmatpush3.bf16.msra.mxu1 %v11733_v36  ;;  %vm10368_vm11 = vmpackc.low %vm2789_vm10, %vm2787_vm9 }
 0x2fe   : > { %10349 = vmatprep.subr.bf16.mxu1 %v11169_v1 }
 0x303   : > { %8465 = vmatmul.mubr.msk.f32.vlgmr.msra.gmra.mrb[2].mxu0 %vm552_vm6, %v1804_v39  ;;  %v11745_v39 = vpack.c.bf16 %v2402_v38, %v2401_v37  ;;  %v3135_v37 = vadd.s32 96, %v11796_v60 }
 0x304   : > { %10300 = vmatpush3.bf16.msra.mxu0 %v11340_v13  ;;  %9788 = vmatprep.mubr.msk.f32.mxu0 %vm11170_vm0, %v11171_v2 }
 0x305   : > { %10301 = vmatprep.subr.bf16.mxu0 %v11169_v1  ;;  %10351 = vmatpush3.bf16.msra.mxu1 %v11745_v39  ;;  %vm3143_vm9 = vcmp.eq.s32.totalorder %v11333_v10, %v3135_v37  ;;  %v12032_v37 = vadd.s32 160, %v11321_v3 }
 0x306   : > { %10352 = vmatprep.subr.bf16.mxu1 %v11169_v1 }
 0x308   : > { %10303 = vmatpush3.bf16.msra.mxu0 %v11352_v18 }
 0x309   : > { %10304 = vmatprep.subr.bf16.mxu0 %v11169_v1 }
 0x30c   : > { %10306 = vmatpush3.bf16.msra.mxu0 %v11368_v27 }
 0x30d   : > { %10308 = vmatprep.subr.msk.bf16.mxu0 %vm10307_vm3, %v11172_v30  ;;  %vm2230_vm3 = vcmp.eq.s32.totalorder %v11333_v10, %v2228_v7  ;;  %v11807_v7 = vadd.s32 40, %v11321_v3 }
 0x30e   : > { %vm10335_vm5 = vmpackc.low %vm2232_vm4, %vm2230_vm3  ;;  %vm3139_vm3 = vcmp.eq.s32.totalorder %v11333_v10, %v11834_v34  ;;  %vm3141_vm4 = vcmp.eq.s32.totalorder %v11333_v10, %v3134_v35  ;;  %v12023_v35 = vadd.s32 152, %v11321_v3 }
 0x30f   : > { %9789 = vmatmul.mubr.msk.f32.vlgmr.msra.gmra.mrb[8].mxu0 %vm385_vm8, %v8466_v56  ;;  %v2786_v17 = vadd.s32 48, %v11807_v7  ;;  %v3138_v43 = vadd.s32 96, %v11807_v7 }
 0x310   : > { %10310 = vmatpush1.bf16.msk.msra.mxu0 %vm10309_vm7, %v11172_v30  ;;  %2044 = vmatprep.mubr.f32.mxu0 %v11171_v2  ;;  %vm2509_vm7 = vcmask 261120  }
 0x311   : > { %10321 = vmatprep.subr.msk.bf16.mxu0 %vm10320_vm13, %v11172_v30  ;;  %vm2797_vm1 = vcmp.eq.s32.totalorder %v11333_v10, %v2786_v17 }
 0x3e2   : > { %v1973_v9 = vpop.f32.mrb[8].mxu0 }
 0x3e3   : > { %v9790_v14 = vpop.f32.mrb[9].mxu0  ;;  %8476 = vmatmul.mubr.msk.f32.vlgmr.msra.gmra.mrb[2].mxu0 %vm552_vm6, %v1973_v9 }
 0x3e4   : > { %10323 = vmatpush1.bf16.msk.msra.mxu0 %vm10322_vm14, %v11172_v30  ;;  %2213 = vmatprep.mubr.f32.mxu0 %v11171_v2 }
 0x3e5   : > { %10334 = vmatprep.subr.msk.bf16.mxu0 %vm10333_vm2, %v11172_v30  ;;  %vm10374_vm2 = vmpackc.low %vm2797_vm1, %vm2795_vm15  ;;  %vm2587_vm15 = vcmp.eq.s32.totalorder %v11333_v10, %v11321_v3  ;;  %vm2589_vm1 = vcmp.eq.s32.totalorder %v11333_v10, %v11326_v4 }
 0x3eb   : > { %8487 = vmatmul.mubr.msk.f32.vlgmr.msra.gmra.mrb[2].mxu0 %vm552_vm6, %v2142_v61  ;;  %v11799_v61 = vadd.s32 24, %v11321_v3 }
 0x3ec   : > { %10336 = vmatpush1.bf16.msk.msra.mxu0 %vm10335_vm5, %v11172_v30  ;;  %2382 = vmatprep.mubr.f32.mxu0 %v11171_v2  ;;  %vm10401_vm5 = vmpackc.low %vm3141_vm4, %vm3139_vm3  ;;  %vm2591_vm3 = vcmp.eq.s32.totalorder %v11333_v10, %v11796_v60 }
 0x3ed   : > { %10337 = vmatprep.subr.bf16.mxu0 %v11169_v1  ;;  %v2784_v9 = vadd.s32 48, %v11799_v61  ;;  %v3136_v38 = vadd.s32 96, %v11799_v61  ;;  %vm2593_vm4 = vcmp.eq.s32.totalorder %v11333_v10, %v11799_v61 }
 0x3ef   : > { %vm2793_vm13 = vcmp.eq.s32.totalorder %v11333_v10, %v2784_v9  ;;  %vm3145_vm10 = vcmp.eq.s32.totalorder %v11333_v10, %v3136_v38  ;;  %v12035_v38 = vadd.s32 168, %v11321_v3 }
 0x3f0   : > { %vm10371_vm14 = vmpackc.low %vm2793_vm13, %vm2791_vm12  ;;  %vm3150_vm13 = vcmp.eq.s32.totalorder %v11356_v19, %v3138_v43 }
 0x3f3   : > { %8498 = vmatmul.mubr.msk.f32.vlgmr.msra.gmra.mrb[2].mxu0 %vm552_vm6, %v2311_v63 }
 0x3f4   : > { %10339 = vmatpush3.bf16.msra.mxu0 %v11675_v16  ;;  %9833 = vmatprep.mubr.msk.f32.mxu0 %vm11170_vm0, %v11171_v2 }
 0x3f5   : > { %10340 = vmatprep.subr.bf16.mxu0 %v11169_v1 }
 0x3f8   : > { %10342 = vmatpush3.bf16.msra.mxu0 %v11685_v21 }
 0x3f9   : > { %10343 = vmatprep.subr.bf16.mxu0 %v11169_v1 }
 0x3fc   : > { %10345 = vmatpush3.bf16.msra.mxu0 %v11697_v24 }
 0x3fd   : > { %10361 = vmatprep.subr.bf16.mxu0 %v11169_v1 }
 0x4c6   : > { %v2384_v32 = vpop.f32.mrb[2].mxu0 }
 0x4c7   : > { %2623 = vrot.lane.b32.xlu1 %v2384_v32, %s11176_s30  ;;  %v2386_v33 = vpop.f32.mrb[3].mxu0  ;;  %9834 = vmatmul.mubr.msk.f32.vlgmr.msra.gmra.mrb[10].mxu0 %vm385_vm8, %v2384_v32 }
 0x4c8   : > { %9870 = vmatprep.mubr.msk.f32.mxu0 %vm11170_vm0, %v11171_v2  ;;  %10363 = vmatpush3.bf16.msra.mxu0 %v11733_v36 }
 0x4c9   : > { %10364 = vmatprep.subr.bf16.mxu0 %v11169_v1 }
 0x4cb   : > { %2698 = vperm.xlu1 %11067, %v11716_v28  }
 0x4cc   : > { %10366 = vmatpush3.bf16.msra.mxu0 %v11745_v39 }
 0x4cd   : > { %10367 = vmatprep.subr.bf16.mxu0 %v11169_v1 }
 0x4cf   : > { %2972 = vrot.lane.b32.xlu1 %v2384_v32, %s11177_s14 }
 0x4d0   : > { %11070 = vset.pattern.permute.xlu1 %v11175_v31 }
 0x4d3   : > { %2974 = vrot.lane.b32.xlu1 %v2386_v33, %s11177_s14 }
 0x4d7   : > { %3055 = vperm.xlu1 %11070, %v11713_v26  }
 0x4db   : > { %3251 = vrot.lane.b32.xlu1 %v2386_v33, %s11178_s16 }
 0x539   : > { %v2624_v50 = vpop.permute.xlu1 %2623 }
 0x54a   : > { %v2699_v51 = vpop.permute.xlu1 %2698 }
 0x54e   : > { %v2973_v52 = vpop.permute.xlu1 %2972 }
 0x552   : > { %v2975_v53 = vpop.permute.xlu1 %2974 }
 0x553   : > { %v2976_v54 = vsel %vm2509_vm7, %v2973_v52, %v2975_v53  ;;  %v3412_v52 = vadd.s32 144, %v11799_v61  ;;  %v3414_v53 = vadd.s32 144, %v11807_v7 }
 0x556   : > { %v3056_v20 = vpop.permute.xlu1 %3055 }
 0x557   : > { %v3058_v25 = vmul.f32 %v11759_v42, %v3056_v20  ;;  %v11969_v20 = vadd.s32 72, %v11321_v3 }
 0x59a   : > { %v2479_v44 = vpop.f32.mrb[10].mxu0 }
 0x59b   : > { %v2480_v45 = vadd.f32 %v11754_v41, %v2479_v44  ;;  %v9835_v46 = vpop.f32.mrb[11].mxu0  ;;  %v11179_v44 = vmov 3  }
 0x59c   : > { %11071 = vset.pattern.permute.xlu0 %v11179_v44  ;;  %11072 = vset.pattern.permute.xlu1 %v11179_v44 }
 0x59d   : > { %v2489_v48 = vmul.f32 %v2487_v40, %v2480_v45  ;;  %v3137_v40 = vadd.s32 96, %v11804_v6  ;;  %3326 = vperm.xlu0 %11071, %v11716_v28   ;;  %3331 = vperm.xlu1 %11072, %v11713_v26   ;;  %v11863_v45 = vld [vmem:[%s13528_s6] ss:$0 sm:$0xff] }
 0x59f   : > { %v2502_v49 = vadd.f32 %v2501_v47, %v2489_v48  ;;  %vm3148_vm12 = vcmp.eq.s32.totalorder %v11356_v19, %v3137_v40 }
 0x5a1   : > { %9845 = vmatmul.mubr.msk.f32.vlgmr.msra.gmra.mrb[16].mxu1 %vm2509_vm7, %v2502_v49 }
 0x5a2   : > { %10354 = vmatpush3.bf16.msra.mxu1 %v11675_v16  ;;  %9859 = vmatprep.mubr.msk.f32.mxu1 %vm11170_vm0, %v11171_v2 }
 0x5a3   : > { %10355 = vmatprep.subr.bf16.mxu1 %v11169_v1 }
 0x5a6   : > { %10357 = vmatpush3.bf16.msra.mxu1 %v11685_v21 }
 0x5a7   : > { %10358 = vmatprep.subr.bf16.mxu1 %v11169_v1 }
 0x5aa   : > { %10360 = vmatpush3.bf16.msra.mxu1 %v11697_v24 }
 0x5ab   : > { %10385 = vmatprep.subr.bf16.mxu1 %v11169_v1 }
 0x5ad   : > { %9860 = vmatmul.mubr.msk.f32.vlgmr.msra.gmra.mrb[18].mxu1 %vm385_vm8, %v2624_v50 }
 0x5ae   : > { %10387 = vmatpush3.bf16.msra.mxu1 %v11675_v16  ;;  %9915 = vmatprep.mubr.msk.f32.mxu1 %vm11170_vm0, %v11171_v2 }
 0x5af   : > { %10388 = vmatprep.subr.bf16.mxu1 %v11169_v1 }
 0x5b2   : > { %10390 = vmatpush3.bf16.msra.mxu1 %v11685_v21 }
 0x5b3   : > { %10391 = vmatprep.subr.bf16.mxu1 %v11169_v1 }
 0x5b6   : > { %10393 = vmatpush3.bf16.msra.mxu1 %v11697_v24 }
 0x5b7   : > { %10394 = vmatprep.subr.bf16.mxu1 %v11169_v1 }
 0x5b9   : > { %9916 = vmatmul.mubr.msk.f32.vlgmr.msra.gmra.mrb[20].mxu1 %vm385_vm8, %v2976_v54 }
 0x5ba   : > { %10396 = vmatpush3.bf16.msra.mxu1 %v11733_v36  ;;  %9926 = vmatprep.mubr.msk.f32.mxu1 %vm11170_vm0, %v11171_v2 }
 0x5bb   : > { %10397 = vmatprep.subr.bf16.mxu1 %v11169_v1 }
 0x5be   : > { %10399 = vmatpush3.bf16.msra.mxu1 %v11745_v39 }
 0x5bf   : > { %10400 = vmatprep.subr.bf16.mxu1 %v11169_v1 }
 0x674   : > { %v11789_v55 = vpop.f32.mrb[16].mxu1 }
 0x675   : > { %v9846_v56 = vpop.f32.mrb[17].mxu1  ;;  %v2580_v28 = vadd.f32 %v11863_v45, %v11789_v55 }
 0x680   : > { %v2693_v62 = vpop.f32.mrb[18].mxu1 }
 0x681   : > { %v2694_v63 = vadd.f32 %v11754_v41, %v2693_v62  ;;  %v9861_v0 = vpop.f32.mrb[19].mxu1  ;;  %v3327_v62 = vpop.permute.xlu0 %3326 }
 0x683   : > { %v2701_v14 = vmul.f32 %v2699_v51, %v2694_v63  ;;  %v3410_v51 = vadd.s32 144, %v11326_v4 }
 0x685   : > { %v2707_v12 = vadd.f32 %v2706_v5, %v2701_v14  ;;  %v3561_v14 = vshra.s32 %v11333_v10, 2 }
 0x687   : > { %9871 = vmatmul.mubr.msk.f32.vlgmr.msra.gmra.mrb[12].mxu0 %vm2509_vm7, %v2707_v12  ;;  %v11934_v12 = vand.u32 3, %v11333_v10  ;;  %v11936_v15 = vmul.u32 48, %v3561_v14 }
 0x688   : > { %10369 = vmatpush3.bf16.msk.msra.mxu0 %vm10368_vm11, %v11172_v30  ;;  %9885 = vmatprep.mubr.msk.f32.mxu0 %vm11170_vm0, %v11171_v2  ;;  %vm10404_vm11 = vmpackc.low %vm3145_vm10, %vm3143_vm9  ;;  %vm2595_vm9 = vcmp.eq.s32.totalorder %v11333_v10, %v11804_v6  ;;  %vm2597_vm10 = vcmp.eq.s32.totalorder %v11333_v10, %v11807_v7 }
 0x689   : > { %10370 = vmatprep.subr.bf16.mxu0 %v11169_v1  ;;  %v11940_v17 = vadd.s32 %v11934_v12, %v11936_v15  ;;  %v3730_v40 = vadd.s32 4, %v11936_v15 }
 0x68b   : > { %v12049_v43 = vadd.s32 %v3730_v40, %v11934_v12 }
 0x68c   : > { %v3045_v22 = vpop.f32.mrb[20].mxu1  ;;  %10372 = vmatpush3.bf16.msk.msra.mxu0 %vm10371_vm14, %v11172_v30  ;;  %vm10406_vm14 = vmpackc.low %vm3150_vm13, %vm3148_vm12  ;;  %vm3418_vm12 = vcmp.eq.s32.totalorder %v11356_v19, %v3410_v51 }
 0x68d   : > { %v3046_v29 = vadd.f32 %v11754_v41, %v3045_v22  ;;  %v9917_v31 = vpop.f32.mrb[21].mxu1  ;;  %10373 = vmatprep.subr.bf16.mxu0 %v11169_v1  ;;  %v11978_v22 = vadd.s32 80, %v11321_v3 }
 0x68e   : > { %v12002_v31 = vadd.s32 120, %v11321_v3 }
 0x68f   : > { %v3053_v32 = vmul.f32 %v3051_v23, %v3046_v29  ;;  %v11981_v23 = vadd.s32 88, %v11321_v3  ;;  %v11999_v29 = vadd.s32 112, %v11321_v3 }
 0x690   : > { %10375 = vmatpush3.bf16.msk.msra.mxu0 %vm10374_vm2, %v11172_v30  ;;  %vm10377_vm2 = vmpackc.low %vm2589_vm1, %vm2587_vm15 }
 0x691   : > { %v3059_v33 = vadd.f32 %v3058_v25, %v3053_v32  ;;  %10376 = vmatprep.subr.bf16.mxu0 %v11169_v1  ;;  %v11990_v25 = vadd.s32 104, %v11321_v3  ;;  %v12011_v32 = vadd.s32 128, %v11321_v3 }
 0x693   : > { %9927 = vmatmul.mubr.msk.f32.vlgmr.msra.gmra.mrb[22].mxu1 %vm2509_vm7, %v3059_v33  ;;  %v12014_v33 = vadd.s32 136, %v11321_v3 }
 0x694   : > { %3242 = vmatprep.mubr.f32.mxu1 %v11171_v2  ;;  %10402 = vmatpush1.bf16.msk.msra.mxu1 %vm10401_vm5, %v11172_v30  ;;  %vm10380_vm5 = vmpackc.low %vm2593_vm4, %vm2591_vm3  ;;  %vm3426_vm3 = vcmp.eq.s32.totalorder %v11356_v19, %v3414_v53  ;;  %v5267_v53 = vadd.s32 24, %v11936_v15 }
 0x695   : > { %10403 = vmatprep.subr.bf16.mxu1 %v11169_v1 }
 0x698   : > { %10405 = vmatpush1.bf16.msk.msra.mxu1 %vm10404_vm11, %v11172_v30  ;;  %vm10383_vm11 = vmpackc.low %vm2597_vm10, %vm2595_vm9  ;;  %vm3566_vm9 = vcmp.eq.s32.totalorder %v11326_v4, %v11940_v17 }
 0x699   : > { %10407 = vmatprep.subr.msk.bf16.mxu1 %vm10406_vm14, %v11172_v30  ;;  %vm3422_vm14 = vcmp.eq.s32.totalorder %v11356_v19, %v3412_v52 }
 0x69c   : > { %10408 = vmatpush1.bf16.msra.mxu1 %v11169_v1 }
 0x69d   : > { %10418 = vmatprep.subr.bf16.mxu1 %v11169_v1 }
 0x75a   : > { %v2777_v46 = vpop.f32.mrb[12].mxu0 }
 0x75b   : > { %v2778_v47 = vadd.f32 %v11863_v45, %v2777_v46  ;;  %v9872_v48 = vpop.f32.mrb[13].mxu0 }
 0x75c   : > { %v12123_v48 = vadd.s32 184, %v11321_v3 }
 0x75d   : > { %9886 = vmatmul.mubr.msk.f32.vlgmr.msra.gmra.mrb[14].mxu0 %vm385_vm8, %v2778_v47 }
 0x75e   : > { %10378 = vmatpush3.bf16.msk.msra.mxu0 %vm10377_vm2, %v11172_v30  ;;  %9900 = vmatprep.mubr.msk.f32.mxu0 %vm11170_vm0, %v11171_v2 }
 0x75f   : > { %10379 = vmatprep.subr.bf16.mxu0 %v11169_v1 }
 0x762   : > { %10381 = vmatpush3.bf16.msk.msra.mxu0 %vm10380_vm5, %v11172_v30  ;;  %vm3565_vm5 = vcmp.eq.s32.totalorder %v11321_v3, %v11940_v17 }
 0x763   : > { %10382 = vmatprep.subr.bf16.mxu0 %v11169_v1  ;;  %vm10434_vm10 = vmpackc.low %vm3566_vm9, %vm3565_vm5  ;;  %vm3575_vm9 = vcmp.eq.s32.totalorder %v11978_v22, %v11940_v17 }
 0x766   : > { %10384 = vmatpush3.bf16.msk.msra.mxu0 %vm10383_vm11, %v11172_v30  ;;  %v3129_v26 = vpop.f32.mrb[22].mxu1  ;;  %vm3568_vm11 = vcmp.eq.s32.totalorder %v11799_v61, %v11940_v17 }
 0x767   : > { %v3130_v49 = vadd.f32 %v11863_v45, %v3129_v26  ;;  %v9928_v50 = vpop.f32.mrb[23].mxu1  ;;  %10409 = vmatprep.subr.bf16.mxu0 %v11169_v1  ;;  %v4127_v26 = vadd.s32 8, %v11936_v15 }
 0x769   : > { %9901 = vmatmul.mubr.msk.f32.vlgmr.msra.gmra.mrb[14].mxu0 %vm385_vm8, %v2580_v28  ;;  %8546 = vmatmul.mubr.msk.f32.vlgmr.msra.gmra.mrb[24].mxu1 %vm385_vm8, %v3130_v49  ;;  %v12138_v28 = vadd.s32 %v4127_v26, %v11934_v12  ;;  %v6692_v26 = vadd.s32 44, %v11936_v15 }
 0x76a   : > { %10411 = vmatpush3.bf16.msra.mxu0 %v11675_v16  ;;  %9941 = vmatprep.mubr.msk.f32.mxu0 %vm11170_vm0, %v11171_v2  ;;  %v3252_v16 = vpop.permute.xlu1 %3251 }
 0x76b   : > { %10412 = vmatprep.subr.bf16.mxu0 %v11169_v1  ;;  %10420 = vmatpush3.bf16.msra.mxu1 %v11733_v36  ;;  %v11904_v36 = vadd.s32 144, %v11321_v3 }
 0x76c   : > { %10421 = vmatprep.subr.bf16.mxu1 %v11169_v1  ;;  %9952 = vmatprep.mubr.msk.f32.mxu1 %vm11170_vm0, %v11171_v2 }
 0x76d   : > { %vm3416_vm0 = vcmp.eq.s32.totalorder %v11356_v19, %v11904_v36 }
 0x76e   : > { %10414 = vmatpush3.bf16.msra.mxu0 %v11685_v21  ;;  %v3411_v21 = vadd.s32 144, %v11796_v60  ;;  %vm10424_vm15 = vmpackc.low %vm3418_vm12, %vm3416_vm0  ;;  %vm3569_vm12 = vcmp.eq.s32.totalorder %v11804_v6, %v11940_v17 }
 0x76f   : > { %10415 = vmatprep.subr.bf16.mxu0 %v11169_v1  ;;  %10423 = vmatpush3.bf16.msra.mxu1 %v11745_v39  ;;  %v3413_v39 = vadd.s32 144, %v11804_v6 }
 0x770   : > { %10433 = vmatprep.subr.bf16.mxu1 %v11169_v1  ;;  %vm3420_vm13 = vcmp.eq.s32.totalorder %v11356_v19, %v3411_v21  ;;  %v4697_v21 = vadd.s32 16, %v11936_v15 }
 0x771   : > { %vm10427_vm1 = vmpackc.low %vm3422_vm14, %vm3420_vm13  ;;  %vm3424_vm2 = vcmp.eq.s32.totalorder %v11356_v19, %v3413_v39  ;;  %v3332_v19 = vpop.permute.xlu1 %3331  ;;  %vm3570_vm13 = vcmp.eq.s32.totalorder %v11807_v7, %v11940_v17  ;;  %v12291_v39 = vmul.u32 4, %v11333_v10 }
 0x772   : > { %10417 = vmatpush3.bf16.msra.mxu0 %v11697_v24  ;;  %vm10430_vm4 = vmpackc.low %vm3426_vm3, %vm3424_vm2  ;;  %v3334_v5 = vmul.f32 %v11759_v42, %v3332_v19  ;;  %v11966_v42 = vadd.s32 64, %v11321_v3  ;;  %v12224_v52 = vadd.s32 %v4697_v21, %v11934_v12  ;;  %v6122_v19 = vadd.s32 36, %v11936_v15 }
 0x773   : > { %10425 = vmatprep.subr.msk.bf16.mxu0 %vm10424_vm15, %v11172_v30  ;;  %vm10440_vm14 = vmpackc.low %vm3570_vm13, %vm3569_vm12  ;;  %vm3571_vm15 = vcmp.eq.s32.totalorder %v11792_v58, %v11940_v17  ;;  %vm3579_vm13 = vcmp.eq.s32.totalorder %v11999_v29, %v11940_v17 }
 0x774   : > { %vm3573_vm3 = vcmp.eq.s32.totalorder %v11966_v42, %v11940_v17 }
 0x775   : > { %9942 = vmatmul.mubr.msk.f32.vlgmr.msra.gmra.mrb[16].mxu0 %vm385_vm8, %v3252_v16 }
 0x776   : > { %3518 = vmatprep.mubr.f32.mxu0 %v11171_v2  ;;  %10426 = vmatpush1.bf16.msra.mxu0 %v11169_v1 }
 0x777   : > { %10428 = vmatprep.subr.msk.bf16.mxu0 %vm10427_vm1, %v11172_v30 }
 0x77a   : > { %10429 = vmatpush1.bf16.msra.mxu0 %v11169_v1 }
 0x77b   : > { %10431 = vmatprep.subr.msk.bf16.mxu0 %vm10430_vm4, %v11172_v30  ;;  %vm3574_vm4 = vcmp.eq.s32.totalorder %v11969_v20, %v11940_v17 }
 0x77c   : > { %vm10446_vm5 = vmpackc.low %vm3574_vm4, %vm3573_vm3  ;;  %vm3583_vm4 = vcmp.eq.s32.totalorder %v11904_v36, %v11940_v17 }
 0x77e   : > { %10432 = vmatpush1.bf16.msra.mxu0 %v11169_v1 }
 0x77f   : > { %10469 = vmatprep.subr.bf16.mxu0 %v11169_v1 }
 0x83c   : > { %v2966_v24 = vpop.f32.mrb[14].mxu0  ;;  %v3244_v54 = vpop.f32.mrb[24].mxu1 }
 0x83d   : > { %v9902_v55 = vpop.f32.mrb[15].mxu0  ;;  %v11925_v56 = vadd.f32 %v3244_v54, %v2966_v24  ;;  %v11927_v57 = vpop.f32.mrb[25].mxu1  ;;  %v12300_v24 = vadd.s32 1, %v12291_v39 }
 0x83e   : > { %v12312_v55 = vadd.s32 %v5267_v53, %v11934_v12  ;;  %v4412_v53 = vadd.s32 12, %v11936_v15 }
 0x848   : > { %v3321_v59 = vpop.f32.mrb[16].mxu0 }
 0x849   : > { %v3322_v63 = vadd.f32 %v11754_v41, %v3321_v59  ;;  %v9943_v0 = vpop.f32.mrb[17].mxu0  ;;  %v11957_v41 = vadd.s32 56, %v11321_v3  ;;  %v12471_v59 = vadd.s32 %v6122_v19, %v11934_v12 }
 0x84b   : > { %v3329_v8 = vmul.f32 %v3327_v62, %v3322_v63  ;;  %vm3572_vm1 = vcmp.eq.s32.totalorder %v11957_v41, %v11940_v17 }
 0x84c   : > { %vm10443_vm2 = vmpackc.low %vm3572_vm1, %vm3571_vm15  ;;  %vm3581_vm1 = vcmp.eq.s32.totalorder %v12011_v32, %v11940_v17 }
 0x84d   : > { %v3335_v9 = vadd.f32 %v3334_v5, %v3329_v8 }
 0x84f   : > { %9953 = vmatmul.mubr.msk.f32.vlgmr.msra.gmra.mrb[26].mxu1 %vm2509_vm7, %v3335_v9  ;;  %vm3567_vm7 = vcmp.eq.s32.totalorder %v11796_v60, %v11940_v17 }
 0x850   : > { %10435 = vmatpush1.bf16.msk.msra.mxu1 %vm10434_vm10, %v11172_v30  ;;  %vm10437_vm0 = vmpackc.low %vm3568_vm11, %vm3567_vm7  ;;  %vm3576_vm7 = vcmp.eq.s32.totalorder %v11981_v23, %v11940_v17  ;;  %vm3577_vm11 = vcmp.eq.s32.totalorder %v11834_v34, %v11940_v17 }
 0x851   : > { %10436 = vmatprep.subr.bf16.mxu1 %v11169_v1  ;;  %vm10449_vm10 = vmpackc.low %vm3576_vm7, %vm3575_vm9  ;;  %vm3585_vm7 = vcmp.eq.s32.totalorder %v12032_v37, %v11940_v17 }
 0x854   : > { %10438 = vmatpush1.bf16.msk.msra.mxu1 %vm10437_vm0, %v11172_v30  ;;  %vm3578_vm0 = vcmp.eq.s32.totalorder %v11990_v25, %v11940_v17 }
 0x855   : > { %10439 = vmatprep.subr.bf16.mxu1 %v11169_v1  ;;  %vm10452_vm12 = vmpackc.low %vm3578_vm0, %vm3577_vm11  ;;  %vm3732_vm0 = vcmp.eq.s32.totalorder %v11321_v3, %v12049_v43 }
 0x858   : > { %10441 = vmatpush1.bf16.msk.msra.mxu1 %vm10440_vm14, %v11172_v30  ;;  %vm3580_vm14 = vcmp.eq.s32.totalorder %v12002_v31, %v11940_v17 }
 0x859   : > { %10442 = vmatprep.subr.bf16.mxu1 %v11169_v1  ;;  %vm10455_vm15 = vmpackc.low %vm3580_vm14, %vm3579_vm13  ;;  %vm3734_vm14 = vcmp.eq.s32.totalorder %v11796_v60, %v12049_v43 }
 0x85c   : > { %10444 = vmatpush1.bf16.msk.msra.mxu1 %vm10443_vm2, %v11172_v30  ;;  %vm3582_vm2 = vcmp.eq.s32.totalorder %v12014_v33, %v11940_v17 }
 0x85d   : > { %10445 = vmatprep.subr.bf16.mxu1 %v11169_v1  ;;  %vm10458_vm3 = vmpackc.low %vm3582_vm2, %vm3581_vm1  ;;  %vm3736_vm2 = vcmp.eq.s32.totalorder %v11804_v6, %v12049_v43 }
 0x860   : > { %10447 = vmatpush1.bf16.msk.msra.mxu1 %vm10446_vm5, %v11172_v30  ;;  %vm3584_vm5 = vcmp.eq.s32.totalorder %v12023_v35, %v11940_v17 }
 0x861   : > { %10448 = vmatprep.subr.bf16.mxu1 %v11169_v1  ;;  %vm10461_vm9 = vmpackc.low %vm3584_vm5, %vm3583_vm4  ;;  %vm3738_vm5 = vcmp.eq.s32.totalorder %v11792_v58, %v12049_v43 }
 0x864   : > { %10450 = vmatpush1.bf16.msk.msra.mxu1 %vm10449_vm10, %v11172_v30  ;;  %vm3586_vm10 = vcmp.eq.s32.totalorder %v12035_v38, %v11940_v17 }
 0x865   : > { %10451 = vmatprep.subr.bf16.mxu1 %v11169_v1  ;;  %vm10464_vm11 = vmpackc.low %vm3586_vm10, %vm3585_vm7  ;;  %vm3740_vm7 = vcmp.eq.s32.totalorder %v11966_v42, %v12049_v43  ;;  %vm3741_vm10 = vcmp.eq.s32.totalorder %v11969_v20, %v12049_v43 }
 0x868   : > { %10453 = vmatpush1.bf16.msk.msra.mxu1 %vm10452_vm12, %v11172_v30  ;;  %vm3733_vm12 = vcmp.eq.s32.totalorder %v11326_v4, %v12049_v43 }
 0x869   : > { %10454 = vmatprep.subr.bf16.mxu1 %v11169_v1  ;;  %vm10470_vm13 = vmpackc.low %vm3733_vm12, %vm3732_vm0  ;;  %vm3742_vm0 = vcmp.eq.s32.totalorder %v11978_v22, %v12049_v43  ;;  %vm3743_vm12 = vcmp.eq.s32.totalorder %v11981_v23, %v12049_v43 }
 0x86c   : > { %10456 = vmatpush1.bf16.msk.msra.mxu1 %vm10455_vm15, %v11172_v30  ;;  %vm3735_vm15 = vcmp.eq.s32.totalorder %v11799_v61, %v12049_v43 }
 0x86d   : > { %10457 = vmatprep.subr.bf16.mxu1 %v11169_v1  ;;  %vm10473_vm1 = vmpackc.low %vm3735_vm15, %vm3734_vm14  ;;  %vm3744_vm14 = vcmp.eq.s32.totalorder %v11834_v34, %v12049_v43  ;;  %vm3745_vm15 = vcmp.eq.s32.totalorder %v11990_v25, %v12049_v43 }
 0x870   : > { %10459 = vmatpush1.bf16.msk.msra.mxu1 %vm10458_vm3, %v11172_v30  ;;  %vm3737_vm3 = vcmp.eq.s32.totalorder %v11807_v7, %v12049_v43 }
 0x871   : > { %10460 = vmatprep.subr.bf16.mxu1 %v11169_v1  ;;  %vm10476_vm4 = vmpackc.low %vm3737_vm3, %vm3736_vm2  ;;  %vm3746_vm2 = vcmp.eq.s32.totalorder %v11999_v29, %v12049_v43  ;;  %vm3747_vm3 = vcmp.eq.s32.totalorder %v12002_v31, %v12049_v43 }
 0x874   : > { %10462 = vmatpush1.bf16.msk.msra.mxu1 %vm10461_vm9, %v11172_v30 }
 0x875   : > { %10463 = vmatprep.subr.bf16.mxu1 %v11169_v1 }
 0x878   : > { %10465 = vmatpush1.bf16.msk.msra.mxu1 %vm10464_vm11, %v11172_v30  ;;  %vm10482_vm11 = vmpackc.low %vm3741_vm10, %vm3740_vm7  ;;  %vm3750_vm7 = vcmp.eq.s32.totalorder %v11904_v36, %v12049_v43  ;;  %vm3751_vm10 = vcmp.eq.s32.totalorder %v12023_v35, %v12049_v43 }
 0x879   : > { %10466 = vmatprep.subr.bf16.mxu1 %v11169_v1 }
 0x922   : > { %v3405_v44 = vpop.f32.mrb[26].mxu1 }
 0x923   : > { %v3406_v46 = vadd.f32 %v11863_v45, %v3405_v44  ;;  %v9954_v47 = vpop.f32.mrb[27].mxu1  ;;  %v12120_v45 = vadd.s32 176, %v11321_v3 }
 0x924   : > { %v12576_v47 = vadd.s32 2, %v12291_v39 }
 0x925   : > { %8561 = vmatmul.mubr.msk.f32.vlgmr.msra.gmra.mrb[18].mxu0 %vm385_vm8, %v3406_v46  ;;  %vm3739_vm8 = vcmp.eq.s32.totalorder %v11957_v41, %v12049_v43 }
 0x926   : > { %10471 = vmatpush1.bf16.msk.msra.mxu0 %vm10470_vm13, %v11172_v30  ;;  %vm10479_vm9 = vmpackc.low %vm3739_vm8, %vm3738_vm5  ;;  %vm3748_vm5 = vcmp.eq.s32.totalorder %v12011_v32, %v12049_v43  ;;  %vm3749_vm8 = vcmp.eq.s32.totalorder %v12014_v33, %v12049_v43 }
 0x927   : > { %10472 = vmatprep.subr.bf16.mxu0 %v11169_v1  ;;  %vm10485_vm13 = vmpackc.low %vm3743_vm12, %vm3742_vm0  ;;  %vm3752_vm0 = vcmp.eq.s32.totalorder %v12032_v37, %v12049_v43  ;;  %vm3753_vm12 = vcmp.eq.s32.totalorder %v12035_v38, %v12049_v43 }
 0x92a   : > { %10474 = vmatpush1.bf16.msk.msra.mxu0 %vm10473_vm1, %v11172_v30  ;;  %vm10488_vm1 = vmpackc.low %vm3745_vm15, %vm3744_vm14  ;;  %vm3754_vm14 = vcmp.eq.s32.totalorder %v12120_v45, %v12049_v43  ;;  %vm3755_vm15 = vcmp.eq.s32.totalorder %v12123_v48, %v12049_v43 }
 0x92b   : > { %10475 = vmatprep.subr.bf16.mxu0 %v11169_v1 }
 0x92e   : > { %10477 = vmatpush1.bf16.msk.msra.mxu0 %vm10476_vm4, %v11172_v30  ;;  %vm10491_vm4 = vmpackc.low %vm3747_vm3, %vm3746_vm2  ;;  %vm3587_vm2 = vcmp.eq.s32.totalorder %v12120_v45, %v11940_v17  ;;  %vm3588_vm3 = vcmp.eq.s32.totalorder %v12123_v48, %v11940_v17 }
 0x92f   : > { %10478 = vmatprep.subr.bf16.mxu0 %v11169_v1 }
 0x932   : > { %10480 = vmatpush1.bf16.msk.msra.mxu0 %vm10479_vm9, %v11172_v30  ;;  %vm10494_vm9 = vmpackc.low %vm3749_vm8, %vm3748_vm5  ;;  %vm4129_vm5 = vcmp.eq.s32.totalorder %v11321_v3, %v12138_v28  ;;  %vm4130_vm8 = vcmp.eq.s32.totalorder %v11326_v4, %v12138_v28 }
 0x933   : > { %10481 = vmatprep.subr.bf16.mxu0 %v11169_v1 }
 0x936   : > { %10483 = vmatpush1.bf16.msk.msra.mxu0 %vm10482_vm11, %v11172_v30  ;;  %vm10497_vm11 = vmpackc.low %vm3751_vm10, %vm3750_vm7  ;;  %vm4131_vm10 = vcmp.eq.s32.totalorder %v11796_v60, %v12138_v28 }
 0x937   : > { %10484 = vmatprep.subr.bf16.mxu0 %v11169_v1  ;;  %vm10506_vm7 = vmpackc.low %vm4130_vm8, %vm4129_vm5  ;;  %vm4139_vm8 = vcmp.eq.s32.totalorder %v11978_v22, %v12138_v28 }
 0x93a   : > { %10486 = vmatpush1.bf16.msk.msra.mxu0 %vm10485_vm13, %v11172_v30  ;;  %vm10500_vm13 = vmpackc.low %vm3753_vm12, %vm3752_vm0  ;;  %vm4133_vm12 = vcmp.eq.s32.totalorder %v11804_v6, %v12138_v28 }
 0x93b   : > { %10487 = vmatprep.subr.bf16.mxu0 %v11169_v1 }
 0x93e   : > { %10489 = vmatpush1.bf16.msk.msra.mxu0 %vm10488_vm1, %v11172_v30  ;;  %vm10503_vm1 = vmpackc.low %vm3755_vm15, %vm3754_vm14  ;;  %vm4135_vm15 = vcmp.eq.s32.totalorder %v11792_v58, %v12138_v28 }
 0x93f   : > { %10490 = vmatprep.subr.bf16.mxu0 %v11169_v1 }
 0x942   : > { %10492 = vmatpush1.bf16.msk.msra.mxu0 %vm10491_vm4, %v11172_v30  ;;  %vm10467_vm4 = vmpackc.low %vm3588_vm3, %vm3587_vm2  ;;  %vm4137_vm3 = vcmp.eq.s32.totalorder %v11966_v42, %v12138_v28 }
 0x943   : > { %10493 = vmatprep.subr.bf16.mxu0 %v11169_v1  ;;  %10468 = vmatpush1.bf16.msk.msra.mxu1 %vm10467_vm4, %v11172_v30  ;;  %vm4138_vm4 = vcmp.eq.s32.totalorder %v11969_v20, %v12138_v28 }
 0x944   : > { %vm10518_vm5 = vmpackc.low %vm4138_vm4, %vm4137_vm3  ;;  %vm4147_vm4 = vcmp.eq.s32.totalorder %v11904_v36, %v12138_v28 }
 0x946   : > { %10495 = vmatpush1.bf16.msk.msra.mxu0 %vm10494_vm9, %v11172_v30  ;;  %vm3637_vm9 = vcmask 523264  }
 0x947   : > { %10496 = vmatprep.subr.bf16.mxu0 %v11169_v1 }
 0x94a   : > { %10498 = vmatpush1.bf16.msk.msra.mxu0 %vm10497_vm11, %v11172_v30  ;;  %vm4132_vm11 = vcmp.eq.s32.totalorder %v11799_v61, %v12138_v28 }
 0x94b   : > { %10499 = vmatprep.subr.bf16.mxu0 %v11169_v1  ;;  %vm10509_vm0 = vmpackc.low %vm4132_vm11, %vm4131_vm10  ;;  %vm4141_vm11 = vcmp.eq.s32.totalorder %v11834_v34, %v12138_v28 }
 0x94e   : > { %10501 = vmatpush1.bf16.msk.msra.mxu0 %vm10500_vm13, %v11172_v30  ;;  %vm4134_vm13 = vcmp.eq.s32.totalorder %v11807_v7, %v12138_v28 }
 0x94f   : > { %10502 = vmatprep.subr.bf16.mxu0 %v11169_v1  ;;  %vm10512_vm14 = vmpackc.low %vm4134_vm13, %vm4133_vm12  ;;  %vm4143_vm13 = vcmp.eq.s32.totalorder %v11999_v29, %v12138_v28 }
 0x952   : > { %10504 = vmatpush1.bf16.msk.msra.mxu0 %vm10503_vm1, %v11172_v30  ;;  %vm4136_vm1 = vcmp.eq.s32.totalorder %v11957_v41, %v12138_v28 }
 0x953   : > { %10505 = vmatprep.subr.bf16.mxu0 %v11169_v1  ;;  %vm10515_vm2 = vmpackc.low %vm4136_vm1, %vm4135_vm15  ;;  %vm4145_vm1 = vcmp.eq.s32.totalorder %v12011_v32, %v12138_v28 }
 0x9f8   : > { %v3520_v49 = vpop.f32.mrb[18].mxu0 }
 0x9f9   : > { %v12145_v50 = vadd.f32 %v3520_v49, %v11925_v56  ;;  %v3522_v16 = vpop.f32.mrb[19].mxu0  ;;  %v5552_v56 = vadd.s32 28, %v11936_v15 }
 0x9fa   : > { %v12148_v51 = vadd.f32 %v3522_v16, %v11927_v57  ;;  %v12600_v16 = vadd.s32 %v6692_v26, %v11934_v12 }
 0x9fb   : > { %v12392_v57 = vadd.s32 %v5552_v56, %v11934_v12 }
 0x9fc   : > { %8616 = vmatprep.mubr.msk.f32.mxu1 %vm3637_vm9, %v12148_v51  ;;  %8671 = vmatprep.mubr.msk.f32.mxu0 %vm3637_vm9, %v12148_v51 }
 0x9fd   : > { %3706 = vmatmul.mubr.f32.vlgmr.msra.gmra.mrb[28].mxu1 %v12145_v50  ;;  %3869 = vmatmul.mubr.f32.vlgmr.msra.gmra.mrb[20].mxu0 %v12145_v50 }
 0x9fe   : > { %10507 = vmatpush1.bf16.msk.msra.mxu0 %vm10506_vm7, %v11172_v30  ;;  %8740 = vmatprep.mubr.msk.f32.mxu0 %vm3637_vm9, %v12148_v51  ;;  %vm4140_vm7 = vcmp.eq.s32.totalorder %v11981_v23, %v12138_v28 }
 0x9ff   : > { %10508 = vmatprep.subr.bf16.mxu0 %v11169_v1  ;;  %vm10521_vm10 = vmpackc.low %vm4140_vm7, %vm4139_vm8  ;;  %vm4149_vm7 = vcmp.eq.s32.totalorder %v12032_v37, %v12138_v28 }
 0xa02   : > { %10510 = vmatpush1.bf16.msk.msra.mxu0 %vm10509_vm0, %v11172_v30  ;;  %vm4142_vm0 = vcmp.eq.s32.totalorder %v11990_v25, %v12138_v28 }
 0xa03   : > { %10511 = vmatprep.subr.bf16.mxu0 %v11169_v1  ;;  %vm10524_vm12 = vmpackc.low %vm4142_vm0, %vm4141_vm11  ;;  %vm4151_vm0 = vcmp.eq.s32.totalorder %v12120_v45, %v12138_v28 }
 0xa06   : > { %10513 = vmatpush1.bf16.msk.msra.mxu0 %vm10512_vm14, %v11172_v30  ;;  %vm4144_vm14 = vcmp.eq.s32.totalorder %v12002_v31, %v12138_v28 }
 0xa07   : > { %10514 = vmatprep.subr.bf16.mxu0 %v11169_v1  ;;  %vm10527_vm15 = vmpackc.low %vm4144_vm14, %vm4143_vm13  ;;  %vm4699_vm14 = vcmp.eq.s32.totalorder %v11321_v3, %v12224_v52 }
 0xa0a   : > { %10516 = vmatpush1.bf16.msk.msra.mxu0 %vm10515_vm2, %v11172_v30  ;;  %vm4146_vm2 = vcmp.eq.s32.totalorder %v12014_v33, %v12138_v28 }
 0xa0b   : > { %10517 = vmatprep.subr.bf16.mxu0 %v11169_v1  ;;  %vm10530_vm3 = vmpackc.low %vm4146_vm2, %vm4145_vm1  ;;  %vm4701_vm2 = vcmp.eq.s32.totalorder %v11796_v60, %v12224_v52 }
 0xa0e   : > { %10519 = vmatpush1.bf16.msk.msra.mxu0 %vm10518_vm5, %v11172_v30  ;;  %vm4148_vm5 = vcmp.eq.s32.totalorder %v12023_v35, %v12138_v28 }
 0xa0f   : > { %10520 = vmatprep.subr.bf16.mxu0 %v11169_v1  ;;  %vm10533_vm8 = vmpackc.low %vm4148_vm5, %vm4147_vm4  ;;  %vm4703_vm5 = vcmp.eq.s32.totalorder %v11804_v6, %v12224_v52 }
 0xa12   : > { %10522 = vmatpush1.bf16.msk.msra.mxu0 %vm10521_vm10, %v11172_v30  ;;  %vm4150_vm10 = vcmp.eq.s32.totalorder %v12035_v38, %v12138_v28 }
 0xa13   : > { %10523 = vmatprep.subr.bf16.mxu0 %v11169_v1  ;;  %vm10536_vm11 = vmpackc.low %vm4150_vm10, %vm4149_vm7  ;;  %vm4705_vm10 = vcmp.eq.s32.totalorder %v11792_v58, %v12224_v52 }
 0xa16   : > { %10525 = vmatpush1.bf16.msk.msra.mxu0 %vm10524_vm12, %v11172_v30  ;;  %vm4152_vm12 = vcmp.eq.s32.totalorder %v12123_v48, %v12138_v28 }
 0xa17   : > { %10526 = vmatprep.subr.bf16.mxu0 %v11169_v1  ;;  %vm10539_vm13 = vmpackc.low %vm4152_vm12, %vm4151_vm0  ;;  %vm4707_vm12 = vcmp.eq.s32.totalorder %v11966_v42, %v12224_v52 }
 0xa1a   : > { %10528 = vmatpush1.bf16.msk.msra.mxu0 %vm10527_vm15, %v11172_v30  ;;  %vm4700_vm15 = vcmp.eq.s32.totalorder %v11326_v4, %v12224_v52 }
 0xa1b   : > { %10529 = vmatprep.subr.bf16.mxu0 %v11169_v1  ;;  %vm10578_vm1 = vmpackc.low %vm4700_vm15, %vm4699_vm14  ;;  %vm4709_vm15 = vcmp.eq.s32.totalorder %v11978_v22, %v12224_v52 }
 0xa1e   : > { %10531 = vmatpush1.bf16.msk.msra.mxu0 %vm10530_vm3, %v11172_v30  ;;  %vm4702_vm3 = vcmp.eq.s32.totalorder %v11799_v61, %v12224_v52 }
 0xa1f   : > { %10532 = vmatprep.subr.bf16.mxu0 %v11169_v1  ;;  %vm10581_vm4 = vmpackc.low %vm4702_vm3, %vm4701_vm2  ;;  %vm4711_vm3 = vcmp.eq.s32.totalorder %v11834_v34, %v12224_v52 }
 0xa22   : > { %10534 = vmatpush1.bf16.msk.msra.mxu0 %vm10533_vm8, %v11172_v30  ;;  %vm4704_vm8 = vcmp.eq.s32.totalorder %v11807_v7, %v12224_v52 }
 0xa23   : > { %10535 = vmatprep.subr.bf16.mxu0 %v11169_v1  ;;  %vm10584_vm7 = vmpackc.low %vm4704_vm8, %vm4703_vm5  ;;  %vm4713_vm8 = vcmp.eq.s32.totalorder %v11999_v29, %v12224_v52 }
 0xa26   : > { %10537 = vmatpush1.bf16.msk.msra.mxu0 %vm10536_vm11, %v11172_v30  ;;  %vm4706_vm11 = vcmp.eq.s32.totalorder %v11957_v41, %v12224_v52 }
 0xa27   : > { %10538 = vmatprep.subr.bf16.mxu0 %v11169_v1  ;;  %vm10587_vm0 = vmpackc.low %vm4706_vm11, %vm4705_vm10  ;;  %vm4715_vm11 = vcmp.eq.s32.totalorder %v12011_v32, %v12224_v52 }
 0xa2a   : > { %10540 = vmatpush1.bf16.msk.msra.mxu0 %vm10539_vm13, %v11172_v30  ;;  %vm4708_vm13 = vcmp.eq.s32.totalorder %v11969_v20, %v12224_v52 }
 0xa2b   : > { %10577 = vmatprep.subr.bf16.mxu0 %v11169_v1  ;;  %vm10590_vm14 = vmpackc.low %vm4708_vm13, %vm4707_vm12  ;;  %vm4717_vm13 = vcmp.eq.s32.totalorder %v11904_v36, %v12224_v52 }
 0xa2d   : > { %4266 = vmatmul.mubr.f32.vlgmr.msra.gmra.mrb[22].mxu0 %v12145_v50 }
 0xa2e   : > { %10579 = vmatpush1.bf16.msk.msra.mxu0 %vm10578_vm1, %v11172_v30  ;;  %8864 = vmatprep.mubr.msk.f32.mxu0 %vm3637_vm9, %v12148_v51  ;;  %vm4710_vm1 = vcmp.eq.s32.totalorder %v11981_v23, %v12224_v52 }
 0xa2f   : > { %10580 = vmatprep.subr.bf16.mxu0 %v11169_v1  ;;  %vm10593_vm2 = vmpackc.low %vm4710_vm1, %vm4709_vm15  ;;  %vm4719_vm1 = vcmp.eq.s32.totalorder %v12032_v37, %v12224_v52 }
 0xa32   : > { %10582 = vmatpush1.bf16.msk.msra.mxu0 %vm10581_vm4, %v11172_v30  ;;  %vm4712_vm4 = vcmp.eq.s32.totalorder %v11990_v25, %v12224_v52 }
 0xa33   : > { %10583 = vmatprep.subr.bf16.mxu0 %v11169_v1  ;;  %vm10596_vm5 = vmpackc.low %vm4712_vm4, %vm4711_vm3  ;;  %vm3712_vm3 = vcmp.eq.s32.totalorder %v11321_v3, %v12300_v24  ;;  %vm3874_vm4 = vcmask 31744  }
 0xa34   : > { %v8617_v54 = vsel %vm3712_vm3, 1.0, %v11171_v2 }
 0xa35   : > { %9957 = vmatprep.mubr.msk.f32.mxu1 %vm3874_vm4, %v8617_v54 }
 0xa36   : > { %10585 = vmatpush1.bf16.msk.msra.mxu0 %vm10584_vm7, %v11172_v30  ;;  %vm4714_vm7 = vcmp.eq.s32.totalorder %v12002_v31, %v12224_v52 }
 0xa37   : > { %10586 = vmatprep.subr.bf16.mxu0 %v11169_v1  ;;  %vm10599_vm10 = vmpackc.low %vm4714_vm7, %vm4713_vm8  ;;  %vm4721_vm8 = vcmp.eq.s32.totalorder %v12120_v45, %v12224_v52  ;;  %vm4722_vm7 = vcmp.eq.s32.totalorder %v12123_v48, %v12224_v52 }
 0xa3a   : > { %10588 = vmatpush1.bf16.msk.msra.mxu0 %vm10587_vm0, %v11172_v30  ;;  %vm4716_vm0 = vcmp.eq.s32.totalorder %v12014_v33, %v12224_v52 }
 0xa3b   : > { %10589 = vmatprep.subr.bf16.mxu0 %v11169_v1  ;;  %vm10602_vm12 = vmpackc.low %vm4716_vm0, %vm4715_vm11  ;;  %vm5269_vm11 = vcmp.eq.s32.totalorder %v11321_v3, %v12312_v55  ;;  %vm5270_vm0 = vcmp.eq.s32.totalorder %v11326_v4, %v12312_v55 }
 0xa3e   : > { %10591 = vmatpush1.bf16.msk.msra.mxu0 %vm10590_vm14, %v11172_v30  ;;  %vm4718_vm14 = vcmp.eq.s32.totalorder %v12023_v35, %v12224_v52 }
 0xa3f   : > { %10592 = vmatprep.subr.bf16.mxu0 %v11169_v1  ;;  %vm10605_vm15 = vmpackc.low %vm4718_vm14, %vm4717_vm13  ;;  %vm5271_vm13 = vcmp.eq.s32.totalorder %v11796_v60, %v12312_v55  ;;  %vm5272_vm14 = vcmp.eq.s32.totalorder %v11799_v61, %v12312_v55 }
 0xa42   : > { %10594 = vmatpush1.bf16.msk.msra.mxu0 %vm10593_vm2, %v11172_v30  ;;  %vm4720_vm2 = vcmp.eq.s32.totalorder %v12035_v38, %v12224_v52 }
 0xa43   : > { %10595 = vmatprep.subr.bf16.mxu0 %v11169_v1 }
 0xa46   : > { %10597 = vmatpush1.bf16.msk.msra.mxu0 %vm10596_vm5, %v11172_v30  ;;  %vm10608_vm5 = vmpackc.low %vm4720_vm2, %vm4719_vm1  ;;  %vm5273_vm1 = vcmp.eq.s32.totalorder %v11804_v6, %v12312_v55  ;;  %vm5274_vm2 = vcmp.eq.s32.totalorder %v11807_v7, %v12312_v55 }
 0xa47   : > { %10598 = vmatprep.subr.bf16.mxu0 %v11169_v1  ;;  %vm10656_vm3 = vmpackc.low %vm5274_vm2, %vm5273_vm1  ;;  %vm5282_vm1 = vcmp.eq.s32.totalorder %v11990_v25, %v12312_v55 }
 0xa4a   : > { %10600 = vmatpush1.bf16.msk.msra.mxu0 %vm10599_vm10, %v11172_v30  ;;  %vm10611_vm10 = vmpackc.low %vm4722_vm7, %vm4721_vm8  ;;  %vm5276_vm8 = vcmp.eq.s32.totalorder %v11957_v41, %v12312_v55 }
 0xa4b   : > { %10601 = vmatprep.subr.bf16.mxu0 %v11169_v1 }
 0xa4e   : > { %10603 = vmatpush1.bf16.msk.msra.mxu0 %vm10602_vm12, %v11172_v30  ;;  %vm10650_vm12 = vmpackc.low %vm5270_vm0, %vm5269_vm11  ;;  %vm5278_vm11 = vcmp.eq.s32.totalorder %v11969_v20, %v12312_v55 }
 0xa4f   : > { %10604 = vmatprep.subr.bf16.mxu0 %v11169_v1 }
 0xa52   : > { %10606 = vmatpush1.bf16.msk.msra.mxu0 %vm10605_vm15, %v11172_v30  ;;  %vm10653_vm15 = vmpackc.low %vm5272_vm14, %vm5271_vm13  ;;  %vm5280_vm13 = vcmp.eq.s32.totalorder %v11981_v23, %v12312_v55 }
 0xa53   : > { %10607 = vmatprep.subr.bf16.mxu0 %v11169_v1 }
 0xa56   : > { %10609 = vmatpush1.bf16.msk.msra.mxu0 %vm10608_vm5, %v11172_v30  ;;  %vm5275_vm5 = vcmp.eq.s32.totalorder %v11792_v58, %v12312_v55 }
 0xa57   : > { %10610 = vmatprep.subr.bf16.mxu0 %v11169_v1  ;;  %vm10659_vm7 = vmpackc.low %vm5276_vm8, %vm5275_vm5  ;;  %vm5284_vm5 = vcmp.eq.s32.totalorder %v12002_v31, %v12312_v55 }
 0xa5a   : > { %10612 = vmatpush1.bf16.msk.msra.mxu0 %vm10611_vm10, %v11172_v30  ;;  %vm5277_vm10 = vcmp.eq.s32.totalorder %v11966_v42, %v12312_v55 }
 0xa5b   : > { %10649 = vmatprep.subr.bf16.mxu0 %v11169_v1  ;;  %vm10662_vm0 = vmpackc.low %vm5278_vm11, %vm5277_vm10  ;;  %vm5286_vm10 = vcmp.eq.s32.totalorder %v12014_v33, %v12312_v55 }
 0xa5d   : > { %4836 = vmatmul.mubr.f32.vlgmr.msra.gmra.mrb[24].mxu0 %v12145_v50 }
 0xa5e   : > { %10651 = vmatpush1.bf16.msk.msra.mxu0 %vm10650_vm12, %v11172_v30  ;;  %8988 = vmatprep.mubr.msk.f32.mxu0 %vm3637_vm9, %v12148_v51  ;;  %vm5279_vm12 = vcmp.eq.s32.totalorder %v11978_v22, %v12312_v55 }
 0xa5f   : > { %10652 = vmatprep.subr.bf16.mxu0 %v11169_v1  ;;  %vm10665_vm14 = vmpackc.low %vm5280_vm13, %vm5279_vm12  ;;  %vm5288_vm12 = vcmp.eq.s32.totalorder %v12023_v35, %v12312_v55 }
 0xa62   : > { %10654 = vmatpush1.bf16.msk.msra.mxu0 %vm10653_vm15, %v11172_v30  ;;  %vm5281_vm15 = vcmp.eq.s32.totalorder %v11834_v34, %v12312_v55 }
 0xa63   : > { %10655 = vmatprep.subr.bf16.mxu0 %v11169_v1  ;;  %vm10668_vm2 = vmpackc.low %vm5282_vm1, %vm5281_vm15  ;;  %vm5290_vm15 = vcmp.eq.s32.totalorder %v12035_v38, %v12312_v55 }
 0xa66   : > { %10657 = vmatpush1.bf16.msk.msra.mxu0 %vm10656_vm3, %v11172_v30  ;;  %vm5283_vm3 = vcmp.eq.s32.totalorder %v11999_v29, %v12312_v55 }
 0xa67   : > { %10658 = vmatprep.subr.bf16.mxu0 %v11169_v1  ;;  %vm10671_vm8 = vmpackc.low %vm5284_vm5, %vm5283_vm3  ;;  %vm5292_vm3 = vcmp.eq.s32.totalorder %v12123_v48, %v12312_v55 }
 0xa6a   : > { %10660 = vmatpush1.bf16.msk.msra.mxu0 %vm10659_vm7, %v11172_v30  ;;  %vm5285_vm7 = vcmp.eq.s32.totalorder %v12011_v32, %v12312_v55 }
 0xa6b   : > { %10661 = vmatprep.subr.bf16.mxu0 %v11169_v1  ;;  %vm10674_vm11 = vmpackc.low %vm5286_vm10, %vm5285_vm7  ;;  %vm5555_vm7 = vcmp.eq.s32.totalorder %v11326_v4, %v12392_v57 }
 0xa6e   : > { %10663 = vmatpush1.bf16.msk.msra.mxu0 %vm10662_vm0, %v11172_v30  ;;  %vm5287_vm0 = vcmp.eq.s32.totalorder %v11904_v36, %v12312_v55 }
 0xa6f   : > { %10664 = vmatprep.subr.bf16.mxu0 %v11169_v1  ;;  %vm10677_vm13 = vmpackc.low %vm5288_vm12, %vm5287_vm0  ;;  %vm5557_vm0 = vcmp.eq.s32.totalorder %v11799_v61, %v12392_v57 }
 0xa72   : > { %10666 = vmatpush1.bf16.msk.msra.mxu0 %vm10665_vm14, %v11172_v30  ;;  %vm5289_vm14 = vcmp.eq.s32.totalorder %v12032_v37, %v12312_v55 }
 0xa73   : > { %10667 = vmatprep.subr.bf16.mxu0 %v11169_v1  ;;  %vm10680_vm1 = vmpackc.low %vm5290_vm15, %vm5289_vm14  ;;  %vm5559_vm14 = vcmp.eq.s32.totalorder %v11807_v7, %v12392_v57 }
 0xa76   : > { %10669 = vmatpush1.bf16.msk.msra.mxu0 %vm10668_vm2, %v11172_v30  ;;  %vm5291_vm2 = vcmp.eq.s32.totalorder %v12120_v45, %v12312_v55 }
 0xa77   : > { %10670 = vmatprep.subr.bf16.mxu0 %v11169_v1  ;;  %vm10683_vm5 = vmpackc.low %vm5292_vm3, %vm5291_vm2  ;;  %vm5561_vm2 = vcmp.eq.s32.totalorder %v11957_v41, %v12392_v57 }
 0xa7a   : > { %10672 = vmatpush1.bf16.msk.msra.mxu0 %vm10671_vm8, %v11172_v30  ;;  %vm5554_vm8 = vcmp.eq.s32.totalorder %v11321_v3, %v12392_v57 }
 0xa7b   : > { %10673 = vmatprep.subr.bf16.mxu0 %v11169_v1  ;;  %vm10686_vm10 = vmpackc.low %vm5555_vm7, %vm5554_vm8  ;;  %vm5563_vm8 = vcmp.eq.s32.totalorder %v11969_v20, %v12392_v57 }
 0xa7e   : > { %10675 = vmatpush1.bf16.msk.msra.mxu0 %vm10674_vm11, %v11172_v30  ;;  %vm5556_vm11 = vcmp.eq.s32.totalorder %v11796_v60, %v12392_v57 }
 0xa7f   : > { %10676 = vmatprep.subr.bf16.mxu0 %v11169_v1  ;;  %vm10689_vm12 = vmpackc.low %vm5557_vm0, %vm5556_vm11  ;;  %vm5565_vm11 = vcmp.eq.s32.totalorder %v11981_v23, %v12392_v57 }
 0xa82   : > { %10678 = vmatpush1.bf16.msk.msra.mxu0 %vm10677_vm13, %v11172_v30  ;;  %vm5558_vm13 = vcmp.eq.s32.totalorder %v11804_v6, %v12392_v57 }
 0xa83   : > { %10679 = vmatprep.subr.bf16.mxu0 %v11169_v1  ;;  %vm10692_vm15 = vmpackc.low %vm5559_vm14, %vm5558_vm13  ;;  %vm5567_vm13 = vcmp.eq.s32.totalorder %v11990_v25, %v12392_v57 }
 0xa86   : > { %10681 = vmatpush1.bf16.msk.msra.mxu0 %vm10680_vm1, %v11172_v30  ;;  %vm5560_vm1 = vcmp.eq.s32.totalorder %v11792_v58, %v12392_v57 }
 0xa87   : > { %10682 = vmatprep.subr.bf16.mxu0 %v11169_v1  ;;  %vm10695_vm3 = vmpackc.low %vm5561_vm2, %vm5560_vm1  ;;  %vm5569_vm1 = vcmp.eq.s32.totalorder %v12002_v31, %v12392_v57 }
 0xa8a   : > { %10684 = vmatpush1.bf16.msk.msra.mxu0 %vm10683_vm5, %v11172_v30  ;;  %vm5562_vm5 = vcmp.eq.s32.totalorder %v11966_v42, %v12392_v57 }
 0xa8b   : > { %10685 = vmatprep.subr.bf16.mxu0 %v11169_v1  ;;  %vm10698_vm7 = vmpackc.low %vm5563_vm8, %vm5562_vm5  ;;  %vm5571_vm5 = vcmp.eq.s32.totalorder %v12014_v33, %v12392_v57 }
 0xa8d   : > { %5406 = vmatmul.mubr.f32.vlgmr.msra.gmra.mrb[26].mxu0 %v12145_v50 }
 0xa8e   : > { %10687 = vmatpush1.bf16.msk.msra.mxu0 %vm10686_vm10, %v11172_v30  ;;  %9050 = vmatprep.mubr.msk.f32.mxu0 %vm3637_vm9, %v12148_v51  ;;  %vm5564_vm10 = vcmp.eq.s32.totalorder %v11978_v22, %v12392_v57 }
 0xa8f   : > { %10688 = vmatprep.subr.bf16.mxu0 %v11169_v1  ;;  %vm10701_vm0 = vmpackc.low %vm5565_vm11, %vm5564_vm10  ;;  %vm5573_vm10 = vcmp.eq.s32.totalorder %v12023_v35, %v12392_v57 }
 0xa92   : > { %10690 = vmatpush1.bf16.msk.msra.mxu0 %vm10689_vm12, %v11172_v30  ;;  %vm5566_vm12 = vcmp.eq.s32.totalorder %v11834_v34, %v12392_v57 }
 0xa93   : > { %10691 = vmatprep.subr.bf16.mxu0 %v11169_v1  ;;  %vm10704_vm14 = vmpackc.low %vm5567_vm13, %vm5566_vm12  ;;  %vm5575_vm12 = vcmp.eq.s32.totalorder %v12035_v38, %v12392_v57 }
 0xa96   : > { %10693 = vmatpush1.bf16.msk.msra.mxu0 %vm10692_vm15, %v11172_v30  ;;  %vm5568_vm15 = vcmp.eq.s32.totalorder %v11999_v29, %v12392_v57 }
 0xa97   : > { %10694 = vmatprep.subr.bf16.mxu0 %v11169_v1  ;;  %vm10707_vm2 = vmpackc.low %vm5569_vm1, %vm5568_vm15  ;;  %vm5577_vm15 = vcmp.eq.s32.totalorder %v12123_v48, %v12392_v57 }
 0xa9a   : > { %10696 = vmatpush1.bf16.msk.msra.mxu0 %vm10695_vm3, %v11172_v30  ;;  %vm5570_vm3 = vcmp.eq.s32.totalorder %v12011_v32, %v12392_v57 }
 0xa9b   : > { %10697 = vmatprep.subr.bf16.mxu0 %v11169_v1  ;;  %vm10710_vm8 = vmpackc.low %vm5571_vm5, %vm5570_vm3  ;;  %vm6125_vm3 = vcmp.eq.s32.totalorder %v11326_v4, %v12471_v59 }
 0xa9e   : > { %10699 = vmatpush1.bf16.msk.msra.mxu0 %vm10698_vm7, %v11172_v30  ;;  %vm5572_vm7 = vcmp.eq.s32.totalorder %v11904_v36, %v12392_v57 }
 0xa9f   : > { %10700 = vmatprep.subr.bf16.mxu0 %v11169_v1  ;;  %vm10713_vm11 = vmpackc.low %vm5573_vm10, %vm5572_vm7  ;;  %vm6127_vm7 = vcmp.eq.s32.totalorder %v11799_v61, %v12471_v59 }
 0xaa2   : > { %10702 = vmatpush1.bf16.msk.msra.mxu0 %vm10701_vm0, %v11172_v30  ;;  %vm5574_vm0 = vcmp.eq.s32.totalorder %v12032_v37, %v12392_v57 }
 0xaa3   : > { %10703 = vmatprep.subr.bf16.mxu0 %v11169_v1  ;;  %vm10716_vm13 = vmpackc.low %vm5575_vm12, %vm5574_vm0  ;;  %vm6129_vm0 = vcmp.eq.s32.totalorder %v11807_v7, %v12471_v59 }
 0xaa6   : > { %10705 = vmatpush1.bf16.msk.msra.mxu0 %vm10704_vm14, %v11172_v30  ;;  %vm5576_vm14 = vcmp.eq.s32.totalorder %v12120_v45, %v12392_v57 }
 0xaa7   : > { %10706 = vmatprep.subr.bf16.mxu0 %v11169_v1  ;;  %vm10719_vm1 = vmpackc.low %vm5577_vm15, %vm5576_vm14  ;;  %vm6131_vm14 = vcmp.eq.s32.totalorder %v11957_v41, %v12471_v59 }
 0xaaa   : > { %10708 = vmatpush1.bf16.msk.msra.mxu0 %vm10707_vm2, %v11172_v30  ;;  %vm6124_vm2 = vcmp.eq.s32.totalorder %v11321_v3, %v12471_v59 }
 0xaab   : > { %10709 = vmatprep.subr.bf16.mxu0 %v11169_v1  ;;  %vm10758_vm5 = vmpackc.low %vm6125_vm3, %vm6124_vm2  ;;  %vm6133_vm2 = vcmp.eq.s32.totalorder %v11969_v20, %v12471_v59 }
 0xaae   : > { %10711 = vmatpush1.bf16.msk.msra.mxu0 %vm10710_vm8, %v11172_v30  ;;  %vm6126_vm8 = vcmp.eq.s32.totalorder %v11796_v60, %v12471_v59 }
 0xaaf   : > { %10712 = vmatprep.subr.bf16.mxu0 %v11169_v1  ;;  %vm10761_vm10 = vmpackc.low %vm6127_vm7, %vm6126_vm8  ;;  %vm6135_vm8 = vcmp.eq.s32.totalorder %v11981_v23, %v12471_v59  ;;  %vm3713_vm7 = vcmp.eq.s32.totalorder %v11326_v4, %v12300_v24 }
 0xab0   : > { %v8618_v0 = vsel %vm3713_vm7, 1.0, %v11171_v2 }
 0xab2   : > { %10714 = vmatpush1.bf16.msk.msra.mxu0 %vm10713_vm11, %v11172_v30  ;;  %vm6128_vm11 = vcmp.eq.s32.totalorder %v11804_v6, %v12471_v59 }
 0xab3   : > { %10715 = vmatprep.subr.bf16.mxu0 %v11169_v1  ;;  %vm10764_vm12 = vmpackc.low %vm6129_vm0, %vm6128_vm11  ;;  %vm3714_vm0 = vcmp.eq.s32.totalorder %v11796_v60, %v12300_v24 }
 0xab4   : > { %v8619_v9 = vsel %vm3714_vm0, 1.0, %v11171_v2  ;;  %vm6141_vm0 = vcmp.eq.s32.totalorder %v12014_v33, %v12471_v59 }
 0xab6   : > { %10717 = vmatpush1.bf16.msk.msra.mxu0 %vm10716_vm13, %v11172_v30  ;;  %vm6130_vm13 = vcmp.eq.s32.totalorder %v11792_v58, %v12471_v59 }
 0xab7   : > { %10718 = vmatprep.subr.bf16.mxu0 %v11169_v1  ;;  %vm10767_vm15 = vmpackc.low %vm6131_vm14, %vm6130_vm13  ;;  %vm6137_vm13 = vcmp.eq.s32.totalorder %v11990_v25, %v12471_v59  ;;  %vm3715_vm14 = vcmp.eq.s32.totalorder %v11799_v61, %v12300_v24 }
 0xab8   : > { %v8620_v14 = vsel %vm3715_vm14, 1.0, %v11171_v2 }
 0xaba   : > { %10720 = vmatpush1.bf16.msk.msra.mxu0 %vm10719_vm1, %v11172_v30  ;;  %vm6132_vm1 = vcmp.eq.s32.totalorder %v11966_v42, %v12471_v59 }
 0xabb   : > { %10757 = vmatprep.subr.bf16.mxu0 %v11169_v1  ;;  %vm10770_vm3 = vmpackc.low %vm6133_vm2, %vm6132_vm1  ;;  %vm6138_vm2 = vcmp.eq.s32.totalorder %v11999_v29, %v12471_v59 }
 0xabd   : > { %5691 = vmatmul.mubr.f32.vlgmr.msra.gmra.mrb[28].mxu0 %v12145_v50 }
 0xabe   : > { %10759 = vmatpush1.bf16.msk.msra.mxu0 %vm10758_vm5, %v11172_v30  ;;  %9174 = vmatprep.mubr.msk.f32.mxu0 %vm3637_vm9, %v12148_v51  ;;  %vm6134_vm5 = vcmp.eq.s32.totalorder %v11978_v22, %v12471_v59 }
 0xabf   : > { %10760 = vmatprep.subr.bf16.mxu0 %v11169_v1  ;;  %vm10773_vm11 = vmpackc.low %vm6135_vm8, %vm6134_vm5  ;;  %vm3717_vm5 = vcmp.eq.s32.totalorder %v11807_v7, %v12300_v24  ;;  %vm3528_vm8 = vcmp.eq.s32.totalorder %v11321_v3, %v12291_v39 }
 0xac0   : > { %v8622_v40 = vsel %vm3717_vm5, 1.0, %v11171_v2  ;;  %v8562_v43 = vsel %vm3528_vm8, 1.0, %v11171_v2  ;;  %vm6144_vm8 = vcmp.eq.s32.totalorder %v12032_v37, %v12471_v59 }
 0xac2   : > { %10762 = vmatpush1.bf16.msk.msra.mxu0 %vm10761_vm10, %v11172_v30  ;;  %vm3893_vm10 = vcmask 1043456  }
 0xac3   : > { %10763 = vmatprep.subr.bf16.mxu0 %v11169_v1 }
 0xac6   : > { %10765 = vmatpush1.bf16.msk.msra.mxu0 %vm10764_vm12, %v11172_v30  ;;  %vm6136_vm12 = vcmp.eq.s32.totalorder %v11834_v34, %v12471_v59 }
 0xac7   : > { %10766 = vmatprep.subr.bf16.mxu0 %v11169_v1  ;;  %vm10776_vm1 = vmpackc.low %vm6137_vm13, %vm6136_vm12  ;;  %vm3529_vm12 = vcmp.eq.s32.totalorder %v11326_v4, %v12291_v39  ;;  %vm3530_vm13 = vcmp.eq.s32.totalorder %v11796_v60, %v12291_v39 }
 0xac8   : > { %v8563_v44 = vsel %vm3529_vm12, 1.0, %v11171_v2  ;;  %v8564_v46 = vsel %vm3530_vm13, 1.0, %v11171_v2  ;;  %vm6146_vm13 = vcmp.eq.s32.totalorder %v12120_v45, %v12471_v59 }
 0xaca   : > { %10768 = vmatpush1.bf16.msk.msra.mxu0 %vm10767_vm15, %v11172_v30  ;;  %vm3716_vm15 = vcmp.eq.s32.totalorder %v11804_v6, %v12300_v24  ;;  %v12643_v24 = vadd.s32 %v4412_v53, %v11934_v12  ;;  %v4982_v53 = vadd.s32 20, %v11936_v15 }
 0xacb   : > { %10769 = vmatprep.subr.bf16.mxu0 %v11169_v1  ;;  %v8621_v17 = vsel %vm3716_vm15, 1.0, %v11171_v2  ;;  %vm6142_vm15 = vcmp.eq.s32.totalorder %v11904_v36, %v12471_v59 }
 0xace   : > { %10771 = vmatpush1.bf16.msk.msra.mxu0 %vm10770_vm3, %v11172_v30  ;;  %vm6139_vm3 = vcmp.eq.s32.totalorder %v12002_v31, %v12471_v59 }
 0xacf   : > { %10772 = vmatprep.subr.bf16.mxu0 %v11169_v1  ;;  %vm10779_vm7 = vmpackc.low %vm6139_vm3, %vm6138_vm2  ;;  %vm3531_vm2 = vcmp.eq.s32.totalorder %v11799_v61, %v12291_v39  ;;  %vm3532_vm3 = vcmp.eq.s32.totalorder %v11804_v6, %v12291_v39 }
 0xad0   : > { %v3707_v62 = vpop.f32.mrb[28].mxu1  ;;  %v3870_v63 = vpop.f32.mrb[20].mxu0  ;;  %v8565_v28 = vsel %vm3531_vm2, 1.0, %v11171_v2  ;;  %v8566_v49 = vsel %vm3532_vm3, 1.0, %v11171_v2  ;;  %vm6695_vm2 = vcmp.eq.s32.totalorder %v11326_v4, %v12600_v16 }
 0xad1   : > { %v3709_v5 = vpop.f32.mrb[29].mxu1  ;;  %v3872_v8 = vpop.f32.mrb[21].mxu0  ;;  %9955 = vmatprep.subr.msk.mxu1 %vm3893_vm10, %v3870_v63 }
 0xad2   : > { %10774 = vmatpush1.bf16.msk.msra.mxu0 %vm10773_vm11, %v11172_v30  ;;  %9956 = vmatpush3.msk.msra.mxu1 %vm3893_vm10, %v3870_v63  ;;  %vm6140_vm11 = vcmp.eq.s32.totalorder %v12011_v32, %v12471_v59  ;;  %v11093_v63 = vld [vmem:[%s11710_s11] sm:$0xf] }
 0xad3   : > { %9966 = vmatprep.subr.msk.mxu1 %vm3893_vm10, %v3707_v62  ;;  %9958 = vmatmul.mubr.msk.f32.vlgmr.msra.gmra.mrb[30].mxu1 %vm3874_vm4, %v8618_v0  ;;  %vm10782_vm14 = vmpackc.low %vm6141_vm0, %vm6140_vm11  ;;  %vm3533_vm11 = vcmp.eq.s32.totalorder %v11807_v7, %v12291_v39  ;;  %vm4109_vm0 = vcmp.eq.s32.totalorder %v11321_v3, %v12576_v47 }
 0xad4   : > { %9967 = vmatpush3.msk.msra.mxu1 %vm3893_vm10, %v3707_v62  ;;  %10775 = vmatprep.subr.bf16.mxu0 %v11169_v1  ;;  %v8567_v21 = vsel %vm3533_vm11, 1.0, %v11171_v2  ;;  %v8686_v52 = vsel %vm4109_vm0, 1.0, %v11171_v2  ;;  %vm6698_vm11 = vcmp.eq.s32.totalorder %v11804_v6, %v12600_v16  ;;  %vm6699_vm0 = vcmp.eq.s32.totalorder %v11807_v7, %v12600_v16 }
 0xad5   : > { %9960 = vmatprep.mubr.msk.f32.mxu1 %vm3874_vm4, %v8619_v9 }
 0xad6   : > { %10777 = vmatpush1.bf16.msk.msra.mxu0 %vm10776_vm1, %v11172_v30  ;;  %vm6143_vm1 = vcmp.eq.s32.totalorder %v12023_v35, %v12471_v59 }
 0xad7   : > { %10778 = vmatprep.subr.bf16.mxu0 %v11169_v1  ;;  %9961 = vmatmul.mubr.msk.f32.gmra.mrb[32].mxu1 %vm3874_vm4, %v8620_v14  ;;  %vm10785_vm5 = vmpackc.low %vm6143_vm1, %vm6142_vm15  ;;  %vm6694_vm1 = vcmp.eq.s32.totalorder %v11321_v3, %v12600_v16  ;;  %v4393_v14 = vadd.s32 3, %v12291_v39 }
 0xad8   : > { %9963 = vmatprep.mubr.msk.f32.mxu1 %vm3874_vm4, %v8621_v17  ;;  %vm10830_vm3 = vmpackc.low %vm6695_vm2, %vm6694_vm1  ;;  %vm6702_vm1 = vcmp.eq.s32.totalorder %v11966_v42, %v12600_v16  ;;  %vm6703_vm2 = vcmp.eq.s32.totalorder %v11969_v20, %v12600_v16 }
 0xada   : > { %10780 = vmatpush1.bf16.msk.msra.mxu0 %vm10779_vm7, %v11172_v30  ;;  %vm6145_vm7 = vcmp.eq.s32.totalorder %v12035_v38, %v12471_v59 }
 0xadb   : > { %10781 = vmatprep.subr.bf16.mxu0 %v11169_v1  ;;  %9964 = vmatmul.mubr.msk.f32.gmra.mrb[34].mxu1 %vm3874_vm4, %v8622_v40  ;;  %vm10788_vm12 = vmpackc.low %vm6145_vm7, %vm6144_vm8  ;;  %vm6697_vm8 = vcmp.eq.s32.totalorder %v11799_v61, %v12600_v16 }
 0xadc   : > { %9968 = vmatprep.mubr.msk.f32.mxu1 %vm3874_vm4, %v8562_v43 }
 0xade   : > { %10783 = vmatpush1.bf16.msk.msra.mxu0 %vm10782_vm14, %v11172_v30  ;;  %vm6147_vm14 = vcmp.eq.s32.totalorder %v12123_v48, %v12471_v59 }
 0xadf   : > { %10784 = vmatprep.subr.bf16.mxu0 %v11169_v1  ;;  %9969 = vmatmul.mubr.msk.f32.vlgmr.msra.gmra.mrb[30].mxu1 %vm3874_vm4, %v8563_v44  ;;  %vm10791_vm15 = vmpackc.low %vm6147_vm14, %vm6146_vm13  ;;  %vm6700_vm13 = vcmp.eq.s32.totalorder %v11792_v58, %v12600_v16  ;;  %vm6701_vm14 = vcmp.eq.s32.totalorder %v11957_v41, %v12600_v16 }
 0xae0   : > { %9971 = vmatprep.mubr.msk.f32.mxu1 %vm3874_vm4, %v8564_v46 }
 0xae2   : > { %10786 = vmatpush1.bf16.msk.msra.mxu0 %vm10785_vm5, %v11172_v30  ;;  %vm6696_vm5 = vcmp.eq.s32.totalorder %v11796_v60, %v12600_v16 }
 0xae3   : > { %10787 = vmatprep.subr.bf16.mxu0 %v11169_v1  ;;  %9972 = vmatmul.mubr.msk.f32.gmra.mrb[32].mxu1 %vm3874_vm4, %v8565_v28  ;;  %vm10833_vm7 = vmpackc.low %vm6697_vm8, %vm6696_vm5  ;;  %vm6704_vm5 = vcmp.eq.s32.totalorder %v11978_v22, %v12600_v16  ;;  %vm6705_vm8 = vcmp.eq.s32.totalorder %v11981_v23, %v12600_v16 }
 0xae4   : > { %9974 = vmatprep.mubr.msk.f32.mxu1 %vm3874_vm4, %v8566_v49 }
 0xae6   : > { %10789 = vmatpush1.bf16.msk.msra.mxu0 %vm10788_vm12, %v11172_v30  ;;  %vm10836_vm12 = vmpackc.low %vm6699_vm0, %vm6698_vm11  ;;  %vm4414_vm11 = vcmp.eq.s32.totalorder %v11321_v3, %v12643_v24  ;;  %vm4415_vm0 = vcmp.eq.s32.totalorder %v11326_v4, %v12643_v24 }
 0xae7   : > { %10790 = vmatprep.subr.bf16.mxu0 %v11169_v1  ;;  %9975 = vmatmul.mubr.msk.f32.gmra.mrb[34].mxu1 %vm3874_vm4, %v8567_v21 }
 0xae8   : > { %9979 = vmatprep.mubr.msk.f32.mxu1 %vm3874_vm4, %v8686_v52  ;;  %v12811_v52 = vadd.s32 16, %v12291_v39 }
 0xaea   : > { %10792 = vmatpush1.bf16.msk.msra.mxu0 %vm10791_vm15, %v11172_v30  ;;  %vm10839_vm15 = vmpackc.low %vm6701_vm14, %vm6700_vm13  ;;  %vm4111_vm13 = vcmp.eq.s32.totalorder %v11796_v60, %v12576_v47  ;;  %vm6706_vm14 = vcmp.eq.s32.totalorder %v11834_v34, %v12600_v16 }
 0xaeb   : > { %10829 = vmatprep.subr.bf16.mxu0 %v11169_v1  ;;  %v8688_v57 = vsel %vm4111_vm13, 1.0, %v11171_v2  ;;  %vm4114_vm13 = vcmp.eq.s32.totalorder %v11807_v7, %v12576_v47 }
 0xaec   : > { %v8691_v62 = vsel %vm4114_vm13, 1.0, %v11171_v2 }
 0xaed   : > { %6261 = vmatmul.mubr.f32.vlgmr.msra.gmra.mrb[30].mxu0 %v12145_v50 }
 0xaee   : > { %10831 = vmatpush1.bf16.msk.msra.mxu0 %vm10830_vm3, %v11172_v30  ;;  %9298 = vmatprep.mubr.msk.f32.mxu0 %vm3637_vm9, %v12148_v51  ;;  %vm10842_vm3 = vmpackc.low %vm6703_vm2, %vm6702_vm1  ;;  %vm4112_vm2 = vcmp.eq.s32.totalorder %v11799_v61, %v12576_v47 }
 0xaef   : > { %10832 = vmatprep.subr.bf16.mxu0 %v11169_v1  ;;  %vm10542_vm1 = vmpackc.low %vm4415_vm0, %vm4414_vm11  ;;  %v8689_v19 = vsel %vm4112_vm2, 1.0, %v11171_v2  ;;  %vm6708_vm11 = vcmp.eq.s32.totalorder %v11999_v29, %v12600_v16  ;;  %vm6709_vm0 = vcmp.eq.s32.totalorder %v12002_v31, %v12600_v16  ;;  %vm6710_vm2 = vcmp.eq.s32.totalorder %v12011_v32, %v12600_v16 }
 0xaf2   : > { %10834 = vmatpush1.bf16.msk.msra.mxu0 %vm10833_vm7, %v11172_v30  ;;  %vm4110_vm7 = vcmp.eq.s32.totalorder %v11326_v4, %v12576_v47 }
 0xaf3   : > { %10835 = vmatprep.subr.bf16.mxu0 %v11169_v1  ;;  %v8687_v55 = vsel %vm4110_vm7, 1.0, %v11171_v2 }
 0xaf6   : > { %10837 = vmatpush1.bf16.msk.msra.mxu0 %vm10836_vm12, %v11172_v30  ;;  %vm10845_vm12 = vmpackc.low %vm6705_vm8, %vm6704_vm5  ;;  %vm4417_vm5 = vcmp.eq.s32.totalorder %v11799_v61, %v12643_v24  ;;  %vm4113_vm8 = vcmp.eq.s32.totalorder %v11804_v6, %v12576_v47 }
 0xaf7   : > { %10838 = vmatprep.subr.bf16.mxu0 %v11169_v1  ;;  %v8690_v59 = vsel %vm4113_vm8, 1.0, %v11171_v2  ;;  %vm4420_vm8 = vcmp.eq.s32.totalorder %v11792_v58, %v12643_v24 }
 0xafa   : > { %10840 = vmatpush1.bf16.msk.msra.mxu0 %vm10839_vm15, %v11172_v30  ;;  %vm6707_vm15 = vcmp.eq.s32.totalorder %v11990_v25, %v12600_v16 }
 0xafb   : > { %10841 = vmatprep.subr.bf16.mxu0 %v11169_v1  ;;  %vm10848_vm7 = vmpackc.low %vm6707_vm15, %vm6706_vm14  ;;  %vm4418_vm14 = vcmp.eq.s32.totalorder %v11804_v6, %v12643_v24  ;;  %vm4419_vm15 = vcmp.eq.s32.totalorder %v11807_v7, %v12643_v24 }
 0xafe   : > { %10843 = vmatpush1.bf16.msk.msra.mxu0 %vm10842_vm3, %v11172_v30  ;;  %vm4416_vm3 = vcmp.eq.s32.totalorder %v11796_v60, %v12643_v24 }
 0xaff   : > { %10844 = vmatprep.subr.bf16.mxu0 %v11169_v1 }
 0xb00   : > { %v4267_v54 = vpop.f32.mrb[22].mxu0 }
 0xb01   : > { %v4269_v56 = vpop.f32.mrb[23].mxu0  ;;  %9977 = vmatprep.subr.msk.mxu1 %vm3893_vm10, %v4267_v54 }
 0xb02   : > { %9978 = vmatpush3.msk.msra.mxu1 %vm3893_vm10, %v4267_v54  ;;  %10846 = vmatpush1.bf16.msk.msra.mxu0 %vm10845_vm12, %v11172_v30  ;;  %vm10545_vm12 = vmpackc.low %vm4417_vm5, %vm4416_vm3  ;;  %vm6711_vm3 = vcmp.eq.s32.totalorder %v12014_v33, %v12600_v16 }
 0xb03   : > { %9980 = vmatmul.mubr.msk.f32.vlgmr.msra.gmra.mrb[30].mxu1 %vm3874_vm4, %v8687_v55  ;;  %10541 = vmatprep.subr.bf16.mxu1 %v11169_v1  ;;  %vm10548_vm5 = vmpackc.low %vm4419_vm15, %vm4418_vm14  ;;  %vm4422_vm14 = vcmp.eq.s32.totalorder %v11966_v42, %v12643_v24  ;;  %vm4423_vm15 = vcmp.eq.s32.totalorder %v11969_v20, %v12643_v24  ;;  %v12825_v55 = vadd.s32 %v4982_v53, %v11934_v12 }
 0xb04   : > { %10543 = vmatpush1.bf16.msk.msra.mxu1 %vm10542_vm1, %v11172_v30  ;;  %10847 = vmatprep.subr.bf16.mxu0 %v11169_v1  ;;  %vm10851_vm1 = vmpackc.low %vm6709_vm0, %vm6708_vm11  ;;  %vm6712_vm0 = vcmp.eq.s32.totalorder %v11904_v36, %v12600_v16 }
 0xb05   : > { %9982 = vmatprep.mubr.msk.f32.mxu1 %vm3874_vm4, %v8688_v57  ;;  %10544 = vmatprep.subr.bf16.mxu1 %v11169_v1  ;;  %vm10854_vm11 = vmpackc.low %vm6711_vm3, %vm6710_vm2  ;;  %vm6714_vm2 = vcmp.eq.s32.totalorder %v12032_v37, %v12600_v16  ;;  %vm6715_vm3 = vcmp.eq.s32.totalorder %v12035_v38, %v12600_v16 }
 0xb06   : > { %10849 = vmatpush1.bf16.msk.msra.mxu0 %vm10848_vm7, %v11172_v30  ;;  %vm4421_vm7 = vcmp.eq.s32.totalorder %v11957_v41, %v12643_v24 }
 0xb07   : > { %9983 = vmatmul.mubr.msk.f32.gmra.mrb[32].mxu1 %vm3874_vm4, %v8689_v19  ;;  %10850 = vmatprep.subr.bf16.mxu0 %v11169_v1  ;;  %vm10551_vm13 = vmpackc.low %vm4421_vm7, %vm4420_vm8  ;;  %vm4424_vm8 = vcmp.eq.s32.totalorder %v11978_v22, %v12643_v24  ;;  %vm4425_vm7 = vcmp.eq.s32.totalorder %v11981_v23, %v12643_v24 }
 0xb08   : > { %10546 = vmatpush1.bf16.msk.msra.mxu1 %vm10545_vm12, %v11172_v30  ;;  %9985 = vmatprep.mubr.msk.f32.mxu1 %vm3874_vm4, %v8690_v59  ;;  %vm6713_vm12 = vcmp.eq.s32.totalorder %v12023_v35, %v12600_v16 }
 0xb09   : > { %10547 = vmatprep.subr.bf16.mxu1 %v11169_v1 }
 0xb0a   : > { %10852 = vmatpush1.bf16.msk.msra.mxu0 %vm10851_vm1, %v11172_v30  ;;  %vm10857_vm1 = vmpackc.low %vm6713_vm12, %vm6712_vm0  ;;  %vm6716_vm0 = vcmp.eq.s32.totalorder %v12120_v45, %v12600_v16  ;;  %vm6717_vm12 = vcmp.eq.s32.totalorder %v12123_v48, %v12600_v16 }
 0xb0b   : > { %9986 = vmatmul.mubr.msk.f32.gmra.mrb[34].mxu1 %vm3874_vm4, %v8691_v62  ;;  %10853 = vmatprep.subr.bf16.mxu0 %v11169_v1 }
 0xb0c   : > { %10549 = vmatpush1.bf16.msk.msra.mxu1 %vm10548_vm5, %v11172_v30  ;;  %8802 = vmatprep.mubr.msk.f32.mxu1 %vm3637_vm9, %v12148_v51  ;;  %vm10554_vm5 = vmpackc.low %vm4423_vm15, %vm4422_vm14  ;;  %vm4426_vm14 = vcmp.eq.s32.totalorder %v11834_v34, %v12643_v24  ;;  %vm4427_vm15 = vcmp.eq.s32.totalorder %v11990_v25, %v12643_v24 }
 0xb0d   : > { %10550 = vmatprep.subr.bf16.mxu1 %v11169_v1 }
 0xb0e   : > { %10855 = vmatpush1.bf16.msk.msra.mxu0 %vm10854_vm11, %v11172_v30  ;;  %vm10860_vm11 = vmpackc.low %vm6715_vm3, %vm6714_vm2  ;;  %vm4428_vm3 = vcmp.eq.s32.totalorder %v11999_v29, %v12643_v24 }
 0xb0f   : > { %10856 = vmatprep.subr.bf16.mxu0 %v11169_v1  ;;  %vm10560_vm2 = vmpackc.low %vm4427_vm15, %vm4426_vm14  ;;  %vm4434_vm15 = vcmp.eq.s32.totalorder %v12032_v37, %v12643_v24 }
 0xb10   : > { %10552 = vmatpush1.bf16.msk.msra.mxu1 %vm10551_vm13, %v11172_v30  ;;  %vm10557_vm13 = vmpackc.low %vm4425_vm7, %vm4424_vm8  ;;  %vm4430_vm7 = vcmp.eq.s32.totalorder %v12011_v32, %v12643_v24 }
 0xb11   : > { %10553 = vmatprep.subr.bf16.mxu1 %v11169_v1 }
 0xb12   : > { %10858 = vmatpush1.bf16.msk.msra.mxu0 %vm10857_vm1, %v11172_v30  ;;  %vm10863_vm1 = vmpackc.low %vm6717_vm12, %vm6716_vm0  ;;  %vm4432_vm12 = vcmp.eq.s32.totalorder %v11904_v36, %v12643_v24 }
 0xb13   : > { %10859 = vmatprep.subr.bf16.mxu0 %v11169_v1 }
 0xb14   : > { %10555 = vmatpush1.bf16.msk.msra.mxu1 %vm10554_vm5, %v11172_v30  ;;  %vm4429_vm5 = vcmp.eq.s32.totalorder %v12002_v31, %v12643_v24 }
 0xb15   : > { %10556 = vmatprep.subr.bf16.mxu1 %v11169_v1  ;;  %vm10563_vm8 = vmpackc.low %vm4429_vm5, %vm4428_vm3  ;;  %vm4436_vm3 = vcmp.eq.s32.totalorder %v12120_v45, %v12643_v24  ;;  %vm4437_vm5 = vcmp.eq.s32.totalorder %v12123_v48, %v12643_v24 }
 0xb16   : > { %10861 = vmatpush1.bf16.msk.msra.mxu0 %vm10860_vm11, %v11172_v30  ;;  %vm4431_vm11 = vcmp.eq.s32.totalorder %v12014_v33, %v12643_v24 }
 0xb17   : > { %10862 = vmatprep.subr.bf16.mxu0 %v11169_v1  ;;  %vm10566_vm0 = vmpackc.low %vm4431_vm11, %vm4430_vm7  ;;  %vm4394_vm7 = vcmp.eq.s32.totalorder %v11321_v3, %v4393_v14  ;;  %vm4395_vm11 = vcmp.eq.s32.totalorder %v11326_v4, %v4393_v14 }
 0xb18   : > { %10558 = vmatpush1.bf16.msk.msra.mxu1 %vm10557_vm13, %v11172_v30  ;;  %vm4433_vm13 = vcmp.eq.s32.totalorder %v12023_v35, %v12643_v24  ;;  %v8748_v17 = vsel %vm4394_vm7, 1.0, %v11171_v2  ;;  %v8749_v49 = vsel %vm4395_vm11, 1.0, %v11171_v2  ;;  %vm4682_vm7 = vcmp.eq.s32.totalorder %v11799_v61, %v12811_v52 }
 0xb19   : > { %10559 = vmatprep.subr.bf16.mxu1 %v11169_v1  ;;  %vm10569_vm14 = vmpackc.low %vm4433_vm13, %vm4432_vm12  ;;  %vm4397_vm12 = vcmp.eq.s32.totalorder %v11799_v61, %v4393_v14  ;;  %vm4398_vm13 = vcmp.eq.s32.totalorder %v11804_v6, %v4393_v14  ;;  %vm4986_vm11 = vcmp.eq.s32.totalorder %v11796_v60, %v12825_v55  ;;  %v8813_v62 = vsel %vm4682_vm7, 1.0, %v11171_v2 }
 0xb1a   : > { %10864 = vmatpush1.bf16.msk.msra.mxu0 %vm10863_vm1, %v11172_v30  ;;  %vm4435_vm1 = vcmp.eq.s32.totalorder %v12035_v38, %v12643_v24  ;;  %v8751_v24 = vsel %vm4397_vm12, 1.0, %v11171_v2  ;;  %v8752_v54 = vsel %vm4398_vm13, 1.0, %v11171_v2  ;;  %vm4683_vm12 = vcmp.eq.s32.totalorder %v11804_v6, %v12811_v52 }
 0xb1b   : > { %10087 = vmatprep.subr.msk.mxu0 %vm3893_vm10, %v11093_v63  ;;  %vm4992_vm7 = vcmp.eq.s32.totalorder %v11966_v42, %v12825_v55 }
 0xb1c   : > { %10561 = vmatpush1.bf16.msk.msra.mxu1 %vm10560_vm2, %v11172_v30  ;;  %vm10572_vm2 = vmpackc.low %vm4435_vm1, %vm4434_vm15  ;;  %vm4679_vm15 = vcmp.eq.s32.totalorder %v11321_v3, %v12811_v52  ;;  %vm4680_vm1 = vcmp.eq.s32.totalorder %v11326_v4, %v12811_v52 }
 0xb1d   : > { %6831 = vmatmul.mubr.f32.vlgmr.msra.gmra.mrb[32].mxu0 %v12145_v50  ;;  %10562 = vmatprep.subr.bf16.mxu1 %v11169_v1  ;;  %v8810_v57 = vsel %vm4679_vm15, 1.0, %v11171_v2  ;;  %v8811_v19 = vsel %vm4680_vm1, 1.0, %v11171_v2  ;;  %vm4988_vm15 = vcmp.eq.s32.totalorder %v11804_v6, %v12825_v55  ;;  %vm4989_vm1 = vcmp.eq.s32.totalorder %v11807_v7, %v12825_v55 }
 0xb1e   : > { %10088 = vmatpush3.msk.msra.mxu0 %vm3893_vm10, %v11093_v63  ;;  %v8814_v63 = vsel %vm4683_vm12, 1.0, %v11171_v2  ;;  %vm4994_vm12 = vcmp.eq.s32.totalorder %v11978_v22, %v12825_v55 }
 0xb20   : > { %10564 = vmatpush1.bf16.msk.msra.mxu1 %vm10563_vm8, %v11172_v30  ;;  %vm10575_vm8 = vmpackc.low %vm4437_vm5, %vm4436_vm3  ;;  %vm4985_vm3 = vcmp.eq.s32.totalorder %v11326_v4, %v12825_v55  ;;  %vm4681_vm5 = vcmp.eq.s32.totalorder %v11796_v60, %v12811_v52 }
 0xb21   : > { %10565 = vmatprep.subr.bf16.mxu1 %v11169_v1  ;;  %v8812_v59 = vsel %vm4681_vm5, 1.0, %v11171_v2  ;;  %vm4991_vm5 = vcmp.eq.s32.totalorder %v11957_v41, %v12825_v55 }
 0xb24   : > { %10567 = vmatpush1.bf16.msk.msra.mxu1 %vm10566_vm0, %v11172_v30  ;;  %vm4396_vm0 = vcmp.eq.s32.totalorder %v11796_v60, %v4393_v14 }
 0xb25   : > { %10568 = vmatprep.subr.bf16.mxu1 %v11169_v1  ;;  %v8750_v21 = vsel %vm4396_vm0, 1.0, %v11171_v2  ;;  %vm4987_vm0 = vcmp.eq.s32.totalorder %v11799_v61, %v12825_v55 }
 0xb26   : > { %vm10617_vm13 = vmpackc.low %vm4987_vm0, %vm4986_vm11  ;;  %vm4993_vm11 = vcmp.eq.s32.totalorder %v11969_v20, %v12825_v55 }
 0xb27   : > { %vm10626_vm0 = vmpackc.low %vm4993_vm11, %vm4992_vm7  ;;  %vm5000_vm7 = vcmp.eq.s32.totalorder %v12011_v32, %v12825_v55  ;;  %vm5001_vm11 = vcmp.eq.s32.totalorder %v12014_v33, %v12825_v55 }
 0xb28   : > { %10570 = vmatpush1.bf16.msk.msra.mxu1 %vm10569_vm14, %v11172_v30  ;;  %vm4399_vm14 = vcmp.eq.s32.totalorder %v11807_v7, %v4393_v14  ;;  %v6960_v14 = vadd.s32 1, %v11333_v10 }
 0xb29   : > { %10571 = vmatprep.subr.bf16.mxu1 %v11169_v1  ;;  %v8753_v56 = vsel %vm4399_vm14, 1.0, %v11171_v2  ;;  %vm4684_vm14 = vcmp.eq.s32.totalorder %v11807_v7, %v12811_v52 }
 0xb2c   : > { %10573 = vmatpush1.bf16.msk.msra.mxu1 %vm10572_vm2, %v11172_v30  ;;  %vm4984_vm2 = vcmp.eq.s32.totalorder %v11321_v3, %v12825_v55 }
 0xb2d   : > { %10574 = vmatprep.subr.bf16.mxu1 %v11169_v1 }
 0xb30   : > { %10576 = vmatpush1.bf16.msk.msra.mxu1 %vm10575_vm8, %v11172_v30  ;;  %v4837_v0 = vpop.f32.mrb[24].mxu0  ;;  %vm10614_vm8 = vmpackc.low %vm4985_vm3, %vm4984_vm2  ;;  %vm4990_vm3 = vcmp.eq.s32.totalorder %v11792_v58, %v12825_v55 }
 0xb31   : > { %v4839_v5 = vpop.f32.mrb[25].mxu0  ;;  %vm10620_vm2 = vmpackc.low %vm4989_vm1, %vm4988_vm15  ;;  %vm4996_vm15 = vcmp.eq.s32.totalorder %v11834_v34, %v12825_v55  ;;  %vm4997_vm1 = vcmp.eq.s32.totalorder %v11990_v25, %v12825_v55 }
 0xb32   : > { %v4963_v5 = vadd.s32 1, %v12811_v52 }
 0xb33   : > { %4551 = vmatmul.mubr.f32.vlgmr.msra.gmra.mrb[36].mxu1 %v12145_v50 }
 0xb34   : > { %9990 = vmatprep.mubr.msk.f32.mxu1 %vm3874_vm4, %v8748_v17  ;;  %v6961_v17 = vmul.u32 4, %v6960_v14 }
 0xb60   : > { %v12790_v8 = vpop.f32.mrb[26].mxu0 }
 0xb61   : > { %v5409_v9 = vpop.f32.mrb[27].mxu0 }
 0xb90   : > { %v12796_v40 = vpop.f32.mrb[28].mxu0 }
 0xb91   : > { %v5694_v43 = vpop.f32.mrb[29].mxu0 }
 0xbc0   : > { %v12798_v44 = vpop.f32.mrb[30].mxu0 }
 0xbc1   : > { %v6264_v46 = vpop.f32.mrb[31].mxu0 }
 0xbf0   : > { %v12800_v47 = vpop.f32.mrb[32].mxu0 }
 0xbf1   : > { %v6834_v26 = vpop.f32.mrb[33].mxu0 }
 0xc06   : > { %v4552_v28 = vpop.f32.mrb[36].mxu1 }
 0xc07   : > { %v4554_v16 = vpop.f32.mrb[37].mxu1  ;;  %9988 = vmatprep.subr.msk.mxu1 %vm3893_vm10, %v4552_v28 }
 0xc08   : > { %9989 = vmatpush3.msk.msra.mxu1 %vm3893_vm10, %v4552_v28 }
 0xc09   : > { %9991 = vmatmul.mubr.msk.f32.vlgmr.msra.gmra.mrb[30].mxu1 %vm3874_vm4, %v8749_v49  ;;  %9999 = vmatprep.subr.msk.mxu1 %vm3893_vm10, %v4837_v0 }
 0xc0a   : > { %10000 = vmatpush3.msk.msra.mxu1 %vm3893_vm10, %v4837_v0  ;;  %9993 = vmatprep.mubr.msk.f32.mxu1 %vm3874_vm4, %v8750_v21  ;;  %v8815_v0 = vsel %vm4684_vm14, 1.0, %v11171_v2  ;;  %v5248_v21 = vadd.s32 2, %v12811_v52 }
 0xc0b   : > { %10613 = vmatprep.subr.bf16.mxu1 %v11169_v1 }
 0xc0d   : > { %9994 = vmatmul.mubr.msk.f32.gmra.mrb[32].mxu1 %vm3874_vm4, %v8751_v24 }
 0xc0e   : > { %9996 = vmatprep.mubr.msk.f32.mxu1 %vm3874_vm4, %v8752_v54 }
 0xc11   : > { %9997 = vmatmul.mubr.msk.f32.gmra.mrb[34].mxu1 %vm3874_vm4, %v8753_v56 }
 0xc12   : > { %10001 = vmatprep.mubr.msk.f32.mxu1 %vm3874_vm4, %v8810_v57  ;;  %v5533_v57 = vadd.s32 3, %v12811_v52 }
 0xc15   : > { %10002 = vmatmul.mubr.msk.f32.vlgmr.msra.gmra.mrb[30].mxu1 %vm3874_vm4, %v8811_v19  ;;  %v5837_v19 = vadd.s32 32, %v11936_v15 }
 0xc16   : > { %10615 = vmatpush1.bf16.msk.msra.mxu1 %vm10614_vm8, %v11172_v30  ;;  %10004 = vmatprep.mubr.msk.f32.mxu1 %vm3874_vm4, %v8812_v59  ;;  %vm10623_vm8 = vmpackc.low %vm4991_vm5, %vm4990_vm3  ;;  %vm4998_vm3 = vcmp.eq.s32.totalorder %v11999_v29, %v12825_v55  ;;  %vm4999_vm5 = vcmp.eq.s32.totalorder %v12002_v31, %v12825_v55 }
 0xc17   : > { %10616 = vmatprep.subr.bf16.mxu1 %v11169_v1  ;;  %v12987_v52 = vadd.s32 %v5837_v19, %v11934_v12 }
 0xc19   : > { %10005 = vmatmul.mubr.msk.f32.gmra.mrb[32].mxu1 %vm3874_vm4, %v8813_v62 }
 0xc1a   : > { %10618 = vmatpush1.bf16.msk.msra.mxu1 %vm10617_vm13, %v11172_v30  ;;  %10007 = vmatprep.mubr.msk.f32.mxu1 %vm3874_vm4, %v8814_v63  ;;  %vm4995_vm13 = vcmp.eq.s32.totalorder %v11981_v23, %v12825_v55 }
 0xc1b   : > { %10619 = vmatprep.subr.bf16.mxu1 %v11169_v1  ;;  %vm10629_vm14 = vmpackc.low %vm4995_vm13, %vm4994_vm12  ;;  %vm5002_vm12 = vcmp.eq.s32.totalorder %v11904_v36, %v12825_v55  ;;  %vm5003_vm13 = vcmp.eq.s32.totalorder %v12023_v35, %v12825_v55 }
 0xc1d   : > { %10008 = vmatmul.mubr.msk.f32.gmra.mrb[34].mxu1 %vm3874_vm4, %v8815_v0 }
 0xc1e   : > { %10621 = vmatpush1.bf16.msk.msra.mxu1 %vm10620_vm2, %v11172_v30  ;;  %8926 = vmatprep.mubr.msk.f32.mxu1 %vm3637_vm9, %v12148_v51  ;;  %vm10632_vm2 = vmpackc.low %vm4997_vm1, %vm4996_vm15  ;;  %vm5004_vm15 = vcmp.eq.s32.totalorder %v12032_v37, %v12825_v55  ;;  %vm5005_vm1 = vcmp.eq.s32.totalorder %v12035_v38, %v12825_v55 }
 0xc1f   : > { %10622 = vmatprep.subr.bf16.mxu1 %v11169_v1 }
 0xc22   : > { %10624 = vmatpush1.bf16.msk.msra.mxu1 %vm10623_vm8, %v11172_v30  ;;  %vm10635_vm8 = vmpackc.low %vm4999_vm5, %vm4998_vm3  ;;  %vm5006_vm3 = vcmp.eq.s32.totalorder %v12120_v45, %v12825_v55  ;;  %vm5007_vm5 = vcmp.eq.s32.totalorder %v12123_v48, %v12825_v55 }
 0xc23   : > { %10625 = vmatprep.subr.bf16.mxu1 %v11169_v1 }
 0xc26   : > { %10627 = vmatpush1.bf16.msk.msra.mxu1 %vm10626_vm0, %v11172_v30  ;;  %vm10638_vm0 = vmpackc.low %vm5001_vm11, %vm5000_vm7  ;;  %vm4964_vm7 = vcmp.eq.s32.totalorder %v11321_v3, %v4963_v5  ;;  %vm6958_vm11 = vcmp.ge.s32.totalorder %v11321_v3, %v12291_v39 }
 0xc27   : > { %10628 = vmatprep.subr.bf16.mxu1 %v11169_v1  ;;  %v8872_v9 = vsel %vm4964_vm7, 1.0, %v11171_v2  ;;  %vm5249_vm7 = vcmp.eq.s32.totalorder %v11321_v3, %v5248_v21 }
 0xc2a   : > { %10630 = vmatpush1.bf16.msk.msra.mxu1 %vm10629_vm14, %v11172_v30  ;;  %vm10641_vm14 = vmpackc.low %vm5003_vm13, %vm5002_vm12  ;;  %vm6962_vm12 = vcmp.lt.s32.totalorder %v11321_v3, %v6961_v17  ;;  %vm6963_vm13 = vcmp.lt.s32.totalorder %v11326_v4, %v6961_v17 }
 0xc2b   : > { %10631 = vmatprep.subr.bf16.mxu1 %v11169_v1 }
 0xc2e   : > { %10633 = vmatpush1.bf16.msk.msra.mxu1 %vm10632_vm2, %v11172_v30  ;;  %vm10644_vm2 = vmpackc.low %vm5005_vm1, %vm5004_vm15  ;;  %vm4965_vm1 = vcmp.eq.s32.totalorder %v11326_v4, %v4963_v5 }
 0xc2f   : > { %10634 = vmatprep.subr.bf16.mxu1 %v11169_v1  ;;  %v8873_v28 = vsel %vm4965_vm1, 1.0, %v11171_v2  ;;  %vm5535_vm1 = vcmp.eq.s32.totalorder %v11326_v4, %v5533_v57 }
 0xc30   : > { %v8997_v0 = vsel %vm5535_vm1, 1.0, %v11171_v2  ;;  %vm5844_vm1 = vcmp.eq.s32.totalorder %v11807_v7, %v12987_v52 }
 0xc32   : > { %10636 = vmatpush1.bf16.msk.msra.mxu1 %vm10635_vm8, %v11172_v30  ;;  %vm10647_vm8 = vmpackc.low %vm5007_vm5, %vm5006_vm3  ;;  %vm4967_vm3 = vcmp.eq.s32.totalorder %v11799_v61, %v4963_v5  ;;  %vm4968_vm5 = vcmp.eq.s32.totalorder %v11804_v6, %v4963_v5 }
 0xc33   : > { %10637 = vmatprep.subr.bf16.mxu1 %v11169_v1  ;;  %v8875_v53 = vsel %vm4967_vm3, 1.0, %v11171_v2  ;;  %v8876_v24 = vsel %vm4968_vm5, 1.0, %v11171_v2  ;;  %vm5840_vm3 = vcmp.eq.s32.totalorder %v11326_v4, %v12987_v52  ;;  %vm5536_vm5 = vcmp.eq.s32.totalorder %v11796_v60, %v5533_v57 }
 0xc36   : > { %10639 = vmatpush1.bf16.msk.msra.mxu1 %vm10638_vm0, %v11172_v30  ;;  %vm6959_vm0 = vcmp.ge.s32.totalorder %v11326_v4, %v12291_v39 }
 0xc37   : > { %10640 = vmatprep.subr.bf16.mxu1 %v11169_v1  ;;  %vm6965_vm15 = vmand %vm6959_vm0, %vm6963_vm13  ;;  %vm5251_vm0 = vcmp.eq.s32.totalorder %v11796_v60, %v5248_v21  ;;  %vm5253_vm13 = vcmp.eq.s32.totalorder %v11804_v6, %v5248_v21 }
 0xc38   : > { %v9307_v46 = vsel %vm6965_vm15, 1.0, %v11171_v2  ;;  %v8936_v56 = vsel %vm5251_vm0, 1.0, %v11171_v2  ;;  %v8938_v62 = vsel %vm5253_vm13, 1.0, %v11171_v2  ;;  %vm5534_vm15 = vcmp.eq.s32.totalorder %v11321_v3, %v5533_v57 }
 0xc39   : > { %v8996_v63 = vsel %vm5534_vm15, 1.0, %v11171_v2  ;;  %vm5842_vm0 = vcmp.eq.s32.totalorder %v11799_v61, %v12987_v52  ;;  %vm5843_vm15 = vcmp.eq.s32.totalorder %v11804_v6, %v12987_v52 }
 0xc3a   : > { %10642 = vmatpush1.bf16.msk.msra.mxu1 %vm10641_vm14, %v11172_v30  ;;  %vm6964_vm14 = vmand %vm6958_vm11, %vm6962_vm12  ;;  %vm5250_vm11 = vcmp.eq.s32.totalorder %v11326_v4, %v5248_v21  ;;  %vm5252_vm12 = vcmp.eq.s32.totalorder %v11799_v61, %v5248_v21 }
 0xc3b   : > { %10643 = vmatprep.subr.bf16.mxu1 %v11169_v1  ;;  %v9306_v43 = vsel %vm6964_vm14, 1.0, %v11171_v2  ;;  %v8935_v55 = vsel %vm5250_vm11, 1.0, %v11171_v2  ;;  %v8937_v59 = vsel %vm5252_vm12, 1.0, %v11171_v2  ;;  %vm5254_vm14 = vcmp.eq.s32.totalorder %v11807_v7, %v5248_v21 }
 0xc3c   : > { %10089 = vmatprep.mubr.msk.f32.mxu0 %vm3874_vm4, %v9306_v43  ;;  %vm5841_vm11 = vcmp.eq.s32.totalorder %v11796_v60, %v12987_v52  ;;  %vm5538_vm12 = vcmp.eq.s32.totalorder %v11804_v6, %v5533_v57  ;;  %v13085_v43 = vadd.s32 32, %v12291_v39  ;;  %v7145_v21 = vsub.s32 %v11326_v4, %v11333_v10 }
 0xc3d   : > { %10090 = vmatmul.mubr.msk.f32.vlgmr.msra.gmra.mrb[34].mxu0 %vm3874_vm4, %v9307_v46  ;;  %vm10725_vm13 = vmpackc.low %vm5842_vm0, %vm5841_vm11  ;;  %v9000_v14 = vsel %vm5538_vm12, 1.0, %v11171_v2  ;;  %vm5848_vm11 = vcmp.eq.s32.totalorder %v11969_v20, %v12987_v52  ;;  %vm5849_vm12 = vcmp.eq.s32.totalorder %v11978_v22, %v12987_v52 }
 0xc3e   : > { %10645 = vmatpush1.bf16.msk.msra.mxu1 %vm10644_vm2, %v11172_v30  ;;  %vm4966_vm2 = vcmp.eq.s32.totalorder %v11796_v60, %v4963_v5 }
 0xc3f   : > { %10646 = vmatprep.subr.bf16.mxu1 %v11169_v1  ;;  %v8874_v16 = vsel %vm4966_vm2, 1.0, %v11171_v2  ;;  %vm5839_vm2 = vcmp.eq.s32.totalorder %v11321_v3, %v12987_v52 }
 0xc42   : > { %10648 = vmatpush1.bf16.msk.msra.mxu1 %vm10647_vm8, %v11172_v30  ;;  %vm4969_vm8 = vcmp.eq.s32.totalorder %v11807_v7, %v4963_v5  ;;  %v8998_v5 = vsel %vm5536_vm5, 1.0, %v11171_v2  ;;  %vm5846_vm5 = vcmp.eq.s32.totalorder %v11957_v41, %v12987_v52 }
 0xc43   : > { %v8877_v54 = vsel %vm4969_vm8, 1.0, %v11171_v2  ;;  %vm10722_vm8 = vmpackc.low %vm5840_vm3, %vm5839_vm2  ;;  %vm5845_vm3 = vcmp.eq.s32.totalorder %v11792_v58, %v12987_v52 }
 0xc44   : > { %vm10728_vm2 = vmpackc.low %vm5844_vm1, %vm5843_vm15  ;;  %vm5851_vm15 = vcmp.eq.s32.totalorder %v11834_v34, %v12987_v52  ;;  %vm5852_vm1 = vcmp.eq.s32.totalorder %v11990_v25, %v12987_v52 }
 0xc45   : > { %5121 = vmatmul.mubr.f32.vlgmr.msra.gmra.mrb[38].mxu1 %v12145_v50 }
 0xc46   : > { %10012 = vmatprep.mubr.msk.f32.mxu1 %vm3874_vm4, %v8872_v9 }
 0xd18   : > { %v5122_v26 = vpop.f32.mrb[38].mxu1 }
 0xd19   : > { %v5124_v49 = vpop.f32.mrb[39].mxu1  ;;  %10010 = vmatprep.subr.msk.mxu1 %vm3893_vm10, %v5122_v26 }
 0xd1a   : > { %10011 = vmatpush3.msk.msra.mxu1 %vm3893_vm10, %v5122_v26  ;;  %v10091_v26 = vpop.f32.mrb[34].mxu0  ;;  %v7144_v49 = vsub.s32 %v11321_v3, %v11333_v10 }
 0xd1b   : > { %10013 = vmatmul.mubr.msk.f32.vlgmr.msra.gmra.mrb[30].mxu1 %vm3874_vm4, %v8873_v28  ;;  %10021 = vmatprep.subr.msk.mxu1 %vm3893_vm10, %v12790_v8  ;;  %v6971_v28 = vadd.s32 1, %v11321_v3  ;;  %v7051_v39 = vpop.f32.mrb[35].mxu0 }
 0xd1c   : > { %10022 = vmatpush3.msk.msra.mxu1 %vm3893_vm10, %v12790_v8  ;;  %10015 = vmatprep.mubr.msk.f32.mxu1 %vm3874_vm4, %v8874_v16  ;;  %v8934_v8 = vsel %vm5249_vm7, 1.0, %v11171_v2  ;;  %vm5537_vm7 = vcmp.eq.s32.totalorder %v11799_v61, %v5533_v57  ;;  %v7148_v16 = vsub.s32 %v11333_v10, %v11321_v3 }
 0xd1d   : > { %10032 = vmatprep.subr.msk.mxu1 %vm3893_vm10, %v12796_v40  ;;  %v8999_v9 = vsel %vm5537_vm7, 1.0, %v11171_v2  ;;  %vm5847_vm7 = vcmp.eq.s32.totalorder %v11966_v42, %v12987_v52  ;;  %10094 = vmatprep.mubr.msk.f32.mxu0 %vm3874_vm4, %v7051_v39  ;;  %v6103_v39 = vadd.s32 1, %v13085_v43 }
 0xd1e   : > { %vm10734_vm0 = vmpackc.low %vm5848_vm11, %vm5847_vm7  ;;  %vm5855_vm7 = vcmp.eq.s32.totalorder %v12011_v32, %v12987_v52  ;;  %vm5856_vm11 = vcmp.eq.s32.totalorder %v12014_v33, %v12987_v52 }
 0xd1f   : > { %10016 = vmatmul.mubr.msk.f32.gmra.mrb[32].mxu1 %vm3874_vm4, %v8875_v53  ;;  %v7149_v53 = vsub.s32 %v11333_v10, %v11326_v4 }
 0xd20   : > { %10018 = vmatprep.mubr.msk.f32.mxu1 %vm3874_vm4, %v8876_v24  ;;  %v6972_v24 = vmul.u32 4, %v6971_v28 }
 0xd23   : > { %10019 = vmatmul.mubr.msk.f32.gmra.mrb[34].mxu1 %vm3874_vm4, %v8877_v54 }
 0xd24   : > { %10023 = vmatprep.mubr.msk.f32.mxu1 %vm3874_vm4, %v8934_v8 }
 0xd27   : > { %10024 = vmatmul.mubr.msk.f32.vlgmr.msra.gmra.mrb[30].mxu1 %vm3874_vm4, %v8935_v55 }
 0xd28   : > { %10033 = vmatpush3.msk.msra.mxu1 %vm3893_vm10, %v12796_v40  ;;  %10026 = vmatprep.mubr.msk.f32.mxu1 %vm3874_vm4, %v8936_v56  ;;  %v8939_v40 = vsel %vm5254_vm14, 1.0, %v11171_v2  ;;  %vm5539_vm14 = vcmp.eq.s32.totalorder %v11807_v7, %v5533_v57  ;;  %v13123_v57 = vld [vmem:[%s11311_s12 + $0x8] sm:$0xff] }
 0xd29   : > { %10721 = vmatprep.subr.bf16.mxu1 %v11169_v1  ;;  %v9001_v17 = vsel %vm5539_vm14, 1.0, %v11171_v2  ;;  %v7346_v19 = vmul.f32 %v13123_v57, %v13123_v57 }
 0xd2b   : > { %10027 = vmatmul.mubr.msk.f32.gmra.mrb[32].mxu1 %vm3874_vm4, %v8937_v59 }
 0xd2c   : > { %10029 = vmatprep.mubr.msk.f32.mxu1 %vm3874_vm4, %v8938_v62 }
 0xd2f   : > { %10030 = vmatmul.mubr.msk.f32.gmra.mrb[34].mxu1 %vm3874_vm4, %v8939_v40 }
 0xd30   : > { %10034 = vmatprep.mubr.msk.f32.mxu1 %vm3874_vm4, %v8996_v63  ;;  %v13151_v63 = vld [vmem:[%s11311_s12 + $0x10] sm:$0xff] }
 0xd33   : > { %10035 = vmatmul.mubr.msk.f32.vlgmr.msra.gmra.mrb[30].mxu1 %vm3874_vm4, %v8997_v0  ;;  %v7698_v0 = vmul.f32 %v13151_v63, %v13151_v63 }
 0xd34   : > { %10723 = vmatpush1.bf16.msk.msra.mxu1 %vm10722_vm8, %v11172_v30  ;;  %10037 = vmatprep.mubr.msk.f32.mxu1 %vm3874_vm4, %v8998_v5  ;;  %vm10731_vm8 = vmpackc.low %vm5846_vm5, %vm5845_vm3  ;;  %vm5853_vm3 = vcmp.eq.s32.totalorder %v11999_v29, %v12987_v52  ;;  %vm5854_vm5 = vcmp.eq.s32.totalorder %v12002_v31, %v12987_v52  ;;  %v13156_v5 = vld [vmem:[%s11311_s12 + $0x18] sm:$0xff] }
 0xd35   : > { %10724 = vmatprep.subr.bf16.mxu1 %v11169_v1 }
 0xd37   : > { %10038 = vmatmul.mubr.msk.f32.gmra.mrb[32].mxu1 %vm3874_vm4, %v8999_v9  ;;  %v7699_v9 = vmul.f32 %v13156_v5, %v13156_v5 }
 0xd38   : > { %10726 = vmatpush1.bf16.msk.msra.mxu1 %vm10725_vm13, %v11172_v30  ;;  %10040 = vmatprep.mubr.msk.f32.mxu1 %vm3874_vm4, %v9000_v14  ;;  %vm5850_vm13 = vcmp.eq.s32.totalorder %v11981_v23, %v12987_v52  ;;  %v13171_v14 = vld [vmem:[%s11311_s12 + $0x20] sm:$0xff] }
 0xd39   : > { %10727 = vmatprep.subr.bf16.mxu1 %v11169_v1  ;;  %vm10737_vm14 = vmpackc.low %vm5850_vm13, %vm5849_vm12  ;;  %vm5857_vm12 = vcmp.eq.s32.totalorder %v11904_v36, %v12987_v52  ;;  %vm5858_vm13 = vcmp.eq.s32.totalorder %v12023_v35, %v12987_v52 }
 0xd3b   : > { %10041 = vmatmul.mubr.msk.f32.gmra.mrb[34].mxu1 %vm3874_vm4, %v9001_v17  ;;  %v8051_v17 = vmul.f32 %v13171_v14, %v13171_v14 }
 0xd3c   : > { %10729 = vmatpush1.bf16.msk.msra.mxu1 %vm10728_vm2, %v11172_v30  ;;  %9112 = vmatprep.mubr.msk.f32.mxu1 %vm3637_vm9, %v12148_v51  ;;  %vm10740_vm2 = vmpackc.low %vm5852_vm1, %vm5851_vm15  ;;  %vm5859_vm15 = vcmp.eq.s32.totalorder %v12032_v37, %v12987_v52  ;;  %vm5860_vm1 = vcmp.eq.s32.totalorder %v12035_v38, %v12987_v52 }
 0xd3d   : > { %10730 = vmatprep.subr.bf16.mxu1 %v11169_v1 }
 0xd40   : > { %10732 = vmatpush1.bf16.msk.msra.mxu1 %vm10731_vm8, %v11172_v30  ;;  %vm10743_vm8 = vmpackc.low %vm5854_vm5, %vm5853_vm3  ;;  %vm5861_vm3 = vcmp.eq.s32.totalorder %v12120_v45, %v12987_v52  ;;  %vm5862_vm5 = vcmp.eq.s32.totalorder %v12123_v48, %v12987_v52 }
 0xd41   : > { %10733 = vmatprep.subr.bf16.mxu1 %v11169_v1 }
 0xd44   : > { %10735 = vmatpush1.bf16.msk.msra.mxu1 %vm10734_vm0, %v11172_v30  ;;  %vm10746_vm0 = vmpackc.low %vm5856_vm11, %vm5855_vm7  ;;  %vm5819_vm7 = vcmp.eq.s32.totalorder %v11321_v3, %v13085_v43  ;;  %vm6970_vm11 = vcmp.ge.s32.totalorder %v11333_v10, %v11336_v11  ;;  %v13118_v11 = vld [vmem:[%s11311_s12] sm:$0xff] }
 0xd45   : > { %10736 = vmatprep.subr.bf16.mxu1 %v11169_v1  ;;  %v9058_v46 = vsel %vm5819_vm7, 1.0, %v11171_v2  ;;  %v7345_v56 = vmul.f32 %v13118_v11, %v13118_v11  ;;  %vm5821_vm7 = vcmp.eq.s32.totalorder %v11796_v60, %v13085_v43 }
 0xd47   : > { %v10873_v40 = vpack.c.bf16 %v7346_v19, %v7345_v56 }
 0xd48   : > { %10738 = vmatpush1.bf16.msk.msra.mxu1 %vm10737_vm14, %v11172_v30  ;;  %vm10749_vm14 = vmpackc.low %vm5858_vm13, %vm5857_vm12  ;;  %vm7150_vm12 = vcmp.le.s32.totalorder %v7148_v16, 1  ;;  %v9060_v16 = vsel %vm5821_vm7, 1.0, %v11171_v2 }
 0xd49   : > { %10739 = vmatprep.subr.bf16.mxu1 %v11169_v1 }
 0xd4c   : > { %10741 = vmatpush1.bf16.msk.msra.mxu1 %vm10740_vm2, %v11172_v30  ;;  %vm10752_vm2 = vmpackc.low %vm5860_vm1, %vm5859_vm15  ;;  %vm13113_vm15 = vcmp.le.s32.totalorder %v7149_v53, 1  ;;  %vm6973_vm1 = vcmp.lt.s32.totalorder %v11333_v10, %v6972_v24 }
 0xd4d   : > { %10742 = vmatprep.subr.bf16.mxu1 %v11169_v1 }
 0xd50   : > { %10744 = vmatpush1.bf16.msk.msra.mxu1 %vm10743_vm8, %v11172_v30  ;;  %vm10755_vm8 = vmpackc.low %vm5862_vm5, %vm5861_vm3 }
 0xd51   : > { %10745 = vmatprep.subr.bf16.mxu1 %v11169_v1  ;;  %vm6974_vm3 = vmand %vm6970_vm11, %vm6973_vm1  ;;  %vm5822_vm11 = vcmp.eq.s32.totalorder %v11799_v61, %v13085_v43 }
 0xd52   : > { %v9308_v59 = vsel %vm6974_vm3, 1.0, %v11171_v2  ;;  %v9061_v53 = vsel %vm5822_vm11, 1.0, %v11171_v2 }
 0xd53   : > { %10092 = vmatprep.subr.msk.mxu0 %vm3893_vm10, %v9308_v59 }
 0xd54   : > { %10747 = vmatpush1.bf16.msk.msra.mxu1 %vm10746_vm0, %v11172_v30  ;;  %vm13103_vm0 = vcmp.le.s32.totalorder %v7144_v49, 1  ;;  %10093 = vmatpush3.msk.msra.mxu0 %vm3893_vm10, %v9308_v59 }
 0xd55   : > { %10748 = vmatprep.subr.bf16.mxu1 %v11169_v1  ;;  %vm7152_vm13 = vmand %vm13103_vm0, %vm7150_vm12  ;;  %10095 = vmatmul.mubr.msk.f32.vlgmr.msra.gmra.mrb[36].mxu0 %vm3874_vm4, %v10091_v26  ;;  %vm5823_vm0 = vcmp.eq.s32.totalorder %v11804_v6, %v13085_v43  ;;  %vm5824_vm12 = vcmp.eq.s32.totalorder %v11807_v7, %v13085_v43 }
 0xd56   : > { %v13139_v52 = vsel %vm7152_vm13, 1.0, %v11171_v2  ;;  %10866 = vmatprep.subr.bf16.mxu0 %v11340_v13  ;;  %v9062_v24 = vsel %vm5823_vm0, 1.0, %v11171_v2  ;;  %vm6108_vm0 = vcmp.eq.s32.totalorder %v11804_v6, %v6103_v39 }
 0xd57   : > { %10868 = vmatpush3.bf16.msra.mxu0 %v11340_v13  ;;  %10101 = vmatprep.mubr.msk.f32.mxu0 %vm552_vm6, %v13139_v52  ;;  %v10889_v13 = vpack.c.bf16 %v7699_v9, %v7698_v0  ;;  %v9124_v56 = vsel %vm6108_vm0, 1.0, %v11171_v2 }
 0xd58   : > { %10750 = vmatpush1.bf16.msk.msra.mxu1 %vm10749_vm14, %v11172_v30  ;;  %vm13109_vm14 = vcmp.le.s32.totalorder %v7145_v21, 1  ;;  %10874 = vmatprep.subr.bf16.mxu0 %v10873_v40  ;;  %v6407_v21 = vadd.s32 40, %v11936_v15 }
 0xd59   : > { %10751 = vmatprep.subr.bf16.mxu1 %v11169_v1 }
 0xd5a   : > { %v13223_v15 = vadd.s32 %v6407_v21, %v11934_v12 }
 0xd5c   : > { %10753 = vmatpush1.bf16.msk.msra.mxu1 %vm10752_vm2, %v11172_v30  ;;  %vm7153_vm2 = vmand %vm13109_vm14, %vm13113_vm15  ;;  %vm6105_vm14 = vcmp.eq.s32.totalorder %v11326_v4, %v6103_v39  ;;  %vm6409_vm15 = vcmp.eq.s32.totalorder %v11321_v3, %v13223_v15  ;;  %vm6410_vm1 = vcmp.eq.s32.totalorder %v11326_v4, %v13223_v15  ;;  %vm6411_vm7 = vcmp.eq.s32.totalorder %v11796_v60, %v13223_v15 }
 0xd5d   : > { %10754 = vmatprep.subr.bf16.mxu1 %v11169_v1  ;;  %vm13133_vm5 = vmpackc.low %vm7153_vm2, %vm7152_vm13  ;;  %v13148_v10 = vsel %vm7153_vm2, 1.0, %v11171_v2  ;;  %vm6104_vm13 = vcmp.eq.s32.totalorder %v11321_v3, %v6103_v39  ;;  %vm6106_vm2 = vcmp.eq.s32.totalorder %v11796_v60, %v6103_v39  ;;  %v9121_v12 = vsel %vm6105_vm14, 1.0, %v11171_v2 }
 0xd5e   : > { %10102 = vmatmul.mubr.msk.f32.vlgmr.msra.gmra.mrb[38].mxu0 %vm552_vm6, %v13148_v10  ;;  %v9120_v54 = vsel %vm6104_vm13, 1.0, %v11171_v2  ;;  %vm10794_vm3 = vmpackc.low %vm6410_vm1, %vm6409_vm15  ;;  %v9122_v8 = vsel %vm6106_vm2, 1.0, %v11171_v2  ;;  %vm6412_vm11 = vcmp.eq.s32.totalorder %v11799_v61, %v13223_v15  ;;  %vm6109_vm13 = vcmp.eq.s32.totalorder %v11807_v7, %v6103_v39 }
 0xd5f   : > { %10876 = vmatpush3.bf16.msra.mxu0 %v10873_v40  ;;  %10115 = vmatprep.mubr.msk.f32.mxu0 %vm552_vm6, %v13139_v52  ;;  %vm6413_vm14 = vcmp.eq.s32.totalorder %v11804_v6, %v13223_v15  ;;  %vm6414_vm15 = vcmp.eq.s32.totalorder %v11807_v7, %v13223_v15  ;;  %v9125_v19 = vsel %vm6109_vm13, 1.0, %v11171_v2  ;;  %vm6415_vm2 = vcmp.eq.s32.totalorder %v11792_v58, %v13223_v15 }
 0xd60   : > { %10756 = vmatpush1.bf16.msk.msra.mxu1 %vm10755_vm8, %v11172_v30  ;;  %10882 = vmatprep.subr.bf16.mxu0 %v11352_v18  ;;  %vm5820_vm8 = vcmp.eq.s32.totalorder %v11326_v4, %v13085_v43  ;;  %vm10800_vm1 = vmpackc.low %vm6414_vm15, %vm6413_vm14  ;;  %vm6421_vm14 = vcmp.eq.s32.totalorder %v11834_v34, %v13223_v15  ;;  %vm6422_vm15 = vcmp.eq.s32.totalorder %v11990_v25, %v13223_v15  ;;  %v6388_v58 = vadd.s32 2, %v13085_v43 }
 0xd61   : > { %v9059_v28 = vsel %vm5820_vm8, 1.0, %v11171_v2  ;;  %vm6107_vm8 = vcmp.eq.s32.totalorder %v11799_v61, %v6103_v39 }
 0xd62   : > { %10116 = vmatmul.mubr.msk.f32.vlgmr.msra.gmra.mrb[40].mxu0 %vm552_vm6, %v13148_v10  ;;  %v9123_v55 = vsel %vm6107_vm8, 1.0, %v11171_v2 }
 0xd63   : > { %5976 = vmatmul.mubr.f32.vlgmr.msra.gmra.mrb[40].mxu1 %v12145_v50  ;;  %10884 = vmatpush3.bf16.msra.mxu0 %v11352_v18 }
 0xd64   : > { %10045 = vmatprep.mubr.msk.f32.mxu1 %vm3874_vm4, %v9058_v46  ;;  %10129 = vmatprep.mubr.msk.f32.mxu0 %vm552_vm6, %v13139_v52  ;;  %v13176_v46 = vld [vmem:[%s11311_s12 + $0x28] sm:$0xff] }
 0xd65   : > { %10890 = vmatprep.subr.bf16.mxu0 %v10889_v13  ;;  %v8052_v26 = vmul.f32 %v13176_v46, %v13176_v46 }
 0xd66   : > { %10130 = vmatmul.mubr.msk.f32.vlgmr.msra.gmra.mrb[42].mxu0 %vm552_vm6, %v13148_v10 }
 0xd67   : > { %10892 = vmatpush3.bf16.msra.mxu0 %v10889_v13  ;;  %10143 = vmatprep.mubr.msk.f32.mxu0 %vm552_vm6, %v13139_v52  ;;  %v10905_v18 = vpack.c.bf16 %v8052_v26, %v8051_v17 }
 0xd68   : > { %10898 = vmatprep.subr.bf16.mxu0 %v11368_v27 }
 0xd6a   : > { %10144 = vmatmul.mubr.msk.f32.vlgmr.msra.gmra.mrb[44].mxu0 %vm552_vm6, %v13148_v10 }
 0xd6b   : > { %10900 = vmatpush3.bf16.msra.mxu0 %v11368_v27  ;;  %10157 = vmatprep.mubr.msk.f32.mxu0 %vm552_vm6, %v13139_v52 }
 0xd6c   : > { %10906 = vmatprep.subr.bf16.mxu0 %v10905_v18 }
 0xd6e   : > { %10158 = vmatmul.mubr.msk.f32.vlgmr.msra.gmra.mrb[46].mxu0 %vm552_vm6, %v13148_v10 }
 0xd6f   : > { %10908 = vmatpush3.bf16.msra.mxu0 %v10905_v18  ;;  %10171 = vmatprep.mubr.msk.f32.mxu0 %vm552_vm6, %v13139_v52 }
 0xd72   : > { %10172 = vmatmul.mubr.msk.f32.vlgmr.msra.gmra.mrb[48].mxu0 %vm552_vm6, %v13148_v10 }
 0xe36   : > { %v5977_v27 = vpop.f32.mrb[40].mxu1 }
 0xe37   : > { %v5979_v49 = vpop.f32.mrb[41].mxu1  ;;  %10043 = vmatprep.subr.msk.mxu1 %vm3893_vm10, %v5977_v27 }
 0xe38   : > { %10044 = vmatpush3.msk.msra.mxu1 %vm3893_vm10, %v5977_v27 }
 0xe39   : > { %10046 = vmatmul.mubr.msk.f32.vlgmr.msra.gmra.mrb[30].mxu1 %vm3874_vm4, %v9059_v28  ;;  %10054 = vmatprep.subr.msk.mxu1 %vm3893_vm10, %v12798_v44 }
 0xe3a   : > { %10055 = vmatpush3.msk.msra.mxu1 %vm3893_vm10, %v12798_v44  ;;  %10048 = vmatprep.mubr.msk.f32.mxu1 %vm3874_vm4, %v9060_v16  ;;  %v9063_v44 = vsel %vm5824_vm12, 1.0, %v11171_v2  ;;  %vm10797_vm12 = vmpackc.low %vm6412_vm11, %vm6411_vm7  ;;  %vm6417_vm7 = vcmp.eq.s32.totalorder %v11966_v42, %v13223_v15  ;;  %vm6418_vm11 = vcmp.eq.s32.totalorder %v11969_v20, %v13223_v15 }
 0xe3b   : > { %10793 = vmatprep.subr.bf16.mxu1 %v11169_v1  ;;  %vm10806_vm0 = vmpackc.low %vm6418_vm11, %vm6417_vm7  ;;  %vm6425_vm7 = vcmp.eq.s32.totalorder %v12011_v32, %v13223_v15  ;;  %vm6426_vm11 = vcmp.eq.s32.totalorder %v12014_v33, %v13223_v15 }
 0xe3d   : > { %10049 = vmatmul.mubr.msk.f32.gmra.mrb[32].mxu1 %vm3874_vm4, %v9061_v53 }
 0xe3e   : > { %10051 = vmatprep.mubr.msk.f32.mxu1 %vm3874_vm4, %v9062_v24 }
 0xe41   : > { %10052 = vmatmul.mubr.msk.f32.gmra.mrb[34].mxu1 %vm3874_vm4, %v9063_v44 }
 0xe42   : > { %10056 = vmatprep.mubr.msk.f32.mxu1 %vm3874_vm4, %v9120_v54 }
 0xe45   : > { %10057 = vmatmul.mubr.msk.f32.vlgmr.msra.gmra.mrb[30].mxu1 %vm3874_vm4, %v9121_v12 }
 0xe46   : > { %10795 = vmatpush1.bf16.msk.msra.mxu1 %vm10794_vm3, %v11172_v30  ;;  %10059 = vmatprep.mubr.msk.f32.mxu1 %vm3874_vm4, %v9122_v8  ;;  %vm6416_vm3 = vcmp.eq.s32.totalorder %v11957_v41, %v13223_v15 }
 0xe47   : > { %10796 = vmatprep.subr.bf16.mxu1 %v11169_v1  ;;  %vm10803_vm8 = vmpackc.low %vm6416_vm3, %vm6415_vm2  ;;  %vm6423_vm2 = vcmp.eq.s32.totalorder %v11999_v29, %v13223_v15  ;;  %vm6424_vm3 = vcmp.eq.s32.totalorder %v12002_v31, %v13223_v15 }
 0xe49   : > { %10060 = vmatmul.mubr.msk.f32.gmra.mrb[32].mxu1 %vm3874_vm4, %v9123_v55 }
 0xe4a   : > { %10798 = vmatpush1.bf16.msk.msra.mxu1 %vm10797_vm12, %v11172_v30  ;;  %10062 = vmatprep.mubr.msk.f32.mxu1 %vm3874_vm4, %v9124_v56  ;;  %vm6419_vm12 = vcmp.eq.s32.totalorder %v11978_v22, %v13223_v15 }
 0xe4b   : > { %10799 = vmatprep.subr.bf16.mxu1 %v11169_v1 }
 0xe4d   : > { %10063 = vmatmul.mubr.msk.f32.gmra.mrb[34].mxu1 %vm3874_vm4, %v9125_v19 }
 0xe4e   : > { %10801 = vmatpush1.bf16.msk.msra.mxu1 %vm10800_vm1, %v11172_v30  ;;  %9236 = vmatprep.mubr.msk.f32.mxu1 %vm3637_vm9, %v12148_v51  ;;  %vm6420_vm9 = vcmp.eq.s32.totalorder %v11981_v23, %v13223_v15  ;;  %vm10812_vm1 = vmpackc.low %vm6422_vm15, %vm6421_vm14  ;;  %vm6429_vm14 = vcmp.eq.s32.totalorder %v12032_v37, %v13223_v15  ;;  %vm6430_vm15 = vcmp.eq.s32.totalorder %v12035_v38, %v13223_v15  ;;  %v7158_v51 = vsel %vm552_vm6, %v13139_v52, 0.0 }
 0xe4f   : > { %10802 = vmatprep.subr.bf16.mxu1 %v11169_v1  ;;  %vm10809_vm13 = vmpackc.low %vm6420_vm9, %vm6419_vm12  ;;  %vm6427_vm12 = vcmp.eq.s32.totalorder %v11904_v36, %v13223_v15  ;;  %vm6428_vm9 = vcmp.eq.s32.totalorder %v12023_v35, %v13223_v15  ;;  %v13324_v36 = vpop.f32.mrb[36].mxu0  ;;  %7159 = vadd.xlane.f32.xlu1 %v7158_v51  ;;  %v6673_v52 = vadd.s32 3, %v13085_v43 }
 0xe50   : > { %v13326_v41 = vpop.f32.mrb[37].mxu0  ;;  %v8249_v42 = vsel %vm552_vm6, %v13324_v36, 0.0 }
 0xe51   : > { %v10103_v22 = vpop.f32.mrb[38].mxu0 }
 0xe52   : > { %10804 = vmatpush1.bf16.msk.msra.mxu1 %vm10803_vm8, %v11172_v30  ;;  %vm10815_vm8 = vmpackc.low %vm6424_vm3, %vm6423_vm2  ;;  %vm6431_vm2 = vcmp.eq.s32.totalorder %v12120_v45, %v13223_v15  ;;  %vm6432_vm3 = vcmp.eq.s32.totalorder %v12123_v48, %v13223_v15  ;;  %v7255_v23 = vpop.f32.mrb[39].mxu0 }
 0xe53   : > { %10805 = vmatprep.subr.bf16.mxu1 %v11169_v1  ;;  %v13334_v25 = vpop.f32.mrb[40].mxu0 }
 0xe54   : > { %v7413_v29 = vpop.f32.mrb[41].mxu0 }
 0xe55   : > { %v13336_v31 = vpop.f32.mrb[42].mxu0 }
 0xe56   : > { %10807 = vmatpush1.bf16.msk.msra.mxu1 %vm10806_vm0, %v11172_v30  ;;  %vm10818_vm0 = vmpackc.low %vm6426_vm11, %vm6425_vm7  ;;  %vm6389_vm7 = vcmp.eq.s32.totalorder %v11321_v3, %v6388_v58  ;;  %v7608_v32 = vpop.f32.mrb[43].mxu0  ;;  %vm6390_vm11 = vcmp.eq.s32.totalorder %v11326_v4, %v6388_v58 }
 0xe57   : > { %10808 = vmatprep.subr.bf16.mxu1 %v11169_v1  ;;  %v9182_v34 = vsel %vm6389_vm7, 1.0, %v11171_v2  ;;  %v13338_v33 = vpop.f32.mrb[44].mxu0  ;;  %v9183_v0 = vsel %vm6390_vm11, 1.0, %v11171_v2 }
 0xe58   : > { %v13340_v35 = vpop.f32.mrb[45].mxu0 }
 0xe59   : > { %v13342_v37 = vpop.f32.mrb[46].mxu0 }
 0xe5a   : > { %10810 = vmatpush1.bf16.msk.msra.mxu1 %vm10809_vm13, %v11172_v30  ;;  %vm10821_vm13 = vmpackc.low %vm6428_vm9, %vm6427_vm12  ;;  %v13344_v38 = vpop.f32.mrb[47].mxu0  ;;  %vm6392_vm12 = vcmp.eq.s32.totalorder %v11799_v61, %v6388_v58  ;;  %vm6393_vm9 = vcmp.eq.s32.totalorder %v11804_v6, %v6388_v58 }
 0xe5b   : > { %10811 = vmatprep.subr.bf16.mxu1 %v11169_v1  ;;  %v13346_v45 = vpop.f32.mrb[48].mxu0  ;;  %v9186_v17 = vsel %vm6393_vm9, 1.0, %v11171_v2 }
 0xe5c   : > { %v13348_v48 = vpop.f32.mrb[49].mxu0 }
 0xe5e   : > { %10813 = vmatpush1.bf16.msk.msra.mxu1 %vm10812_vm1, %v11172_v30  ;;  %vm10824_vm1 = vmpackc.low %vm6430_vm15, %vm6429_vm14  ;;  %vm6674_vm14 = vcmp.eq.s32.totalorder %v11321_v3, %v6673_v52  ;;  %vm6676_vm15 = vcmp.eq.s32.totalorder %v11796_v60, %v6673_v52 }
 0xe5f   : > { %10814 = vmatprep.subr.bf16.mxu1 %v11169_v1  ;;  %v9244_v43 = vsel %vm6674_vm14, 1.0, %v11171_v2  ;;  %v9246_v3 = vsel %vm6676_vm15, 1.0, %v11171_v2 }
 0xe62   : > { %10816 = vmatpush1.bf16.msk.msra.mxu1 %vm10815_vm8, %v11172_v30  ;;  %vm10827_vm8 = vmpackc.low %vm6432_vm3, %vm6431_vm2  ;;  %vm6678_vm2 = vcmp.eq.s32.totalorder %v11804_v6, %v6673_v52  ;;  %vm6679_vm3 = vcmp.eq.s32.totalorder %v11807_v7, %v6673_v52 }
 0xe63   : > { %10817 = vmatprep.subr.bf16.mxu1 %v11169_v1 }
 0xe66   : > { %10819 = vmatpush1.bf16.msk.msra.mxu1 %vm10818_vm0, %v11172_v30  ;;  %vm6391_vm0 = vcmp.eq.s32.totalorder %v11796_v60, %v6388_v58  ;;  %v9248_v60 = vsel %vm6678_vm2, 1.0, %v11171_v2 }
 0xe67   : > { %10820 = vmatprep.subr.bf16.mxu1 %v11169_v1  ;;  %v9184_v13 = vsel %vm6391_vm0, 1.0, %v11171_v2 }
 0xe6a   : > { %10822 = vmatpush1.bf16.msk.msra.mxu1 %vm10821_vm13, %v11172_v30  ;;  %vm6394_vm13 = vcmp.eq.s32.totalorder %v11807_v7, %v6388_v58 }
 0xe6b   : > { %10823 = vmatprep.subr.bf16.mxu1 %v11169_v1 }
 0xe6e   : > { %10825 = vmatpush1.bf16.msk.msra.mxu1 %vm10824_vm1, %v11172_v30  ;;  %vm6677_vm1 = vcmp.eq.s32.totalorder %v11799_v61, %v6673_v52  ;;  %v9249_v61 = vsel %vm6679_vm3, 1.0, %v11171_v2 }
 0xe6f   : > { %10826 = vmatprep.subr.bf16.mxu1 %v11169_v1  ;;  %v8248_v1 = vsel %vm552_vm6, %v13326_v41, 0.0 }
 0xe70   : > { %v13332_v20 = vadd.f32 %v8249_v42, %v8248_v1 }
 0xe72   : > { %10828 = vmatpush1.bf16.msk.msra.mxu1 %vm10827_vm8, %v11172_v30 }
 0xe75   : > { %6546 = vmatmul.mubr.f32.vlgmr.msra.gmra.mrb[42].mxu1 %v12145_v50  ;;  %v7161_v50 = vsel %vm552_vm6, %v13148_v10, 0.0  ;;  %v9185_v10 = vsel %vm6392_vm12, 1.0, %v11171_v2 }
 0xe76   : > { %10067 = vmatprep.mubr.msk.f32.mxu1 %vm3874_vm4, %v9182_v34  ;;  %7162 = vadd.xlane.f32.xlu0 %v7161_v50  ;;  %v13354_v59 = vadd.f32 %v7161_v50, %v7158_v51 }
 0xedc   : > { %v7160_v16 = vpop.xlane.xlu1 %7159 }
 0xf03   : > { %v7163_v49 = vpop.xlane.xlu0 %7162 }
 0xf48   : > { %v6547_v40 = vpop.f32.mrb[42].mxu1 }
 0xf49   : > { %v6549_v9 = vpop.f32.mrb[43].mxu1  ;;  %10065 = vmatprep.subr.msk.mxu1 %vm3893_vm10, %v6547_v40 }
 0xf4a   : > { %10066 = vmatpush3.msk.msra.mxu1 %vm3893_vm10, %v6547_v40 }
 0xf4b   : > { %10068 = vmatmul.mubr.msk.f32.vlgmr.msra.gmra.mrb[30].mxu1 %vm3874_vm4, %v9183_v0  ;;  %10076 = vmatprep.subr.msk.mxu1 %vm3893_vm10, %v12800_v47 }
 0xf4c   : > { %10077 = vmatpush3.msk.msra.mxu1 %vm3893_vm10, %v12800_v47  ;;  %10070 = vmatprep.mubr.msk.f32.mxu1 %vm3874_vm4, %v9184_v13  ;;  %v9187_v47 = vsel %vm6394_vm13, 1.0, %v11171_v2  ;;  %vm6675_vm10 = vcmp.eq.s32.totalorder %v11326_v4, %v6673_v52  ;;  %v9247_v4 = vsel %vm6677_vm1, 1.0, %v11171_v2 }
 0xf4d   : > { %10870 = vmatprep.subr.msk.bf16.mxu1 %vm13133_vm5, %v11172_v30  ;;  %v9245_v26 = vsel %vm6675_vm10, 1.0, %v11171_v2  ;;  %v7165_v2 = vrot.slane %v13354_v59, 4 }
 0xf4f   : > { %10071 = vmatmul.mubr.msk.f32.gmra.mrb[32].mxu1 %vm3874_vm4, %v9185_v10  ;;  %v7166_v6 = vadd.f32 %v7165_v2, %v13354_v59 }
 0xf50   : > { %10073 = vmatprep.mubr.msk.f32.mxu1 %vm3874_vm4, %v9186_v17 }
 0xf51   : > { %v7167_v7 = vrot.slane %v7166_v6, 2 }
 0xf53   : > { %10074 = vmatmul.mubr.msk.f32.gmra.mrb[34].mxu1 %vm3874_vm4, %v9187_v47  ;;  %v7168_v18 = vadd.f32 %v7167_v7, %v7166_v6 }
 0xf54   : > { %10078 = vmatprep.mubr.msk.f32.mxu1 %vm3874_vm4, %v9244_v43 }
 0xf55   : > { %v7169_v27 = vrot.slane %v7168_v18, 1 }
 0xf57   : > { %10079 = vmatmul.mubr.msk.f32.vlgmr.msra.gmra.mrb[30].mxu1 %vm3874_vm4, %v9245_v26  ;;  %v7170_v28 = vadd.f32 %v7169_v27, %v7168_v18 }
 0xf58   : > { %10081 = vmatprep.mubr.msk.f32.mxu1 %vm3874_vm4, %v9246_v3  ;;  %10872 = vmatpush3.bf16.msk.msra.mxu1 %vm13133_vm5, %v11172_v30 }
 0xf59   : > { %10878 = vmatprep.subr.msk.bf16.mxu1 %vm13133_vm5, %v11172_v30  ;;  %v7172_v39 = vmul.f32 %v7170_v28, %v7163_v49  ;;  %v7171_v21 = vmul.f32 %v7170_v28, %v7160_v16 }
 0xf5b   : > { %10082 = vmatmul.mubr.msk.f32.gmra.mrb[32].mxu1 %vm3874_vm4, %v9247_v4  ;;  %11073 = vrcp.f32 %v7172_v39  ;;  %v9318_v53 = vadd.f32 -1.0, %v7172_v39  ;;  %v9317_v24 = vadd.f32 -1.0, %v7171_v21 }
 0xf5c   : > { %10084 = vmatprep.mubr.msk.f32.mxu1 %vm3874_vm4, %v9248_v60  ;;  %11075 = vrcp.f32 %v7171_v21 }
 0xf5d   : > { %11077 = vrcp.f32 %v9318_v53 }
 0xf5e   : > { %11079 = vrcp.f32 %v9317_v24 }
 0xf5f   : > { %10085 = vmatmul.mubr.msk.f32.gmra.mrb[34].mxu1 %vm3874_vm4, %v9249_v61 }
 0xf60   : > { %10108 = vmatprep.mubr.msk.f32.mxu1 %vm552_vm6, %v7255_v23 }
 0xf63   : > { %10109 = vmatmul.mubr.msk.f32.vlgmr.msra.gmra.mrb[44].mxu1 %vm552_vm6, %v10103_v22 }
 0xf64   : > { %10880 = vmatpush3.bf16.msk.msra.mxu1 %vm13133_vm5, %v11172_v30  ;;  %10122 = vmatprep.mubr.msk.f32.mxu1 %vm552_vm6, %v7413_v29 }
 0xf65   : > { %10886 = vmatprep.subr.msk.bf16.mxu1 %vm13133_vm5, %v11172_v30  ;;  %v11074_v8 = vpop.eup %11073 }
 0xf66   : > { %v11076_v55 = vpop.eup %11075 }
 0xf67   : > { %10123 = vmatmul.mubr.msk.f32.vlgmr.msra.gmra.mrb[46].mxu1 %vm552_vm6, %v13334_v25  ;;  %v11078_v1 = vpop.eup %11077 }
 0xf68   : > { %10888 = vmatpush3.bf16.msk.msra.mxu1 %vm13133_vm5, %v11172_v30  ;;  %10136 = vmatprep.mubr.msk.f32.mxu1 %vm552_vm6, %v7608_v32  ;;  %v11080_v22 = vpop.eup %11079 }
 0xf69   : > { %10894 = vmatprep.subr.msk.bf16.mxu1 %vm13133_vm5, %v11172_v30 }
 0xf6b   : > { %10137 = vmatmul.mubr.msk.f32.vlgmr.msra.gmra.mrb[48].mxu1 %vm552_vm6, %v13336_v31 }
 0xf6c   : > { %10896 = vmatpush3.bf16.msk.msra.mxu1 %vm13133_vm5, %v11172_v30  ;;  %10150 = vmatprep.mubr.msk.f32.mxu1 %vm552_vm6, %v13340_v35 }
 0xf6d   : > { %10902 = vmatprep.subr.msk.bf16.mxu1 %vm13133_vm5, %v11172_v30 }
 0xf6f   : > { %10151 = vmatmul.mubr.msk.f32.vlgmr.msra.gmra.mrb[50].mxu1 %vm552_vm6, %v13338_v33  ;;  %v7182_v33 = vmul.f32 %v11078_v1, %v7172_v39 }
 0xf70   : > { %10904 = vmatpush3.bf16.msk.msra.mxu1 %vm13133_vm5, %v11172_v30  ;;  %10164 = vmatprep.mubr.msk.f32.mxu1 %vm552_vm6, %v13344_v38 }
 0xf71   : > { %10910 = vmatprep.subr.msk.bf16.mxu1 %vm13133_vm5, %v11172_v30 }
 0xf73   : > { %10165 = vmatmul.mubr.msk.f32.vlgmr.msra.gmra.mrb[52].mxu1 %vm552_vm6, %v13342_v37  ;;  %v7180_v37 = vmul.f32 %v11080_v22, %v7171_v21 }
 0xf74   : > { %10912 = vmatpush3.bf16.msk.msra.mxu1 %vm13133_vm5, %v11172_v30  ;;  %10178 = vmatprep.mubr.msk.f32.mxu1 %vm552_vm6, %v13348_v48 }
 0xf77   : > { %10179 = vmatmul.mubr.msk.f32.vlgmr.msra.gmra.mrb[54].mxu1 %vm552_vm6, %v13346_v45 }
0x102a   : > { %v13454_v62 = vpop.f32.mrb[30].mxu1 }
0x102b   : > { %v13456_v30 = vpop.f32.mrb[31].mxu1 }
0x102e   : > { %v13458_v15 = vpop.f32.mrb[32].mxu1 }
0x102f   : > { %v13460_v44 = vpop.f32.mrb[33].mxu1 }
0x1032   : > { %v13462_v54 = vpop.f32.mrb[34].mxu1 }
0x1033   : > { %v13464_v12 = vpop.f32.mrb[35].mxu1 }
0x1036   : > { %v10110_v56 = vpop.f32.mrb[44].mxu1 }
0x1037   : > { %v7504_v19 = vmul.f32 %v11074_v8, %v10110_v56  ;;  %v7336_v58 = vpop.f32.mrb[45].mxu1 }
0x1038   : > { %v7503_v34 = vmul.f32 %v11076_v55, %v7336_v58 }
0x1039   : > { %v7508_v23 = vmul.f32 %v7504_v19, %v7504_v19  ;;  %v7516_v22 = vsub.f32 %v13123_v57, %v7504_v19 }
0x103a   : > { %v10124_v42 = vpop.f32.mrb[46].mxu1  ;;  %v7507_v31 = vmul.f32 %v7503_v34, %v7503_v34 }
0x103b   : > { %v7506_v25 = vmul.f32 %v11074_v8, %v10124_v42  ;;  %v7494_v29 = vpop.f32.mrb[47].mxu1 }
0x103c   : > { %v7505_v32 = vmul.f32 %v11076_v55, %v7494_v29  ;;  %v7515_v29 = vsub.f32 %v13118_v11, %v7503_v34 }
0x103d   : > { %v7510_v35 = vsub.f32 %v7506_v25, %v7508_v23 }
0x103e   : > { %v7509_v38 = vsub.f32 %v7505_v32, %v7507_v31  ;;  %v10138_v45 = vpop.f32.mrb[48].mxu1 }
0x103f   : > { %v7512_v48 = vmul.f32 %v7510_v35, %v7182_v33  ;;  %v13466_v50 = vmul.f32 %v11074_v8, %v10138_v45  ;;  %v7689_v51 = vpop.f32.mrb[49].mxu1 }
0x1040   : > { %v7511_v59 = vmul.f32 %v7509_v38, %v7180_v37  ;;  %v13468_v40 = vmul.f32 %v11076_v55, %v7689_v51 }
0x1041   : > { %v7514_v0 = vmax.f32 %v7512_v48, 0.0  ;;  %v7861_v10 = vmul.f32 %v13466_v50, %v13466_v50  ;;  %v7869_v19 = vsub.f32 %v13156_v5, %v13466_v50 }
0x1042   : > { %v7513_v9 = vmax.f32 %v7511_v59, 0.0  ;;  %v10152_v13 = vpop.f32.mrb[50].mxu1  ;;  %v7860_v26 = vmul.f32 %v13468_v40, %v13468_v40 }
0x1043   : > { %v7518_v52 = vadd.f32 1e-06, %v7514_v0  ;;  %v7859_v17 = vmul.f32 %v11074_v8, %v10152_v13  ;;  %v7847_v47 = vpop.f32.mrb[51].mxu1 }
0x1044   : > { %v7517_v43 = vadd.f32 1e-06, %v7513_v9  ;;  %v7858_v3 = vmul.f32 %v11076_v55, %v7847_v47 }
0x1045   : > { %11081 = vrsqrt.f32 %v7518_v52  ;;  %v7863_v4 = vsub.f32 %v7859_v17, %v7861_v10 }
0x1046   : > { %11083 = vrsqrt.f32 %v7517_v43  ;;  %v7862_v60 = vsub.f32 %v7858_v3, %v7860_v26  ;;  %v10166_v61 = vpop.f32.mrb[52].mxu1 }
0x1047   : > { %v7865_v2 = vmul.f32 %v7863_v4, %v7182_v33  ;;  %v8210_v6 = vmul.f32 %v11074_v8, %v10166_v61  ;;  %v8042_v7 = vpop.f32.mrb[53].mxu1 }
0x1048   : > { %v7864_v18 = vmul.f32 %v7862_v60, %v7180_v37  ;;  %v8209_v27 = vmul.f32 %v11076_v55, %v8042_v7 }
0x1049   : > { %v7867_v28 = vmax.f32 %v7865_v2, 0.0  ;;  %v8214_v21 = vmul.f32 %v8210_v6, %v8210_v6  ;;  %v8222_v26 = vsub.f32 %v13176_v46, %v8210_v6 }
0x104a   : > { %v7866_v49 = vmax.f32 %v7864_v18, 0.0  ;;  %v10180_v16 = vpop.f32.mrb[54].mxu1  ;;  %v8213_v58 = vmul.f32 %v8209_v27, %v8209_v27  ;;  %v8221_v3 = vsub.f32 %v13171_v14, %v8209_v27 }
0x104b   : > { %v7871_v39 = vadd.f32 1e-06, %v7867_v28  ;;  %v8212_v53 = vmul.f32 %v11074_v8, %v10180_v16  ;;  %v8200_v24 = vpop.f32.mrb[55].mxu1 }
0x104c   : > { %v7870_v56 = vadd.f32 1e-06, %v7866_v49  ;;  %v8211_v1 = vmul.f32 %v11076_v55, %v8200_v24 }
0x104d   : > { %11085 = vrsqrt.f32 %v7871_v39  ;;  %v8216_v42 = vsub.f32 %v8212_v53, %v8214_v21 }
0x104e   : > { %11087 = vrsqrt.f32 %v7870_v56  ;;  %v8215_v23 = vsub.f32 %v8211_v1, %v8213_v58 }
0x104f   : > { %v11082_v25 = vpop.eup %11081  ;;  %v8218_v31 = vmul.f32 %v8216_v42, %v7182_v33  ;;  %v7868_v33 = vsub.f32 %v13151_v63, %v13468_v40 }
0x1050   : > { %v11084_v32 = vpop.eup %11083  ;;  %v8217_v35 = vmul.f32 %v8215_v23, %v7180_v37  ;;  %v7522_v38 = vmul.f32 %v11082_v25, %v7516_v22 }
0x1051   : > { %v8220_v45 = vmax.f32 %v8218_v31, 0.0  ;;  %v7521_v48 = vmul.f32 %v11084_v32, %v7515_v29 }
0x1052   : > { %v8219_v8 = vmax.f32 %v8217_v35, 0.0  ;;  %v7524_v51 = vsub.f32 %v7522_v38, %v13454_v62 }
0x1053   : > { %v8224_v59 = vadd.f32 1e-06, %v8220_v45  ;;  %v7523_v55 = vsub.f32 %v7521_v48, %v13456_v30 }
0x1054   : > { %v8223_v0 = vadd.f32 1e-06, %v8219_v8  ;;  %v7526_v9 = vand.u32 2147483647, %v7524_v51 }
0x1055   : > { %11089 = vrsqrt.f32 %v8224_v59  ;;  %v7525_v57 = vand.u32 2147483647, %v7523_v55 }
0x1056   : > { %11091 = vrsqrt.f32 %v8223_v0  ;;  %v7528_v11 = vmul.f32 %v13324_v36, %v7526_v9 }
0x1057   : > { %v11086_v34 = vpop.eup %11085  ;;  %v7527_v37 = vmul.f32 %v7525_v57, %v13326_v41 }
0x1058   : > { %v11088_v62 = vpop.eup %11087  ;;  %v7530_v13 = vsel %vm552_vm6, %v7528_v11, 0.0  ;;  %v7875_v30 = vmul.f32 %v11086_v34, %v7869_v19 }
0x1059   : > { %v7529_v52 = vsel %vm552_vm6, %v7527_v37, 0.0  ;;  %v7874_v10 = vmul.f32 %v11088_v62, %v7868_v33 }
0x105a   : > { %v7531_v17 = vadd.f32 %v7530_v13, %v7529_v52  ;;  %v7877_v47 = vsub.f32 %v7875_v30, %v13458_v15 }
0x105b   : > { %v7876_v5 = vsub.f32 %v7874_v10, %v13460_v44 }
0x105c   : > { %7532 = vadd.xlane.f32.xlu0 %v7531_v17  ;;  %v7879_v50 = vand.u32 2147483647, %v7877_v47 }
0x105d   : > { %v7878_v43 = vand.u32 2147483647, %v7876_v5 }
0x105e   : > { %v7881_v63 = vmul.f32 %v13324_v36, %v7879_v50 }
0x105f   : > { %v11090_v40 = vpop.eup %11089  ;;  %v7880_v4 = vmul.f32 %v7878_v43, %v13326_v41 }
0x1060   : > { %v11092_v60 = vpop.eup %11091  ;;  %v7883_v61 = vsel %vm552_vm6, %v7881_v63, 0.0  ;;  %v8228_v2 = vmul.f32 %v11090_v40, %v8222_v26 }
0x1061   : > { %v7882_v15 = vsel %vm552_vm6, %v7880_v4, 0.0  ;;  %v8227_v7 = vmul.f32 %v11092_v60, %v8221_v3 }
0x1062   : > { %v7884_v44 = vadd.f32 %v7883_v61, %v7882_v15  ;;  %v8230_v18 = vsub.f32 %v8228_v2, %v13462_v54 }
0x1063   : > { %v8229_v28 = vsub.f32 %v8227_v7, %v13464_v12 }
0x1064   : > { %7885 = vadd.xlane.f32.xlu1 %v7884_v44  ;;  %v8232_v46 = vand.u32 2147483647, %v8230_v18 }
0x1065   : > { %v8231_v6 = vand.u32 2147483647, %v8229_v28 }
0x1066   : > { %v8234_v49 = vmul.f32 %v13324_v36, %v8232_v46 }
0x1067   : > { %v8233_v14 = vmul.f32 %v8231_v6, %v13326_v41 }
0x1068   : > { %8251 = vadd.xlane.f32.xlu1 %v13332_v20  ;;  %v8236_v27 = vsel %vm552_vm6, %v8234_v49, 0.0 }
0x1069   : > { %v8235_v16 = vsel %vm552_vm6, %v8233_v14, 0.0  ;;  %vm8261_vm6 = vcmask 0  }
0x106a   : > { %v8237_v39 = vadd.f32 %v8236_v27, %v8235_v16 }
0x106c   : > { %8238 = vadd.xlane.f32.xlu0 %v8237_v39 }
0x10e9   : > { %v7533_v21 = vpop.xlane.xlu0 %7532 }
0x10ea   : > { %v7534_v53 = vrot.slane %v7533_v21, 4 }
0x10ec   : > { %v7535_v54 = vadd.f32 %v7534_v53, %v7533_v21 }
0x10ee   : > { %v7536_v24 = vrot.slane %v7535_v54, 2 }
0x10f0   : > { %v7537_v12 = vadd.f32 %v7536_v24, %v7535_v54 }
0x10f1   : > { %v7886_v56 = vpop.xlane.xlu1 %7885 }
0x10f2   : > { %v7887_v58 = vrot.slane %v7886_v56, 4  ;;  %v7538_v1 = vrot.slane %v7537_v12, 1 }
0x10f4   : > { %v7888_v42 = vadd.f32 %v7887_v58, %v7886_v56  ;;  %v7539_v36 = vadd.f32 %v7538_v1, %v7537_v12 }
0x10f5   : > { %v8252_v22 = vpop.xlane.xlu1 %8251 }
0x10f6   : > { %v7889_v41 = vrot.slane %v7888_v42, 2  ;;  %v8253_v23 = vrot.slane %v8252_v22, 4  ;;  %11006 = vpush %v7539_v36 }
0x10f8   : > { %v8254_v20 = vadd.f32 %v8253_v23, %v8252_v22  ;;  %v7890_v25 = vadd.f32 %v7889_v41, %v7888_v42 }
0x10f9   : > { %v8239_v29 = vpop.xlane.xlu0 %8238 }
0x10fa   : > { %v8255_v31 = vrot.slane %v8254_v20, 2  ;;  %v8240_v32 = vrot.slane %v8239_v29, 4  ;;  %v7891_v35 = vrot.slane %v7890_v25, 1 }
0x10fc   : > { %v8241_v38 = vadd.f32 %v8240_v32, %v8239_v29  ;;  %v7892_v45 = vadd.f32 %v7891_v35, %v7890_v25  ;;  %v8256_v48 = vadd.f32 %v8255_v31, %v8254_v20 }
0x10fe   : > { %v8242_v8 = vrot.slane %v8241_v38, 2  ;;  %11008 = vpush %v7892_v45  ;;  %v8257_v59 = vrot.slane %v8256_v48, 1 }
0x1100   : > { %v8243_v51 = vadd.f32 %v8242_v8, %v8241_v38  ;;  %v8258_v9 = vadd.f32 %v8257_v59, %v8256_v48 }
0x1102   : > { %v8244_v55 = vrot.slane %v8243_v51, 1 }
0x1104   : > { %v8245_v0 = vadd.f32 %v8244_v55, %v8243_v51 }
0x1106   : > { %11010 = vpush %v8245_v0 }
0x1107   : > { %11012 = vpush %v8258_v9 }
0x1127   : > { %s11007_s12 = spop %11006 }
0x112f   : > { %s11009_s11 = spop %11008 }
0x1130   : > { %s7894_s18 = sadd.f32 %s11009_s11, %s11007_s12 }
0x1137   : > { %s11011_s16 = spop %11010 }
0x1138   : > { %s8247_s20 = sadd.f32 %s11011_s16, %s7894_s18  ;;  %s11013_s22 = spop %11012 }
0x1139   : > { %v8263_v57 = vstv %s11013_s22 }
0x113a   : > { %v8260_v19 = vstv %s8247_s20  ;;  %8264 = vst.msk [vmem:[%s347_s19] sm:$0x1] %vm8261_vm6, %v8263_v57 }
0x113b   : > { %8262 = vst.msk [vmem:[%s344_s24] sm:$0x1] %vm8261_vm6, %v8260_v19 }
0x113c PF: > { %p19_p8 = scmp.ge.s32.totalorder %s11247_s10, 4   ;;  %s13548_s27 = smov %s11156_s28 }
0x113d   : > { %s13549_s28 = smov %s11160_s29  ;;  %s13550_s29 = smov %s11257_s13 }
0x113e   : > { %s13551_s30 = smov %s11247_s10  ;;  %21 = sbr.rel (!%p19_p8) target bundleno = 3 (0x3), region = 103 }
0x1145   :  { %8294 = vsyncpa [#allocation3], 1 }
0x1146   :  { %8296 = vsyncpa [#allocation3 + $0x1], 1 }

</bundles_post_ra>
